<compile_context>
chip_gen: v7x
topology: tpu7x:2x2x1
jax: 0.10.0
libtpu: 0.0.40
codegen_flags: <defaults>
</compile_context>

<pallas_src>
import functools

import numpy as np
import jax
import jax.numpy as jnp
from jax.experimental import pallas as pl
from jax.experimental.pallas import tpu as pltpu

_BN_EPS = 1e-5
_ACT_DTYPE = jnp.bfloat16

_IMAGENET_MEAN = np.array([0.485, 0.456, 0.406], np.float32)
_IMAGENET_STD = np.array([0.229, 0.224, 0.225], np.float32)

# Per-kernel working-set budget used when picking tile sizes (conservative so a
# double-buffered tile set + f32 epilogue temporaries also fit v7x's 64 MiB).
_TILE_BUDGET = 20 * 1024 * 1024


def _round_up(x, m):
    return ((x + m - 1) // m) * m


@functools.lru_cache(maxsize=None)
def _vmem_limit():
    """Generation-aware scoped-VMEM limit: ~100 MiB on 128-MiB parts (v5e/v6e),
    48 MiB on 64-MiB parts (v7x / unknown)."""
    cap = None
    try:
        cap = getattr(pltpu.get_tpu_info(), "vmem_capacity_bytes", None)
    except Exception:
        cap = None
    if not cap:
        cap = 64 * 1024 * 1024
    return 100 * 1024 * 1024 if cap >= 128 * 1024 * 1024 else 48 * 1024 * 1024


@functools.lru_cache(maxsize=None)
def _is_v5e():
    try:
        kind = jax.devices()[0].device_kind.lower()
    except Exception:
        return False
    return ("v5 lite" in kind) or ("v5e" in kind) or ("v5litepod" in kind)


# ----------------------------- Pallas kernels -----------------------------

def _mm_bias_kernel(a_ref, b_ref, c_ref, o_ref, *, relu):
    # out = relu_opt((A @ B) + bias); A, B are bf16, accumulation is f32 (MXU).
    acc = jnp.dot(a_ref[...], b_ref[...], preferred_element_type=jnp.float32)
    out = acc + c_ref[...]
    if relu:
        out = jnp.maximum(out, 0.0)
    o_ref[...] = out.astype(o_ref.dtype)


def _mm_bias_res_kernel(a_ref, b_ref, c_ref, r_ref, o_ref, *, relu):
    # out = relu_opt((A @ B) + bias + residual)
    acc = jnp.dot(a_ref[...], b_ref[...], preferred_element_type=jnp.float32)
    out = acc + c_ref[...] + r_ref[...].astype(jnp.float32)
    if relu:
        out = jnp.maximum(out, 0.0)
    o_ref[...] = out.astype(o_ref.dtype)


def _conv3x3_kernel(x_ref, w_ref, b_ref, o_ref, acc_ref, *, offsets, length, relu):
    # Direct stride-1 3x3 conv, one batch image per grid step, no HBM im2col.
    #   x_ref  : (1, HpWp_pad, Cin)  flattened zero-padded image (bf16)
    #   w_ref  : (9, Cin, TCN)       per-tap weight slabs (BN scale folded)
    #   b_ref  : (1, TCN)            folded-BN bias (f32)
    #   o_ref  : (1, length, TCN)    output rows on the padded-width grid
    #   acc_ref: (length, TCN)       f32 accumulator scratch
    # Tap (di, dj) contributes x_flat[di*Wp + dj + r] @ W[di, dj] to output
    # row r (r = oh*Wp + ow); the Wp-OW throw-away pad columns are cropped by
    # the wrapper.
    for t, off in enumerate(offsets):
        a = x_ref[0, pl.ds(off, length), :]
        p = jnp.dot(a, w_ref[t], preferred_element_type=jnp.float32)
        if t == 0:
            acc_ref[...] = p
        else:
            acc_ref[...] += p
    out = acc_ref[...] + b_ref[...]
    if relu:
        out = jnp.maximum(out, 0.0)
    o_ref[0] = out.astype(o_ref.dtype)


def _head_kernel(x_ref, w_ref, b_ref, o_ref):
    # Fused global-average-pool + FC: mean over spatial, then (N,C)@(C,1000)+b.
    pooled = jnp.mean(x_ref[...].astype(jnp.float32), axis=1)
    acc = jnp.dot(pooled.astype(jnp.bfloat16), w_ref[...],
                  preferred_element_type=jnp.float32)
    o_ref[...] = acc + b_ref[...]


# --------------------------- pallas_call builders ---------------------------

def _choose_tn(N):
    if (not _is_v5e()) and N % 256 == 0:
        return 256          # feed the 256-wide MXU on v6e/v7x
    if N % 128 == 0:
        return 128          # v5e MXU is 128 wide; also trims f32 epilogue tiles
    return N                # small channel counts (64): full-dim block, no pad


def _choose_tiling(M, K, TN, has_res):
    """Pick (Mp, TM).  Prefer blocks that divide M exactly (no pad / slice HBM
    round trips): small M gets a single full-dim block (legal regardless of
    alignment), larger M the biggest exact divisor fitting the VMEM budget."""
    def footprint(tm):
        f = 2 * tm * K * 2            # A tile (bf16, double-buffered)
        f += 2 * K * TN * 2           # weight stripe (bf16, double-buffered)
        f += 2 * tm * TN * 2          # output tile (bf16, double-buffered)
        f += tm * TN * 4              # f32 epilogue temporary
        if has_res:
            f += 2 * tm * TN * 2      # residual tile
        return f

    if M <= 2048 and footprint(M) <= _TILE_BUDGET:
        return M, M                   # no pad, single row stripe
    for tm in (1792, 1536, 1280, 1024, 896, 784, 768, 640, 512, 448, 384,
               320, 256, 224, 192, 160, 128):
        if M % tm == 0 and footprint(tm) <= _TILE_BUDGET:
            return M, tm
    Mp = _round_up(M, 128)            # fallback: pad (unused for these shapes)
    for tm in (512, 256, 128):
        if Mp % tm == 0 and footprint(tm) <= _TILE_BUDGET:
            return Mp, tm
    return Mp, 128


@functools.lru_cache(maxsize=None)
def _matmul_fn(Mp, K, N, TM, TN, relu, has_res):
    kernel = functools.partial(
        _mm_bias_res_kernel if has_res else _mm_bias_kernel, relu=relu)
    in_specs = [
        pl.BlockSpec((TM, K), lambda i, j: (i, 0)),   # A stripe (full K)
        pl.BlockSpec((K, TN), lambda i, j: (0, j)),   # weight stripe (full K)
        pl.BlockSpec((1, TN), lambda i, j: (0, j)),   # bias
    ]
    if has_res:
        in_specs.append(pl.BlockSpec((TM, TN), lambda i, j: (i, j)))
    # j (output columns) is the fastest grid axis, so the A stripe stays
    # resident in VMEM across the sweep over weight column stripes.
    # TODO(synk): for large batches, flip residency (or add K-tiling) when the
    # re-fetched weight stripes exceed the A-stripe traffic.
    f = pl.pallas_call(
        kernel,
        out_shape=jax.ShapeDtypeStruct((Mp, N), _ACT_DTYPE),
        grid=(Mp // TM, N // TN),
        in_specs=in_specs,
        out_specs=pl.BlockSpec((TM, TN), lambda i, j: (i, j)),
        compiler_params=pltpu.CompilerParams(
            dimension_semantics=("parallel", "parallel"),
            vmem_limit_bytes=_vmem_limit()),
    )
    return jax.jit(f)


@functools.lru_cache(maxsize=None)
def _conv3x3_fn(NB, HPWP, L, Cin, Cout, TCN, relu, offsets):
    kernel = functools.partial(_conv3x3_kernel, offsets=offsets,
                               length=L, relu=relu)
    taps = len(offsets)
    # Grid (cout tiles, batch); batch is fastest so the weight block index is
    # unchanged across consecutive steps (fetched once per cout tile).
    f = pl.pallas_call(
        kernel,
        out_shape=jax.ShapeDtypeStruct((NB, L, Cout), _ACT_DTYPE),
        grid=(Cout // TCN, NB),
        in_specs=[
            pl.BlockSpec((1, HPWP, Cin), lambda j, n: (n, 0, 0)),
            pl.BlockSpec((taps, Cin, TCN), lambda j, n: (0, 0, j)),
            pl.BlockSpec((1, TCN), lambda j, n: (0, j)),
        ],
        out_specs=pl.BlockSpec((1, L, TCN), lambda j, n: (n, 0, j)),
        scratch_shapes=[pltpu.VMEM((L, TCN), jnp.float32)],
        compiler_params=pltpu.CompilerParams(
            dimension_semantics=("parallel", "parallel"),
            vmem_limit_bytes=_vmem_limit()),
    )
    return jax.jit(f)


@functools.lru_cache(maxsize=None)
def _head_fn(N, HW, C, NC):
    return jax.jit(pl.pallas_call(
        _head_kernel,
        out_shape=jax.ShapeDtypeStruct((N, NC), jnp.float32),
        compiler_params=pltpu.CompilerParams(vmem_limit_bytes=_vmem_limit()),
    ))


def matmul_bias(a, b, bias, *, relu, residual=None):
    """out = relu_opt(a @ b + bias (+ residual)); a (M,K) bf16, b (K,N) bf16."""
    M, K = a.shape
    _, N = b.shape
    TN = _choose_tn(N)
    Mp, TM = _choose_tiling(M, K, TN, residual is not None)
    if Mp != M:
        a = jnp.pad(a, ((0, Mp - M), (0, 0)))
    args = [a, b, bias]
    if residual is not None:
        if Mp != M:
            residual = jnp.pad(residual, ((0, Mp - M), (0, 0)))
        args.append(residual)
    out = _matmul_fn(Mp, K, N, TM, TN, bool(relu), residual is not None)(*args)
    return out[:M] if Mp != M else out


# ------------------------------ glue / layers ------------------------------

def extract_patches(x, kh, kw, stride, pad):
    """im2col: NHWC -> (N*OH*OW, kh*kw*C), taps ordered (kh, kw, C).
    1x1 convs are a pure reshape (no data expansion).  Only conv1 (7x7) and the
    three stride-2 3x3 convs still take the spatial branch."""
    N, H, W, C = x.shape
    OH = (H + 2 * pad - kh) // stride + 1
    OW = (W + 2 * pad - kw) // stride + 1
    if kh == 1 and kw == 1 and pad == 0:
        if stride != 1:
            x = x[:, ::stride, ::stride, :]
        return x.reshape(N * OH * OW, C), OH, OW
    # TODO(synk): stride-2 spatial convs still materialize bf16 im2col patches
    # in HBM; phase-decomposition would let them reuse the direct 3x3 kernel.
    xp = jnp.pad(x, ((0, 0), (pad, pad), (pad, pad), (0, 0)))
    cols = [xp[:, i:i + stride * OH:stride, j:j + stride * OW:stride, :]
            for i in range(kh) for j in range(kw)]
    patches = jnp.concatenate(cols, axis=-1)
    return patches.reshape(N * OH * OW, kh * kw * C), OH, OW


def _conv3x3_s1(x, w4, bias, *, relu):
    """Direct 3x3 / stride-1 / pad-1 conv via the flattened-offset Pallas
    kernel (no HBM im2col).  Returns NHWC bf16."""
    kh, kw, cin, cout = w4.shape
    N, H, W, C = x.shape
    pad = 1
    Hp, Wp = H + 2 * pad, W + 2 * pad
    OH, OW = H, W
    # One extra zero row at the bottom keeps the largest tap offset in bounds
    # (the kernel computes OH*Wp rows; offsets go up to 2*Wp + 2).
    xp = jnp.pad(x, ((0, 0), (pad, pad + 1), (pad, pad), (0, 0)))
    xflat = xp.reshape(N, (Hp + 1) * Wp, C)
    wmat = jnp.reshape(w4, (kh * kw, cin, cout))
    offsets = tuple(di * Wp + dj for di in range(kh) for dj in range(kw))
    L = OH * Wp
    TCN = _choose_tn(cout)
    y = _conv3x3_fn(N, (Hp + 1) * Wp, L, cin, cout, TCN, bool(relu), offsets)(
        xflat, wmat, bias)
    # Crop the Wp - OW throw-away pad columns per output row.
    return y.reshape(N, OH, Wp, cout)[:, :, :OW, :]


def conv_bn(x, cp, *, stride=1, relu=True, residual=None):
    """Conv (bias-free) with folded BatchNorm (+residual) (+ReLU). x is NHWC bf16."""
    w4, bias = cp["w"], cp["b"]
    kh, kw, cin, cout = w4.shape
    if kh == 3 and kw == 3 and stride == 1 and residual is None:
        return _conv3x3_s1(x, w4, bias, relu=relu)      # direct, no im2col
    pad = (kh - 1) // 2          # resnet: 7x7->3, 3x3->1, 1x1->0
    N = x.shape[0]
    patches, OH, OW = extract_patches(x, kh, kw, stride, pad)
    wmat = w4.reshape(kh * kw * cin, cout)
    res2d = residual.reshape(N * OH * OW, cout) if residual is not None else None
    out = matmul_bias(patches, wmat, bias, relu=relu, residual=res2d)
    return out.reshape(N, OH, OW, cout)


def maxpool_3x3_s2_p1(x):
    # Running maximum over the 9 taps; XLA fuses the strided slices.
    # TODO(synk): a Pallas row-tiled max kernel would avoid the padded copy.
    N, H, W, C = x.shape
    k, s, p = 3, 2, 1
    OH = (H + 2 * p - k) // s + 1
    OW = (W + 2 * p - k) // s + 1
    xp = jnp.pad(x, ((0, 0), (p, p), (p, p), (0, 0)),
                 constant_values=-jnp.inf)
    out = None
    for i in range(k):
        for j in range(k):
            win = xp[:, i:i + s * OH:s, j:j + s * OW:s, :]
            out = win if out is None else jnp.maximum(out, win)
    return out


def head(x, fc_w, fc_b):
    """Fused global average pool + fully-connected classifier (one Pallas call)."""
    N, H, W, C = x.shape
    return _head_fn(N, H * W, C, fc_w.shape[1])(x.reshape(N, H * W, C), fc_w, fc_b)


def preprocess(x_nchw):
    """Resize(256) -> CenterCrop(224) -> subtract channel mean -> NHWC bf16.
    The 1/std of Normalize (and conv1's BN scale) is folded into conv1's
    weights, so only the mean subtraction remains here (zero-padding semantics
    of conv1 are preserved exactly)."""
    N, C, H, W = x_nchw.shape
    # TODO(synk): torchvision's antialiased bilinear Resize(256) is not
    # reproduced exactly; plain bilinear resize is used.
    if H <= W:
        nh, nw = 256, int(round(256 * W / H))
    else:
        nh, nw = int(round(256 * H / W)), 256
    x = jax.image.resize(x_nchw, (N, C, nh, nw), method="bilinear")
    t = (nh - 224) // 2
    l = (nw - 224) // 2
    x = x[:, :, t:t + 224, l:l + 224]
    x = jnp.transpose(x, (0, 2, 3, 1))                  # NHWC
    x = x - jnp.asarray(_IMAGENET_MEAN)                 # per-channel mean
    return x.astype(_ACT_DTYPE)


# ------------------------------- parameters -------------------------------
# TODO(synk): pretrained torch.hub weights are not loaded; parameters are
# deterministic synthetic He-init with identity BatchNorm running stats.

def _make_conv(key, kh, kw, cin, cout, in_scale=None):
    fan_in = kh * kw * cin
    w = jax.random.normal(key, (kh, kw, cin, cout), jnp.float32) * np.sqrt(2.0 / fan_in)
    # Fold eval-mode BN scale (gamma=1, beta=0, mean=0, var=1) into the weight.
    w = w * np.float32(1.0 / np.sqrt(1.0 + _BN_EPS))
    if in_scale is not None:     # fold preprocessing 1/std per input channel
        w = w * jnp.asarray(in_scale, jnp.float32).reshape(1, 1, cin, 1)
    return {"w": w.astype(jnp.bfloat16),
            "b": jnp.zeros((1, cout), jnp.float32)}


def _make_bottleneck(key, cin, planes, stride):
    k1, k2, k3, k4 = jax.random.split(key, 4)
    blk = {
        "c1": _make_conv(k1, 1, 1, cin, planes),
        "c2": _make_conv(k2, 3, 3, planes, planes),
        "c3": _make_conv(k3, 1, 1, planes, planes * 4),
    }
    if stride != 1 or cin != planes * 4:
        blk["down"] = _make_conv(k4, 1, 1, cin, planes * 4)
    return blk


_LAYER_CFG = ((64, 3, 1), (128, 4, 2), (256, 6, 2), (512, 3, 2))


def init_resnet50_params(key):
    ki = iter(jax.random.split(key, 64))
    params = {"conv1": _make_conv(next(ki), 7, 7, 3, 64,
                                  in_scale=1.0 / _IMAGENET_STD)}
    inplanes = 64
    layers = []
    for planes, nblocks, stride in _LAYER_CFG:
        blocks = []
        for b in range(nblocks):
            s = stride if b == 0 else 1
            blocks.append(_make_bottleneck(next(ki), inplanes, planes, s))
            inplanes = planes * 4
        layers.append(blocks)
    params["layers"] = layers
    kfc = next(ki)
    params["fc_w"] = (jax.random.normal(kfc, (2048, 1000), jnp.float32)
                      * np.sqrt(1.0 / 2048)).astype(jnp.bfloat16)
    params["fc_b"] = jnp.zeros((1, 1000), jnp.float32)
    return params


# --------------------------------- forward ---------------------------------

def bottleneck_forward(x, blk, stride):
    if "down" in blk:
        identity = conv_bn(x, blk["down"], stride=stride, relu=False)
    else:
        identity = x
    out = conv_bn(x, blk["c1"], stride=1, relu=True)
    out = conv_bn(out, blk["c2"], stride=stride, relu=True)
    # conv3 + bn3 + residual add + relu fused into a single Pallas matmul.
    out = conv_bn(out, blk["c3"], stride=1, relu=True, residual=identity)
    return out


def resnet50_forward(params, x_nchw):
    x = preprocess(x_nchw)                                  # (N,224,224,3) bf16
    x = conv_bn(x, params["conv1"], stride=2, relu=True)    # (N,112,112,64)
    x = maxpool_3x3_s2_p1(x)                                # (N,56,56,64)
    for li, blocks in enumerate(params["layers"]):
        layer_stride = _LAYER_CFG[li][2]
        for bi, blk in enumerate(blocks):
            s = layer_stride if bi == 0 else 1
            x = bottleneck_forward(x, blk, s)               # ... (N,7,7,2048)
    logits = head(x, params["fc_w"], params["fc_b"])        # (N,1000) f32
    # (reference module also prints shape / tensor / sum as debug side-effects)
    return logits


if __name__ == "__main__":
    key = jax.random.PRNGKey(0)
    kx, kp = jax.random.split(key)
    # Small NCHW input image batch in [0,1]; preprocess resizes to 224x224.
    x = jax.random.uniform(kx, (2, 3, 64, 64), dtype=jnp.float32)
    params = init_resnet50_params(kp)
    fwd = jax.jit(resnet50_forward)
    out = jax.block_until_ready(fwd(params, x))
    assert out.shape == (2, 1000), out.shape
    assert bool(jnp.all(jnp.isfinite(out)))
    print("KERNEL_OK")
</pallas_src>

<mosaic_0001>
module attributes {stable_mosaic.version = 11 : i64} {
  func.func @_mm_bias_kernel(%arg0: i32, %arg1: i32, %arg2: memref<1792x147xbf16, #tpu.memory_space<vmem>>, %arg3: memref<147x64xbf16, #tpu.memory_space<vmem>>, %arg4: memref<1x64xf32, #tpu.memory_space<vmem>>, %arg5: memref<1792x64xbf16, #tpu.memory_space<vmem>>) attributes {dimension_semantics = [#tpu.dimension_semantics<parallel>, #tpu.dimension_semantics<parallel>], iteration_bounds = array<i64: 14, 1>, scalar_prefetch = 0 : i64, scratch_operands = 0 : i64, tpu.core_type = #tpu.core_type<tc>, window_params = [{transform_indices = @transform_0, window_bounds = array<i64: 1792, 147>}, {transform_indices = @transform_1, window_bounds = array<i64: 147, 64>}, {transform_indices = @transform_2, window_bounds = array<i64: 1, 64>}, {transform_indices = @transform_3, window_bounds = array<i64: 1792, 64>}]} {
    %c0 = arith.constant 0 : index
    %c0_0 = arith.constant 0 : index
    %0 = vector.load %arg2[%c0, %c0_0] : memref<1792x147xbf16, #tpu.memory_space<vmem>>, vector<1792x147xbf16>
    %c0_1 = arith.constant 0 : index
    %c0_2 = arith.constant 0 : index
    %1 = vector.load %arg3[%c0_1, %c0_2] : memref<147x64xbf16, #tpu.memory_space<vmem>>, vector<147x64xbf16>
    %cst = arith.constant dense<0.000000e+00> : vector<1792x64xf32>
    %2 = tpu.matmul %0, %1, %cst {dimension_numbers = #tpu.dot_dimension_numbers<[1], [0], [0], [1], [0, 0, 1, 1], [], []>} : vector<1792x147xbf16>, vector<147x64xbf16>, vector<1792x64xf32> -> vector<1792x64xf32>
    %c0_3 = arith.constant 0 : index
    %c0_4 = arith.constant 0 : index
    %3 = vector.load %arg4[%c0_3, %c0_4] : memref<1x64xf32, #tpu.memory_space<vmem>>, vector<1x64xf32>
    %4 = vector.broadcast %3 : vector<1x64xf32> to vector<1792x64xf32>
    %5 = arith.addf %2, %4 : vector<1792x64xf32>
    %cst_5 = arith.constant 0.000000e+00 : f32
    %6 = vector.broadcast %cst_5 : f32 to vector<1792x64xf32>
    %7 = arith.maximumf %5, %6 : vector<1792x64xf32>
    %8 = arith.truncf %7 : vector<1792x64xf32> to vector<1792x64xbf16>
    %c0_6 = arith.constant 0 : index
    %c0_7 = arith.constant 0 : index
    %9 = vector.load %arg5[%c0_6, %c0_7] : memref<1792x64xbf16, #tpu.memory_space<vmem>>, vector<1792x64xbf16>
    tpu.vector_store %arg5[%c0_6, %c0_7], %8 {strides = array<i32>} : memref<1792x64xbf16, #tpu.memory_space<vmem>>, vector<1792x64xbf16>,
    return
  }
  func.func @transform_0(%arg0: i32, %arg1: i32) -> (i32, i32) {
    %c0_i32 = arith.constant 0 : i32
    %c0_i32_0 = arith.constant 0 : i32
    return %arg0, %c0_i32 : i32, i32
  }
  func.func @transform_1(%arg0: i32, %arg1: i32) -> (i32, i32) {
    %c0_i32 = arith.constant 0 : i32
    %c0_i32_0 = arith.constant 0 : i32
    return %c0_i32, %arg1 : i32, i32
  }
  func.func @transform_2(%arg0: i32, %arg1: i32) -> (i32, i32) {
    %c0_i32 = arith.constant 0 : i32
    %c0_i32_0 = arith.constant 0 : i32
    return %c0_i32, %arg1 : i32, i32
  }
  func.func @transform_3(%arg0: i32, %arg1: i32) -> (i32, i32) {
    %c0_i32 = arith.constant 0 : i32
    return %arg0, %arg1 : i32, i32
  }
}

</mosaic_0001>

<bundles_post_ra>
// kernel: tpu_custom_call.1
= control target key start
LH: loop header
LB: loop body
LE: loop exit
PB: predicated region body
PF: predicated region fallthrough
CT: control target
= control target key end

     0   :  { %8 = vsyncpa [#allocation3], 0  ;;  %s6786_s0 = inlined_call_operand.vmem [shape: bf16[25088,147], index: 0, kind: input, shape index: {}]   ;;  %s6787_s1 = inlined_call_operand.vmem [shape: bf16[147,64], index: 1, kind: input, shape index: {}]   ;;  %s6788_s2 = inlined_call_operand.vmem [shape: f32[1,64], index: 2, kind: input, shape index: {}]   ;;  %s6789_s3 = inlined_call_operand.hbm [shape: bf16[25088,64], index: 3, kind: output, shape index: {}]  }
   0x1   :  { %10 = vsyncpa [#allocation3 + $0x1], 0  ;;  %s5611_s12 = smov 0   ;;  %s5613_s13 = smov 0  }
   0x2   :  { %s5615_s14 = smov 0   ;;  %s5617_s15 = smov 0  }
   0x3   :  { %s5619_s16 = smov 0   ;;  %s5621_s17 = smov 0  }
   0x4 LB: > { %s4268_s18 = sadd.s32 4294967295, %s5584_s17   ;;  %s4269_s19 = sadd.s32 4294967294, %s5584_s17   ;;  %s5584_s17 = sphi %s5621_s17, %s16_s17   ;;  %s5580_s16 = sphi %s5619_s16, %s6796_s16   ;;  %s5576_s15 = sphi %s5617_s15, %s6795_s15   ;;  %s5572_s14 = sphi %s5615_s14, %s6794_s14   ;;  %s5568_s13 = sphi %s5613_s13, %s6793_s13   ;;  %s5564_s12 = sphi %s5611_s12, %s6792_s12  }
   0x5   : > { %s28_s20 = sadd.s32 1, %s5580_s16  ;;  %s115_s21 = sadd.s32 1, %s5572_s14 }
   0x6   : > { %p30_p0 = scmp.ge.s32.totalorder %s28_s20, 14  ;;  %p125_p1 = scmp.ne.s32.totalorder %s5572_s14, %s5568_s13 }
   0x7   : > { %p126_p2 = scmp.eq.s32.totalorder %s4268_s18, 13  ;;  %p131_p3 = scmp.ne.s32.totalorder %s5568_s13, %s5564_s12 }
   0x8   : > { %s6798_s20 = smov (%p30_p0, %s28_s20), 0  ;;  %p132_p5 = scmp.eq.s32.totalorder %s4269_s19, 13 }
   0x9   : > { %p5651_p4 = por %p126_p2, %p125_p1  ;;  %s110_s23 = ssub.s32 %s5580_s16, %s6798_s20 }
   0xa   : > { %p4274_p6 = scmp.ge.s32.totalorder %s5584_s17, 1  ;;  %p113_p7 = scmp.eq.s32.totalorder %s110_s23, 0 }
   0xb   : > { %p5658_p8 = por %p132_p5, %p131_p3  ;;  %p173_p9 = scmp.lt.s32.totalorder %s5584_s17, 15 }
   0xc   : > { %s5664_s25 = scalar_select %p113_p7, %s5572_s14, %s115_s21  }
   0xd   : > { %p174_p10 = pnand %p4274_p6, %p173_p9 }
   0xe   : > { %v5157_v0 = vld [vmem:[%s6787_s1] sm:$0xff] (!%p174_p10)   ;;  %v5586_v1 = vmov (!%p174_p10), 0   ;;  %v5158_v2 = vld [vmem:[%s6787_s1 + $0x8] sm:$0xff] (!%p174_p10)   ;;  %v5159_v3 = vld [vmem:[%s6787_s1 + $0x10] sm:$0xff] (!%p174_p10)   ;;  %s205_s5 = smul.u32 (!%p174_p10), 224, %s5576_s15  ;;  %vm1536_vm0 = vcmask (!%p174_p10), 154624  }
   0xf   : > { %177 = sbr.rel (%p174_p10) target bundleno = 730 (0x2da), region = 32  ;;  %1880 = vmatprep.subr.bf16.mxu0 (!%p174_p10), %v5586_v1  ;;  %5077 = vmatprep.subr.bf16.mxu1 (!%p174_p10), %v5586_v1  ;;  %v5160_v4 = vld [vmem:[%s6787_s1 + $0x18] sm:$0xff] (!%p174_p10)   ;;  %v5161_v5 = vld [vmem:[%s6787_s1 + $0x20] sm:$0xff] (!%p174_p10)   ;;  %v5162_v8 = vld [vmem:[%s6787_s1 + $0x28] sm:$0xff] (!%p174_p10)   ;;  %vm1873_vm1 = vcmask (!%p174_p10), 1040384   ;;  %vm1874_vm2 = vcmask (!%p174_p10), 1041408  }
  0x10   : > { %1881 = vmatpush1.bf16.msra.mxu0 (!%p174_p10), %v5157_v0  ;;  %5087 = vmatpush1.bf16.msra.mxu1 (!%p174_p10), %v5157_v0  ;;  %p206_p11 = scmp.lt.s32.totalorder (!%p174_p10), %s205_s5, 3135  ;;  %v5163_v9 = vld [vmem:[%s6787_s1 + $0x30] sm:$0xff] (!%p174_p10)   ;;  %v5164_v10 = vld [vmem:[%s6787_s1 + $0x38] sm:$0xff] (!%p174_p10)   ;;  %v5587_v11 = vmov (!%p174_p10), 65535   ;;  %v5165_v13 = vld [vmem:[%s6787_s1 + $0x40] sm:$0xff] (!%p174_p10)   ;;  %s202_s7 = sand.u32 (!%p174_p10), 1, %s5568_s13  }
  0x11   : > { %1882 = vmatprep.subr.bf16.mxu0 (!%p174_p10), %v5586_v1  ;;  %5078 = vmatprep.subr.bf16.mxu1 (!%p174_p10), %v5586_v1  ;;  %v1875_v12 = vsel (!%p174_p10), %vm1873_vm1, 4294967295, %v5587_v11  ;;  %v5166_v14 = vld [vmem:[%s6787_s1 + $0x48] ss:$0 sps:$4 sm:$0x33] (!%p174_p10)   ;;  %s5097_s10 = smul.u32 (!%p174_p10), 896, %s202_s7  ;;  %vm3929_vm3 = vcmask (!%p174_p10), 519168  }
  0x12   : > { %v1876_v15 = vsel (!%p174_p10), %vm1874_vm2, %v1875_v12, 0  ;;  %s5076_s28 = smul.u32 (!%p174_p10), 14336, %s5576_s15  ;;  %s6740_s15 = scalar_lea.sflag (!%p174_p10), [#allocation3], %s202_s7 }
  0x13   : > { %v1878_v16 = vand.u32 (!%p174_p10), %v5166_v14, %v1876_v15  ;;  %s5886_s18 = scalar_lea.vmem (!%p174_p10), [#allocation2], %s5097_s10 }
  0x14   : > { %1883 = vmatpush1.bf16.msra.mxu0 (!%p174_p10), %v5158_v2  ;;  %5088 = vmatpush1.bf16.msra.mxu1 (!%p174_p10), %v5158_v2  ;;  %s4169_s29 = sshll.u32 (!%p174_p10), %s5886_s18, 4  ;;  %s6728_s29 = int_to_ptr.vmem [resolvable:$true] %s4169_s29 }
  0x15   : > { %1884 = vmatprep.subr.bf16.mxu0 (!%p174_p10), %v5586_v1  ;;  %5079 = vmatprep.subr.bf16.mxu1 (!%p174_p10), %v5586_v1  ;;  %s5506_s6 = scalar_lea.vmem (!%p174_p10), %s6728_s29, 14336 }
  0x16   : > { %s6800_s5 = smov (!%p206_p11, %s205_s5), 3135  ;;  %p5507_p12 = scmp.ne.s32.totalorder %s6728_s29, %s5506_s6 }
  0x17   : > { %s4851_s8 = sshll.u32 %s6800_s5, 3  ;;  %s6726_s5 = scalar_lea.hbm %s6789_s3, %s5076_s28 }
  0x18   : > { %1885 = vmatpush1.bf16.msra.mxu0 %v5159_v3  ;;  %5089 = vmatpush1.bf16.msra.mxu1 %v5159_v3  ;;  %s5682_s11 = scalar_lea.vmem %s6786_s0, %s4851_s8  ;;  %p5508_p13 = pnand %p5507_p12, %p5651_p4 }
  0x19   : > { %1886 = vmatprep.subr.bf16.mxu0 %v5586_v1  ;;  %5080 = vmatprep.subr.bf16.mxu1 %v5586_v1  ;;  %v5169_v6 = vld [vmem:[%s5682_s11 + $0x4] ss:$8 sps:$4 sm:$0xff]   ;;  %v5167_v17 = vld [vmem:[%s5682_s11] ss:$8 sps:$4 sm:$0xff]   ;;  %v5173_v19 = vld [vmem:[%s5682_s11 + $0x14] ss:$8 sps:$4 sm:$0xff]  }
  0x1a   : > { %v5172_v7 = vld [vmem:[%s5682_s11 + $0x384] ss:$8 sps:$4 sm:$0xff]   ;;  %4512 = vmatprep.mubr.msk.bf16.mxu0 %vm1536_vm0, %v5169_v6  ;;  %v5170_v18 = vld [vmem:[%s5682_s11 + $0x380] ss:$8 sps:$4 sm:$0xff]   ;;  %v5175_v20 = vld [vmem:[%s5682_s11 + $0x394] ss:$8 sps:$4 sm:$0xff]   ;;  %p5509_p0 = pneg %p5508_p13 }
  0x1b   : > { %4568 = vmatprep.mubr.msk.bf16.mxu1 %vm1536_vm0, %v5172_v7  ;;  %v5177_v21 = vld [vmem:[%s5682_s11 + $0x10] ss:$8 sps:$4 sm:$0xff]   ;;  %v5179_v23 = vld [vmem:[%s5682_s11 + $0x24] ss:$8 sps:$4 sm:$0xff]   ;;  %v5183_v25 = vld [vmem:[%s5682_s11 + $0x20] ss:$8 sps:$4 sm:$0xff]  }
  0x1c   : > { %1887 = vmatpush1.bf16.msra.mxu0 %v5160_v4  ;;  %5090 = vmatpush1.bf16.msra.mxu1 %v5160_v4  ;;  %v5178_v22 = vld [vmem:[%s5682_s11 + $0x390] ss:$8 sps:$4 sm:$0xff]   ;;  %v5181_v24 = vld [vmem:[%s5682_s11 + $0x3a4] ss:$8 sps:$4 sm:$0xff]   ;;  %v5184_v26 = vld [vmem:[%s5682_s11 + $0x3a0] ss:$8 sps:$4 sm:$0xff]  }
  0x1d   : > { %1888 = vmatprep.subr.bf16.mxu0 %v5586_v1  ;;  %5081 = vmatprep.subr.bf16.mxu1 %v5586_v1  ;;  %v5185_v27 = vld [vmem:[%s5682_s11 + $0x34] ss:$8 sps:$4 sm:$0xff]   ;;  %v5189_v29 = vld [vmem:[%s5682_s11 + $0x30] ss:$8 sps:$4 sm:$0xff]   ;;  %v5191_v31 = vld [vmem:[%s5682_s11 + $0x44] ss:$8 sps:$4 sm:$0xff]  }
  0x1e   : > { %v5187_v28 = vld [vmem:[%s5682_s11 + $0x3b4] ss:$8 sps:$4 sm:$0xff]   ;;  %v5190_v30 = vld [vmem:[%s5682_s11 + $0x3b0] ss:$8 sps:$4 sm:$0xff]   ;;  %v5193_v32 = vld [vmem:[%s5682_s11 + $0x3c4] ss:$8 sps:$4 sm:$0xff]  }
  0x1f   : > { %v5195_v33 = vld [vmem:[%s5682_s11 + $0x40] ss:$8 sps:$4 sm:$0xff]   ;;  %v5197_v35 = vld [vmem:[%s5682_s11 + $0x54] ss:$8 sps:$4 sm:$0xff]   ;;  %v5201_v37 = vld [vmem:[%s5682_s11 + $0x50] ss:$8 sps:$4 sm:$0xff]  }
  0x20   : > { %1889 = vmatpush1.bf16.msra.mxu0 %v5161_v5  ;;  %5091 = vmatpush1.bf16.msra.mxu1 %v5161_v5  ;;  %v5196_v34 = vld [vmem:[%s5682_s11 + $0x3c0] ss:$8 sps:$4 sm:$0xff]   ;;  %v5199_v36 = vld [vmem:[%s5682_s11 + $0x3d4] ss:$8 sps:$4 sm:$0xff]   ;;  %v5202_v38 = vld [vmem:[%s5682_s11 + $0x3d0] ss:$8 sps:$4 sm:$0xff]  }
  0x21   : > { %1890 = vmatprep.subr.bf16.mxu0 %v5586_v1  ;;  %5082 = vmatprep.subr.bf16.mxu1 %v5586_v1  ;;  %v5203_v39 = vld [vmem:[%s5682_s11 + $0x64] ss:$8 sps:$4 sm:$0xff]   ;;  %v5207_v41 = vld [vmem:[%s5682_s11 + $0x60] ss:$8 sps:$4 sm:$0xff]   ;;  %v5209_v43 = vld [vmem:[%s5682_s11 + $0x74] ss:$8 sps:$4 sm:$0xff]  }
  0x22   : > { %v5205_v40 = vld [vmem:[%s5682_s11 + $0x3e4] ss:$8 sps:$4 sm:$0xff]   ;;  %v5208_v42 = vld [vmem:[%s5682_s11 + $0x3e0] ss:$8 sps:$4 sm:$0xff]   ;;  %v5211_v44 = vld [vmem:[%s5682_s11 + $0x3f4] ss:$8 sps:$4 sm:$0xff]  }
  0x23   : > { %v5213_v45 = vld [vmem:[%s5682_s11 + $0x70] ss:$8 sps:$4 sm:$0xff]   ;;  %v5215_v47 = vld [vmem:[%s5682_s11 + $0x84] ss:$8 sps:$4 sm:$0xff]   ;;  %v5219_v49 = vld [vmem:[%s5682_s11 + $0x80] ss:$8 sps:$4 sm:$0xff]  }
  0x24   : > { %1891 = vmatpush1.bf16.msra.mxu0 %v5162_v8  ;;  %5092 = vmatpush1.bf16.msra.mxu1 %v5162_v8  ;;  %v5214_v46 = vld [vmem:[%s5682_s11 + $0x3f0] ss:$8 sps:$4 sm:$0xff]   ;;  %v5217_v48 = vld [vmem:[%s5682_s11 + $0x404] ss:$8 sps:$4 sm:$0xff]   ;;  %v5220_v50 = vld [vmem:[%s5682_s11 + $0x400] ss:$8 sps:$4 sm:$0xff]  }
  0x25   : > { %1892 = vmatprep.subr.bf16.mxu0 %v5586_v1  ;;  %5083 = vmatprep.subr.bf16.mxu1 %v5586_v1  ;;  %v5221_v51 = vld [vmem:[%s5682_s11 + $0x94] ss:$8 sps:$4 sm:$0xff]   ;;  %v5225_v53 = vld [vmem:[%s5682_s11 + $0x90] ss:$8 sps:$4 sm:$0xff]   ;;  %v5227_v55 = vld [vmem:[%s5682_s11 + $0xa4] ss:$8 sps:$4 sm:$0xff]  }
  0x26   : > { %v5223_v52 = vld [vmem:[%s5682_s11 + $0x414] ss:$8 sps:$4 sm:$0xff]   ;;  %v5226_v54 = vld [vmem:[%s5682_s11 + $0x410] ss:$8 sps:$4 sm:$0xff]   ;;  %v5229_v56 = vld [vmem:[%s5682_s11 + $0x424] ss:$8 sps:$4 sm:$0xff]  }
  0x27   : > { %v5231_v57 = vld [vmem:[%s5682_s11 + $0xa0] ss:$8 sps:$4 sm:$0xff]   ;;  %v5233_v59 = vld [vmem:[%s5682_s11 + $0xb4] ss:$8 sps:$4 sm:$0xff]   ;;  %v5237_v61 = vld [vmem:[%s5682_s11 + $0xb0] ss:$8 sps:$4 sm:$0xff]  }
  0x28   : > { %1893 = vmatpush1.bf16.msra.mxu0 %v5163_v9  ;;  %5093 = vmatpush1.bf16.msra.mxu1 %v5163_v9  ;;  %v5232_v58 = vld [vmem:[%s5682_s11 + $0x420] ss:$8 sps:$4 sm:$0xff]   ;;  %v5235_v60 = vld [vmem:[%s5682_s11 + $0x434] ss:$8 sps:$4 sm:$0xff]   ;;  %v5238_v62 = vld [vmem:[%s5682_s11 + $0x430] ss:$8 sps:$4 sm:$0xff]  }
  0x29   : > { %1894 = vmatprep.subr.bf16.mxu0 %v5586_v1  ;;  %5084 = vmatprep.subr.bf16.mxu1 %v5586_v1  ;;  %v5239_v63 = vld [vmem:[%s5682_s11 + $0xc4] ss:$8 sps:$4 sm:$0xff]   ;;  %v5244_v2 = vld [vmem:[%s5682_s11 + $0x440] ss:$8 sps:$4 sm:$0xff]   ;;  %v5245_v3 = vld [vmem:[%s5682_s11 + $0xd4] ss:$8 sps:$4 sm:$0xff]  }
  0x2a   : > { %v5241_v0 = vld [vmem:[%s5682_s11 + $0x444] ss:$8 sps:$4 sm:$0xff]   ;;  %v5247_v4 = vld [vmem:[%s5682_s11 + $0x454] ss:$8 sps:$4 sm:$0xff]   ;;  %v5249_v5 = vld [vmem:[%s5682_s11 + $0xd0] ss:$8 sps:$4 sm:$0xff]  }
  0x2b   : > { %v5250_v6 = vld [vmem:[%s5682_s11 + $0x450] ss:$8 sps:$4 sm:$0xff]   ;;  %v5251_v7 = vld [vmem:[%s5682_s11 + $0xe4] ss:$8 sps:$4 sm:$0xff]   ;;  %v5255_v9 = vld [vmem:[%s5682_s11 + $0xe0] ss:$8 sps:$4 sm:$0xff]  }
  0x2c   : > { %1895 = vmatpush1.bf16.msra.mxu0 %v5164_v10  ;;  %5094 = vmatpush1.bf16.msra.mxu1 %v5164_v10  ;;  %v5253_v8 = vld [vmem:[%s5682_s11 + $0x464] ss:$8 sps:$4 sm:$0xff]   ;;  %v5256_v10 = vld [vmem:[%s5682_s11 + $0x460] ss:$8 sps:$4 sm:$0xff]   ;;  %v5257_v11 = vld [vmem:[%s5682_s11 + $0xf4] ss:$8 sps:$4 sm:$0xff]  }
  0x2d   : > { %1896 = vmatprep.subr.bf16.mxu0 %v5586_v1  ;;  %5085 = vmatprep.subr.bf16.mxu1 %v5586_v1  ;;  %v5259_v12 = vld [vmem:[%s5682_s11 + $0x474] ss:$8 sps:$4 sm:$0xff]   ;;  %v5262_v14 = vld [vmem:[%s5682_s11 + $0x470] ss:$8 sps:$4 sm:$0xff]   ;;  %v5263_v15 = vld [vmem:[%s5682_s11 + $0x104] ss:$8 sps:$4 sm:$0xff]  }
  0x2e   : > { %s5588_s8 = smov [#allocation2]  }
  0x2f   : > { %s5510_s9 = sshll.u32 %s5588_s8, 4  ;;  %s5511_s9 = int_to_ptr.vmem [resolvable:$false] %s5510_s9 }
  0x30   : > { %1897 = vmatpush1.bf16.msra.mxu0 %v5165_v13  ;;  %5095 = vmatpush1.bf16.msra.mxu1 %v5165_v13  ;;  %v5261_v13 = vld [vmem:[%s5682_s11 + $0xf0] ss:$8 sps:$4 sm:$0xff]   ;;  %s5512_s10 = scalar_lea.vmem %s5511_s9, 28672  ;;  %p5513_p1 = scmp.lt.s32.totalorder %s6728_s29, %s5511_s9 }
  0x31   : > { %1898 = vmatprep.subr.bf16.mxu0 %v5586_v1  ;;  %5086 = vmatprep.subr.bf16.mxu1 %v5586_v1  ;;  %v5243_v1 = vld [vmem:[%s5682_s11 + $0xc0] ss:$8 sps:$4 sm:$0xff]   ;;  %p5514_p2 = scmp.lt.s32.totalorder %s5512_s10, %s5506_s6 }
  0x33   : > { %p5515_p3 = por %p5514_p2, %p5513_p1 }
  0x34   : > { %1899 = vmatpush1.bf16.msra.mxu0 %v1878_v16  ;;  %5096 = vmatpush1.bf16.msra.mxu1 %v1878_v16  ;;  %v5265_v16 = vld [vmem:[%s5682_s11 + $0x484] ss:$8 sps:$4 sm:$0xff]  }
  0x35   : > { %p5516_p5 = pnand %p5515_p3, %p5509_p0 }
  0x37   : > { %1913 = vmatmul.mubr.bf16.vlgmr.msra.gmra.mrb[0].mxu0 %v5167_v17  ;;  %2361 = vmatmul.mubr.bf16.vlgmr.msra.gmra.mrb[0].mxu1 %v5170_v18  ;;  %v5267_v17 = vld [vmem:[%s5682_s11 + $0x100] ss:$8 sps:$4 sm:$0xff]  }
  0x38   : > { %4513 = vmatprep.mubr.msk.bf16.mxu0 %vm1536_vm0, %v5173_v19  ;;  %4569 = vmatprep.mubr.msk.bf16.mxu1 %vm1536_vm0, %v5175_v20  ;;  %v5268_v18 = vld [vmem:[%s5682_s11 + $0x480] ss:$8 sps:$4 sm:$0xff]   ;;  %v5269_v19 = vld [vmem:[%s5682_s11 + $0x114] ss:$8 sps:$4 sm:$0xff]  }
  0x39   : > { %v5271_v20 = vld [vmem:[%s5682_s11 + $0x494] ss:$8 sps:$4 sm:$0xff]  }
  0x3f   : > { %1921 = vmatmul.mubr.bf16.gmra.mrb[4].mxu0 %v5177_v21  ;;  %2369 = vmatmul.mubr.bf16.gmra.mrb[4].mxu1 %v5178_v22  ;;  %v5273_v21 = vld [vmem:[%s5682_s11 + $0x110] ss:$8 sps:$4 sm:$0xff]  }
  0x40   : > { %4514 = vmatprep.mubr.msk.bf16.mxu0 %vm1536_vm0, %v5179_v23  ;;  %4570 = vmatprep.mubr.msk.bf16.mxu1 %vm1536_vm0, %v5181_v24  ;;  %v5274_v22 = vld [vmem:[%s5682_s11 + $0x490] ss:$8 sps:$4 sm:$0xff]   ;;  %v5275_v23 = vld [vmem:[%s5682_s11 + $0x124] ss:$8 sps:$4 sm:$0xff]  }
  0x41   : > { %v5277_v24 = vld [vmem:[%s5682_s11 + $0x4a4] ss:$8 sps:$4 sm:$0xff]  }
  0x47   : > { %1929 = vmatmul.mubr.bf16.gmra.mrb[8].mxu0 %v5183_v25  ;;  %2377 = vmatmul.mubr.bf16.gmra.mrb[8].mxu1 %v5184_v26  ;;  %v5279_v25 = vld [vmem:[%s5682_s11 + $0x120] ss:$8 sps:$4 sm:$0xff]  }
  0x48   : > { %4515 = vmatprep.mubr.msk.bf16.mxu0 %vm1536_vm0, %v5185_v27  ;;  %4571 = vmatprep.mubr.msk.bf16.mxu1 %vm1536_vm0, %v5187_v28  ;;  %v5280_v26 = vld [vmem:[%s5682_s11 + $0x4a0] ss:$8 sps:$4 sm:$0xff]   ;;  %v5281_v27 = vld [vmem:[%s5682_s11 + $0x134] ss:$8 sps:$4 sm:$0xff]  }
  0x49   : > { %v5283_v28 = vld [vmem:[%s5682_s11 + $0x4b4] ss:$8 sps:$4 sm:$0xff]  }
  0x4f   : > { %1937 = vmatmul.mubr.bf16.gmra.mrb[12].mxu0 %v5189_v29  ;;  %2385 = vmatmul.mubr.bf16.gmra.mrb[12].mxu1 %v5190_v30  ;;  %v5285_v29 = vld [vmem:[%s5682_s11 + $0x130] ss:$8 sps:$4 sm:$0xff]  }
  0x50   : > { %4516 = vmatprep.mubr.msk.bf16.mxu0 %vm1536_vm0, %v5191_v31  ;;  %4572 = vmatprep.mubr.msk.bf16.mxu1 %vm1536_vm0, %v5193_v32  ;;  %v5286_v30 = vld [vmem:[%s5682_s11 + $0x4b0] ss:$8 sps:$4 sm:$0xff]   ;;  %v5287_v31 = vld [vmem:[%s5682_s11 + $0x144] ss:$8 sps:$4 sm:$0xff]  }
  0x51   : > { %v5289_v32 = vld [vmem:[%s5682_s11 + $0x4c4] ss:$8 sps:$4 sm:$0xff]  }
  0x57   : > { %1945 = vmatmul.mubr.bf16.gmra.mrb[16].mxu0 %v5195_v33  ;;  %2393 = vmatmul.mubr.bf16.gmra.mrb[16].mxu1 %v5196_v34  ;;  %v5291_v33 = vld [vmem:[%s5682_s11 + $0x140] ss:$8 sps:$4 sm:$0xff]  }
  0x58   : > { %4517 = vmatprep.mubr.msk.bf16.mxu0 %vm1536_vm0, %v5197_v35  ;;  %4573 = vmatprep.mubr.msk.bf16.mxu1 %vm1536_vm0, %v5199_v36  ;;  %v5292_v34 = vld [vmem:[%s5682_s11 + $0x4c0] ss:$8 sps:$4 sm:$0xff]   ;;  %v5293_v35 = vld [vmem:[%s5682_s11 + $0x154] ss:$8 sps:$4 sm:$0xff]  }
  0x59   : > { %v5295_v36 = vld [vmem:[%s5682_s11 + $0x4d4] ss:$8 sps:$4 sm:$0xff]  }
  0x5f   : > { %1953 = vmatmul.mubr.bf16.gmra.mrb[20].mxu0 %v5201_v37  ;;  %2401 = vmatmul.mubr.bf16.gmra.mrb[20].mxu1 %v5202_v38  ;;  %v5297_v37 = vld [vmem:[%s5682_s11 + $0x150] ss:$8 sps:$4 sm:$0xff]  }
  0x60   : > { %4518 = vmatprep.mubr.msk.bf16.mxu0 %vm1536_vm0, %v5203_v39  ;;  %4574 = vmatprep.mubr.msk.bf16.mxu1 %vm1536_vm0, %v5205_v40  ;;  %v5298_v38 = vld [vmem:[%s5682_s11 + $0x4d0] ss:$8 sps:$4 sm:$0xff]   ;;  %v5299_v39 = vld [vmem:[%s5682_s11 + $0x164] ss:$8 sps:$4 sm:$0xff]  }
  0x61   : > { %v5301_v40 = vld [vmem:[%s5682_s11 + $0x4e4] ss:$8 sps:$4 sm:$0xff]  }
  0x67   : > { %1961 = vmatmul.mubr.bf16.gmra.mrb[24].mxu0 %v5207_v41  ;;  %2409 = vmatmul.mubr.bf16.gmra.mrb[24].mxu1 %v5208_v42  ;;  %v5303_v41 = vld [vmem:[%s5682_s11 + $0x160] ss:$8 sps:$4 sm:$0xff]  }
  0x68   : > { %4519 = vmatprep.mubr.msk.bf16.mxu0 %vm1536_vm0, %v5209_v43  ;;  %4575 = vmatprep.mubr.msk.bf16.mxu1 %vm1536_vm0, %v5211_v44  ;;  %v5304_v42 = vld [vmem:[%s5682_s11 + $0x4e0] ss:$8 sps:$4 sm:$0xff]   ;;  %v5305_v43 = vld [vmem:[%s5682_s11 + $0x174] ss:$8 sps:$4 sm:$0xff]  }
  0x69   : > { %v5307_v44 = vld [vmem:[%s5682_s11 + $0x4f4] ss:$8 sps:$4 sm:$0xff]  }
  0x6f   : > { %1969 = vmatmul.mubr.bf16.gmra.mrb[28].mxu0 %v5213_v45  ;;  %2417 = vmatmul.mubr.bf16.gmra.mrb[28].mxu1 %v5214_v46  ;;  %v5309_v45 = vld [vmem:[%s5682_s11 + $0x170] ss:$8 sps:$4 sm:$0xff]  }
  0x70   : > { %4520 = vmatprep.mubr.msk.bf16.mxu0 %vm1536_vm0, %v5215_v47  ;;  %4576 = vmatprep.mubr.msk.bf16.mxu1 %vm1536_vm0, %v5217_v48  ;;  %v5310_v46 = vld [vmem:[%s5682_s11 + $0x4f0] ss:$8 sps:$4 sm:$0xff]   ;;  %v5311_v47 = vld [vmem:[%s5682_s11 + $0x184] ss:$8 sps:$4 sm:$0xff]  }
  0x71   : > { %v5313_v48 = vld [vmem:[%s5682_s11 + $0x504] ss:$8 sps:$4 sm:$0xff]  }
  0x77   : > { %1977 = vmatmul.mubr.bf16.gmra.mrb[32].mxu0 %v5219_v49  ;;  %2425 = vmatmul.mubr.bf16.gmra.mrb[32].mxu1 %v5220_v50  ;;  %v5315_v49 = vld [vmem:[%s5682_s11 + $0x180] ss:$8 sps:$4 sm:$0xff]  }
  0x78   : > { %4521 = vmatprep.mubr.msk.bf16.mxu0 %vm1536_vm0, %v5221_v51  ;;  %4577 = vmatprep.mubr.msk.bf16.mxu1 %vm1536_vm0, %v5223_v52  ;;  %v5316_v50 = vld [vmem:[%s5682_s11 + $0x500] ss:$8 sps:$4 sm:$0xff]   ;;  %v5317_v51 = vld [vmem:[%s5682_s11 + $0x194] ss:$8 sps:$4 sm:$0xff]  }
  0x79   : > { %v5319_v52 = vld [vmem:[%s5682_s11 + $0x514] ss:$8 sps:$4 sm:$0xff]  }
  0x7f   : > { %1985 = vmatmul.mubr.bf16.gmra.mrb[36].mxu0 %v5225_v53  ;;  %2433 = vmatmul.mubr.bf16.gmra.mrb[36].mxu1 %v5226_v54  ;;  %v5321_v53 = vld [vmem:[%s5682_s11 + $0x190] ss:$8 sps:$4 sm:$0xff]  }
  0x80   : > { %4522 = vmatprep.mubr.msk.bf16.mxu0 %vm1536_vm0, %v5227_v55  ;;  %4578 = vmatprep.mubr.msk.bf16.mxu1 %vm1536_vm0, %v5229_v56  ;;  %v5322_v54 = vld [vmem:[%s5682_s11 + $0x510] ss:$8 sps:$4 sm:$0xff]   ;;  %v5323_v55 = vld [vmem:[%s5682_s11 + $0x1a4] ss:$8 sps:$4 sm:$0xff]  }
  0x81   : > { %v5325_v56 = vld [vmem:[%s5682_s11 + $0x524] ss:$8 sps:$4 sm:$0xff]  }
  0x87   : > { %1993 = vmatmul.mubr.bf16.gmra.mrb[40].mxu0 %v5231_v57  ;;  %2441 = vmatmul.mubr.bf16.gmra.mrb[40].mxu1 %v5232_v58  ;;  %v5327_v57 = vld [vmem:[%s5682_s11 + $0x1a0] ss:$8 sps:$4 sm:$0xff]  }
  0x88   : > { %4523 = vmatprep.mubr.msk.bf16.mxu0 %vm1536_vm0, %v5233_v59  ;;  %4579 = vmatprep.mubr.msk.bf16.mxu1 %vm1536_vm0, %v5235_v60  ;;  %v5328_v58 = vld [vmem:[%s5682_s11 + $0x520] ss:$8 sps:$4 sm:$0xff]   ;;  %v5329_v59 = vld [vmem:[%s5682_s11 + $0x1b4] ss:$8 sps:$4 sm:$0xff]  }
  0x89   : > { %v5331_v60 = vld [vmem:[%s5682_s11 + $0x534] ss:$8 sps:$4 sm:$0xff]  }
  0x8f   : > { %2001 = vmatmul.mubr.bf16.gmra.mrb[44].mxu0 %v5237_v61  ;;  %2449 = vmatmul.mubr.bf16.gmra.mrb[44].mxu1 %v5238_v62  ;;  %v5870_v61 = vld [vmem:[%s6788_s2] ss:$0 sm:$0xff] }
  0x90   : > { %4524 = vmatprep.mubr.msk.bf16.mxu0 %vm1536_vm0, %v5239_v63  ;;  %4580 = vmatprep.mubr.msk.bf16.mxu1 %vm1536_vm0, %v5241_v0 }
  0x97   : > { %2009 = vmatmul.mubr.bf16.gmra.mrb[48].mxu0 %v5243_v1  ;;  %2457 = vmatmul.mubr.bf16.gmra.mrb[48].mxu1 %v5244_v2 }
  0x98   : > { %4525 = vmatprep.mubr.msk.bf16.mxu0 %vm1536_vm0, %v5245_v3  ;;  %4581 = vmatprep.mubr.msk.bf16.mxu1 %vm1536_vm0, %v5247_v4  ;;  %v5333_v4 = vld [vmem:[%s5682_s11 + $0x1b0] ss:$8 sps:$4 sm:$0xff]  }
  0x9f   : > { %2017 = vmatmul.mubr.bf16.gmra.mrb[52].mxu0 %v5249_v5  ;;  %2465 = vmatmul.mubr.bf16.gmra.mrb[52].mxu1 %v5250_v6  ;;  %v5334_v5 = vld [vmem:[%s5682_s11 + $0x530] ss:$8 sps:$4 sm:$0xff]  }
  0xa0   : > { %4526 = vmatprep.mubr.msk.bf16.mxu0 %vm1536_vm0, %v5251_v7  ;;  %4582 = vmatprep.mubr.msk.bf16.mxu1 %vm1536_vm0, %v5253_v8  ;;  %v5335_v8 = vld [vmem:[%s5682_s11 + $0x1c4] ss:$8 sps:$4 sm:$0xff]  }
  0xa7   : > { %2025 = vmatmul.mubr.bf16.gmra.mrb[56].mxu0 %v5255_v9  ;;  %2473 = vmatmul.mubr.bf16.gmra.mrb[56].mxu1 %v5256_v10  ;;  %v5337_v9 = vld [vmem:[%s5682_s11 + $0x544] ss:$8 sps:$4 sm:$0xff]  }
  0xa8   : > { %4527 = vmatprep.mubr.msk.bf16.mxu0 %vm1536_vm0, %v5257_v11  ;;  %4583 = vmatprep.mubr.msk.bf16.mxu1 %vm1536_vm0, %v5259_v12 }
  0xaf   : > { %2033 = vmatmul.mubr.bf16.gmra.mrb[60].mxu0 %v5261_v13  ;;  %2481 = vmatmul.mubr.bf16.gmra.mrb[60].mxu1 %v5262_v14 }
  0xb0   : > { %4528 = vmatprep.mubr.msk.bf16.mxu0 %vm1536_vm0, %v5263_v15  ;;  %4584 = vmatprep.mubr.msk.bf16.mxu1 %vm1536_vm0, %v5265_v16 }
  0xb7   : > { %2041 = vmatmul.mubr.bf16.gmra.mrb[64].mxu0 %v5267_v17  ;;  %2489 = vmatmul.mubr.bf16.gmra.mrb[64].mxu1 %v5268_v18 }
  0xb8   : > { %4529 = vmatprep.mubr.msk.bf16.mxu0 %vm1536_vm0, %v5269_v19  ;;  %4585 = vmatprep.mubr.msk.bf16.mxu1 %vm1536_vm0, %v5271_v20 }
  0xbf   : > { %2049 = vmatmul.mubr.bf16.gmra.mrb[68].mxu0 %v5273_v21  ;;  %2497 = vmatmul.mubr.bf16.gmra.mrb[68].mxu1 %v5274_v22 }
  0xc0   : > { %4530 = vmatprep.mubr.msk.bf16.mxu0 %vm1536_vm0, %v5275_v23  ;;  %4586 = vmatprep.mubr.msk.bf16.mxu1 %vm1536_vm0, %v5277_v24 }
  0xc7   : > { %2057 = vmatmul.mubr.bf16.gmra.mrb[72].mxu0 %v5279_v25  ;;  %2505 = vmatmul.mubr.bf16.gmra.mrb[72].mxu1 %v5280_v26 }
  0xc8   : > { %4531 = vmatprep.mubr.msk.bf16.mxu0 %vm1536_vm0, %v5281_v27  ;;  %4587 = vmatprep.mubr.msk.bf16.mxu1 %vm1536_vm0, %v5283_v28  ;;  %v5339_v28 = vld [vmem:[%s5682_s11 + $0x1c0] ss:$8 sps:$4 sm:$0xff]  }
  0xcf   : > { %2065 = vmatmul.mubr.bf16.gmra.mrb[76].mxu0 %v5285_v29  ;;  %2513 = vmatmul.mubr.bf16.gmra.mrb[76].mxu1 %v5286_v30  ;;  %v5340_v29 = vld [vmem:[%s5682_s11 + $0x540] ss:$8 sps:$4 sm:$0xff]  }
  0xd0   : > { %4532 = vmatprep.mubr.msk.bf16.mxu0 %vm1536_vm0, %v5287_v31  ;;  %4588 = vmatprep.mubr.msk.bf16.mxu1 %vm1536_vm0, %v5289_v32  ;;  %v5341_v32 = vld [vmem:[%s5682_s11 + $0x1d4] ss:$8 sps:$4 sm:$0xff]  }
  0xd7   : > { %2073 = vmatmul.mubr.bf16.gmra.mrb[80].mxu0 %v5291_v33  ;;  %2521 = vmatmul.mubr.bf16.gmra.mrb[80].mxu1 %v5292_v34  ;;  %v5343_v33 = vld [vmem:[%s5682_s11 + $0x554] ss:$8 sps:$4 sm:$0xff]  }
  0xd8   : > { %4533 = vmatprep.mubr.msk.bf16.mxu0 %vm1536_vm0, %v5293_v35  ;;  %4589 = vmatprep.mubr.msk.bf16.mxu1 %vm1536_vm0, %v5295_v36 }
  0xdf   : > { %2081 = vmatmul.mubr.bf16.gmra.mrb[84].mxu0 %v5297_v37  ;;  %2529 = vmatmul.mubr.bf16.gmra.mrb[84].mxu1 %v5298_v38 }
  0xe0   : > { %4534 = vmatprep.mubr.msk.bf16.mxu0 %vm1536_vm0, %v5299_v39  ;;  %4590 = vmatprep.mubr.msk.bf16.mxu1 %vm1536_vm0, %v5301_v40 }
  0xe7   : > { %2089 = vmatmul.mubr.bf16.gmra.mrb[88].mxu0 %v5303_v41  ;;  %2537 = vmatmul.mubr.bf16.gmra.mrb[88].mxu1 %v5304_v42 }
  0xe8   : > { %4535 = vmatprep.mubr.msk.bf16.mxu0 %vm1536_vm0, %v5305_v43  ;;  %4591 = vmatprep.mubr.msk.bf16.mxu1 %vm1536_vm0, %v5307_v44 }
  0xef   : > { %2097 = vmatmul.mubr.bf16.gmra.mrb[92].mxu0 %v5309_v45  ;;  %2545 = vmatmul.mubr.bf16.gmra.mrb[92].mxu1 %v5310_v46 }
  0xf0   : > { %4536 = vmatprep.mubr.msk.bf16.mxu0 %vm1536_vm0, %v5311_v47  ;;  %4592 = vmatprep.mubr.msk.bf16.mxu1 %vm1536_vm0, %v5313_v48 }
  0xf7   : > { %2105 = vmatmul.mubr.bf16.gmra.mrb[96].mxu0 %v5315_v49  ;;  %2553 = vmatmul.mubr.bf16.gmra.mrb[96].mxu1 %v5316_v50 }
  0xf8   : > { %4537 = vmatprep.mubr.msk.bf16.mxu0 %vm1536_vm0, %v5317_v51  ;;  %4593 = vmatprep.mubr.msk.bf16.mxu1 %vm1536_vm0, %v5319_v52  ;;  %v5345_v52 = vld [vmem:[%s5682_s11 + $0x1d0] ss:$8 sps:$4 sm:$0xff]  }
  0xff   : > { %2113 = vmatmul.mubr.bf16.gmra.mrb[100].mxu0 %v5321_v53  ;;  %2561 = vmatmul.mubr.bf16.gmra.mrb[100].mxu1 %v5322_v54  ;;  %v5346_v53 = vld [vmem:[%s5682_s11 + $0x550] ss:$8 sps:$4 sm:$0xff]  }
 0x100   : > { %4538 = vmatprep.mubr.msk.bf16.mxu0 %vm1536_vm0, %v5323_v55  ;;  %4594 = vmatprep.mubr.msk.bf16.mxu1 %vm1536_vm0, %v5325_v56  ;;  %v5347_v56 = vld [vmem:[%s5682_s11 + $0x1e4] ss:$8 sps:$4 sm:$0xff]  }
 0x107   : > { %2121 = vmatmul.mubr.bf16.gmra.mrb[104].mxu0 %v5327_v57  ;;  %2569 = vmatmul.mubr.bf16.gmra.mrb[104].mxu1 %v5328_v58  ;;  %v5349_v57 = vld [vmem:[%s5682_s11 + $0x564] ss:$8 sps:$4 sm:$0xff]  }
 0x108   : > { %4539 = vmatprep.mubr.msk.bf16.mxu0 %vm1536_vm0, %v5329_v59  ;;  %4595 = vmatprep.mubr.msk.bf16.mxu1 %vm1536_vm0, %v5331_v60 }
 0x10a   : > { %v1914_v62 = vpop.f32.mrb[0].mxu0  ;;  %v2362_v63 = vpop.f32.mrb[0].mxu1 }
 0x10b   : > { %v1915_v0 = vadd.f32 %v5870_v61, %v1914_v62  ;;  %v2363_v1 = vadd.f32 %v5870_v61, %v2362_v63  ;;  %v1916_v2 = vpop.f32.mrb[1].mxu0  ;;  %v2364_v3 = vpop.f32.mrb[1].mxu1 }
 0x10c   : > { %v1917_v6 = vpop.f32.mrb[2].mxu0  ;;  %v2365_v7 = vpop.f32.mrb[2].mxu1 }
 0x10d   : > { %v2809_v10 = vmax.f32 %v1915_v0, 0.0  ;;  %v2921_v11 = vmax.f32 %v2363_v1, 0.0  ;;  %v1918_v12 = vadd.f32 %v5870_v61, %v1917_v6  ;;  %v2366_v13 = vadd.f32 %v5870_v61, %v2365_v7  ;;  %v1919_v14 = vpop.f32.mrb[3].mxu0  ;;  %v2367_v15 = vpop.f32.mrb[3].mxu1 }
 0x10e   : > { %v5352_v14 = vld [vmem:[%s5682_s11 + $0x560] ss:$8 sps:$4 sm:$0xff]  }
 0x10f   : > { %v4852_v16 = vpack.c.bf16 %v2809_v10, %v2809_v10  ;;  %v4964_v17 = vpack.c.bf16 %v2921_v11, %v2921_v11  ;;  %v2810_v18 = vmax.f32 %v1918_v12, 0.0  ;;  %v2922_v19 = vmax.f32 %v2366_v13, 0.0  ;;  %2129 = vmatmul.mubr.bf16.gmra.mrb[108].mxu0 %v5333_v4  ;;  %2577 = vmatmul.mubr.bf16.gmra.mrb[108].mxu1 %v5334_v5  ;;  %v5351_v13 = vld [vmem:[%s5682_s11 + $0x1e0] ss:$8 sps:$4 sm:$0xff]  }
 0x110   : > { %4540 = vmatprep.mubr.msk.bf16.mxu0 %vm1536_vm0, %v5335_v8  ;;  %4596 = vmatprep.mubr.msk.bf16.mxu1 %vm1536_vm0, %v5337_v9 }
 0x111   : > { %3930 = vst.msk [vmem:[%s5886_s18] sm:$0xf] %vm3929_vm3, %v4852_v16  ;;  %4042 = vst.msk [vmem:[%s5886_s18 + $0x1c0] sm:$0xf] %vm3929_vm3, %v4964_v17  ;;  %v4853_v20 = vpack.c.bf16 %v2810_v18, %v2810_v18  ;;  %v4965_v21 = vpack.c.bf16 %v2922_v19, %v2922_v19  ;;  %v5353_v17 = vld [vmem:[%s5682_s11 + $0x1f4] ss:$8 sps:$4 sm:$0xff]  }
 0x112   : > { %v1922_v22 = vpop.f32.mrb[4].mxu0  ;;  %v2370_v23 = vpop.f32.mrb[4].mxu1  ;;  %v5355_v18 = vld [vmem:[%s5682_s11 + $0x574] ss:$8 sps:$4 sm:$0xff]  }
 0x113   : > { %3931 = vst.msk [vmem:[%s5886_s18 + $0x4] sm:$0xf] %vm3929_vm3, %v4853_v20  ;;  %4043 = vst.msk [vmem:[%s5886_s18 + $0x1c4] sm:$0xf] %vm3929_vm3, %v4965_v21  ;;  %v1923_v24 = vadd.f32 %v5870_v61, %v1922_v22  ;;  %v2371_v25 = vadd.f32 %v5870_v61, %v2370_v23  ;;  %v1924_v26 = vpop.f32.mrb[5].mxu0  ;;  %v2372_v27 = vpop.f32.mrb[5].mxu1 }
 0x114   : > { %v1925_v30 = vpop.f32.mrb[6].mxu0  ;;  %v2373_v31 = vpop.f32.mrb[6].mxu1 }
 0x115   : > { %v2811_v34 = vmax.f32 %v1923_v24, 0.0  ;;  %v2923_v35 = vmax.f32 %v2371_v25, 0.0  ;;  %v1926_v36 = vadd.f32 %v5870_v61, %v1925_v30  ;;  %v2374_v37 = vadd.f32 %v5870_v61, %v2373_v31  ;;  %v1927_v38 = vpop.f32.mrb[7].mxu0  ;;  %v2375_v39 = vpop.f32.mrb[7].mxu1 }
 0x116   : > { %v5358_v38 = vld [vmem:[%s5682_s11 + $0x570] ss:$8 sps:$4 sm:$0xff]  }
 0x117   : > { %v4854_v40 = vpack.c.bf16 %v2811_v34, %v2811_v34  ;;  %v4966_v41 = vpack.c.bf16 %v2923_v35, %v2923_v35  ;;  %v2812_v42 = vmax.f32 %v1926_v36, 0.0  ;;  %v2924_v43 = vmax.f32 %v2374_v37, 0.0  ;;  %2137 = vmatmul.mubr.bf16.gmra.mrb[112].mxu0 %v5339_v28  ;;  %2585 = vmatmul.mubr.bf16.gmra.mrb[112].mxu1 %v5340_v29  ;;  %v5357_v37 = vld [vmem:[%s5682_s11 + $0x1f0] ss:$8 sps:$4 sm:$0xff]  }
 0x118   : > { %4541 = vmatprep.mubr.msk.bf16.mxu0 %vm1536_vm0, %v5341_v32  ;;  %4597 = vmatprep.mubr.msk.bf16.mxu1 %vm1536_vm0, %v5343_v33 }
 0x119   : > { %3932 = vst.msk [vmem:[%s5886_s18 + $0x8] sm:$0xf] %vm3929_vm3, %v4854_v40  ;;  %4044 = vst.msk [vmem:[%s5886_s18 + $0x1c8] sm:$0xf] %vm3929_vm3, %v4966_v41  ;;  %v4855_v44 = vpack.c.bf16 %v2812_v42, %v2812_v42  ;;  %v4967_v45 = vpack.c.bf16 %v2924_v43, %v2924_v43  ;;  %v5359_v41 = vld [vmem:[%s5682_s11 + $0x204] ss:$8 sps:$4 sm:$0xff]  }
 0x11a   : > { %v1930_v46 = vpop.f32.mrb[8].mxu0  ;;  %v2378_v47 = vpop.f32.mrb[8].mxu1  ;;  %v5361_v42 = vld [vmem:[%s5682_s11 + $0x584] ss:$8 sps:$4 sm:$0xff]  }
 0x11b   : > { %3933 = vst.msk [vmem:[%s5886_s18 + $0xc] sm:$0xf] %vm3929_vm3, %v4855_v44  ;;  %4045 = vst.msk [vmem:[%s5886_s18 + $0x1cc] sm:$0xf] %vm3929_vm3, %v4967_v45  ;;  %v1931_v48 = vadd.f32 %v5870_v61, %v1930_v46  ;;  %v2379_v49 = vadd.f32 %v5870_v61, %v2378_v47  ;;  %v1932_v50 = vpop.f32.mrb[9].mxu0  ;;  %v2380_v51 = vpop.f32.mrb[9].mxu1 }
 0x11c   : > { %v1933_v54 = vpop.f32.mrb[10].mxu0  ;;  %v2381_v55 = vpop.f32.mrb[10].mxu1 }
 0x11d   : > { %v2813_v58 = vmax.f32 %v1931_v48, 0.0  ;;  %v2925_v59 = vmax.f32 %v2379_v49, 0.0  ;;  %v1934_v60 = vadd.f32 %v5870_v61, %v1933_v54  ;;  %v2382_v62 = vadd.f32 %v5870_v61, %v2381_v55  ;;  %v1935_v63 = vpop.f32.mrb[11].mxu0  ;;  %v2383_v0 = vpop.f32.mrb[11].mxu1 }
 0x11e   : > { %v5364_v63 = vld [vmem:[%s5682_s11 + $0x580] ss:$8 sps:$4 sm:$0xff]  }
 0x11f   : > { %v4856_v1 = vpack.c.bf16 %v2813_v58, %v2813_v58  ;;  %v4968_v2 = vpack.c.bf16 %v2925_v59, %v2925_v59  ;;  %v2814_v3 = vmax.f32 %v1934_v60, 0.0  ;;  %v2926_v4 = vmax.f32 %v2382_v62, 0.0  ;;  %2145 = vmatmul.mubr.bf16.gmra.mrb[116].mxu0 %v5345_v52  ;;  %2593 = vmatmul.mubr.bf16.gmra.mrb[116].mxu1 %v5346_v53  ;;  %v5363_v62 = vld [vmem:[%s5682_s11 + $0x200] ss:$8 sps:$4 sm:$0xff]  }
 0x120   : > { %4542 = vmatprep.mubr.msk.bf16.mxu0 %vm1536_vm0, %v5347_v56  ;;  %4598 = vmatprep.mubr.msk.bf16.mxu1 %vm1536_vm0, %v5349_v57 }
 0x121   : > { %3934 = vst.msk [vmem:[%s5886_s18 + $0x10] sm:$0xf] %vm3929_vm3, %v4856_v1  ;;  %4046 = vst.msk [vmem:[%s5886_s18 + $0x1d0] sm:$0xf] %vm3929_vm3, %v4968_v2  ;;  %v4857_v5 = vpack.c.bf16 %v2814_v3, %v2814_v3  ;;  %v4969_v6 = vpack.c.bf16 %v2926_v4, %v2926_v4  ;;  %v5365_v2 = vld [vmem:[%s5682_s11 + $0x214] ss:$8 sps:$4 sm:$0xff]  }
 0x122   : > { %v1938_v7 = vpop.f32.mrb[12].mxu0  ;;  %v2386_v8 = vpop.f32.mrb[12].mxu1  ;;  %v5367_v3 = vld [vmem:[%s5682_s11 + $0x594] ss:$8 sps:$4 sm:$0xff]  }
 0x123   : > { %3935 = vst.msk [vmem:[%s5886_s18 + $0x14] sm:$0xf] %vm3929_vm3, %v4857_v5  ;;  %4047 = vst.msk [vmem:[%s5886_s18 + $0x1d4] sm:$0xf] %vm3929_vm3, %v4969_v6  ;;  %v1939_v9 = vadd.f32 %v5870_v61, %v1938_v7  ;;  %v2387_v10 = vadd.f32 %v5870_v61, %v2386_v8  ;;  %v1940_v11 = vpop.f32.mrb[13].mxu0  ;;  %v2388_v12 = vpop.f32.mrb[13].mxu1 }
 0x124   : > { %v1941_v15 = vpop.f32.mrb[14].mxu0  ;;  %v2389_v16 = vpop.f32.mrb[14].mxu1 }
 0x125   : > { %v2815_v19 = vmax.f32 %v1939_v9, 0.0  ;;  %v2927_v20 = vmax.f32 %v2387_v10, 0.0  ;;  %v1942_v21 = vadd.f32 %v5870_v61, %v1941_v15  ;;  %v2390_v22 = vadd.f32 %v5870_v61, %v2389_v16  ;;  %v1943_v23 = vpop.f32.mrb[15].mxu0  ;;  %v2391_v24 = vpop.f32.mrb[15].mxu1 }
 0x126   : > { %v5370_v23 = vld [vmem:[%s5682_s11 + $0x590] ss:$8 sps:$4 sm:$0xff]  }
 0x127   : > { %v4858_v25 = vpack.c.bf16 %v2815_v19, %v2815_v19  ;;  %v4970_v26 = vpack.c.bf16 %v2927_v20, %v2927_v20  ;;  %v2816_v27 = vmax.f32 %v1942_v21, 0.0  ;;  %v2928_v28 = vmax.f32 %v2390_v22, 0.0  ;;  %2153 = vmatmul.mubr.bf16.gmra.mrb[120].mxu0 %v5351_v13  ;;  %2601 = vmatmul.mubr.bf16.gmra.mrb[120].mxu1 %v5352_v14  ;;  %v5369_v22 = vld [vmem:[%s5682_s11 + $0x210] ss:$8 sps:$4 sm:$0xff]  }
 0x128   : > { %4543 = vmatprep.mubr.msk.bf16.mxu0 %vm1536_vm0, %v5353_v17  ;;  %4599 = vmatprep.mubr.msk.bf16.mxu1 %vm1536_vm0, %v5355_v18 }
 0x129   : > { %3936 = vst.msk [vmem:[%s5886_s18 + $0x18] sm:$0xf] %vm3929_vm3, %v4858_v25  ;;  %4048 = vst.msk [vmem:[%s5886_s18 + $0x1d8] sm:$0xf] %vm3929_vm3, %v4970_v26  ;;  %v4859_v29 = vpack.c.bf16 %v2816_v27, %v2816_v27  ;;  %v4971_v30 = vpack.c.bf16 %v2928_v28, %v2928_v28  ;;  %v5371_v26 = vld [vmem:[%s5682_s11 + $0x224] ss:$8 sps:$4 sm:$0xff]  }
 0x12a   : > { %v1946_v31 = vpop.f32.mrb[16].mxu0  ;;  %v2394_v32 = vpop.f32.mrb[16].mxu1  ;;  %v5373_v27 = vld [vmem:[%s5682_s11 + $0x5a4] ss:$8 sps:$4 sm:$0xff]  }
 0x12b   : > { %3937 = vst.msk [vmem:[%s5886_s18 + $0x1c] sm:$0xf] %vm3929_vm3, %v4859_v29  ;;  %4049 = vst.msk [vmem:[%s5886_s18 + $0x1dc] sm:$0xf] %vm3929_vm3, %v4971_v30  ;;  %v1947_v33 = vadd.f32 %v5870_v61, %v1946_v31  ;;  %v2395_v34 = vadd.f32 %v5870_v61, %v2394_v32  ;;  %v1948_v35 = vpop.f32.mrb[17].mxu0  ;;  %v2396_v36 = vpop.f32.mrb[17].mxu1 }
 0x12c   : > { %v1949_v39 = vpop.f32.mrb[18].mxu0  ;;  %v2397_v40 = vpop.f32.mrb[18].mxu1 }
 0x12d   : > { %v2817_v43 = vmax.f32 %v1947_v33, 0.0  ;;  %v2929_v44 = vmax.f32 %v2395_v34, 0.0  ;;  %v1950_v45 = vadd.f32 %v5870_v61, %v1949_v39  ;;  %v2398_v46 = vadd.f32 %v5870_v61, %v2397_v40  ;;  %v1951_v47 = vpop.f32.mrb[19].mxu0  ;;  %v2399_v48 = vpop.f32.mrb[19].mxu1 }
 0x12e   : > { %v5376_v47 = vld [vmem:[%s5682_s11 + $0x5a0] ss:$8 sps:$4 sm:$0xff]  }
 0x12f   : > { %v4860_v49 = vpack.c.bf16 %v2817_v43, %v2817_v43  ;;  %v4972_v50 = vpack.c.bf16 %v2929_v44, %v2929_v44  ;;  %v2818_v51 = vmax.f32 %v1950_v45, 0.0  ;;  %v2930_v52 = vmax.f32 %v2398_v46, 0.0  ;;  %2161 = vmatmul.mubr.bf16.gmra.mrb[124].mxu0 %v5357_v37  ;;  %2609 = vmatmul.mubr.bf16.gmra.mrb[124].mxu1 %v5358_v38  ;;  %v5375_v46 = vld [vmem:[%s5682_s11 + $0x220] ss:$8 sps:$4 sm:$0xff]  }
 0x130   : > { %4544 = vmatprep.mubr.msk.bf16.mxu0 %vm1536_vm0, %v5359_v41  ;;  %4600 = vmatprep.mubr.msk.bf16.mxu1 %vm1536_vm0, %v5361_v42 }
 0x131   : > { %3938 = vst.msk [vmem:[%s5886_s18 + $0x20] sm:$0xf] %vm3929_vm3, %v4860_v49  ;;  %4050 = vst.msk [vmem:[%s5886_s18 + $0x1e0] sm:$0xf] %vm3929_vm3, %v4972_v50  ;;  %v4861_v53 = vpack.c.bf16 %v2818_v51, %v2818_v51  ;;  %v4973_v54 = vpack.c.bf16 %v2930_v52, %v2930_v52  ;;  %v5377_v50 = vld [vmem:[%s5682_s11 + $0x234] ss:$8 sps:$4 sm:$0xff]  }
 0x132   : > { %v1954_v55 = vpop.f32.mrb[20].mxu0  ;;  %v2402_v56 = vpop.f32.mrb[20].mxu1  ;;  %v5379_v51 = vld [vmem:[%s5682_s11 + $0x5b4] ss:$8 sps:$4 sm:$0xff]  }
 0x133   : > { %3939 = vst.msk [vmem:[%s5886_s18 + $0x24] sm:$0xf] %vm3929_vm3, %v4861_v53  ;;  %4051 = vst.msk [vmem:[%s5886_s18 + $0x1e4] sm:$0xf] %vm3929_vm3, %v4973_v54  ;;  %v1955_v57 = vadd.f32 %v5870_v61, %v1954_v55  ;;  %v2403_v58 = vadd.f32 %v5870_v61, %v2402_v56  ;;  %v1956_v59 = vpop.f32.mrb[21].mxu0  ;;  %v2404_v60 = vpop.f32.mrb[21].mxu1 }
 0x134   : > { %v1957_v0 = vpop.f32.mrb[22].mxu0  ;;  %v2405_v1 = vpop.f32.mrb[22].mxu1 }
 0x135   : > { %v2819_v4 = vmax.f32 %v1955_v57, 0.0  ;;  %v2931_v5 = vmax.f32 %v2403_v58, 0.0  ;;  %v1958_v6 = vadd.f32 %v5870_v61, %v1957_v0  ;;  %v2406_v7 = vadd.f32 %v5870_v61, %v2405_v1  ;;  %v1959_v8 = vpop.f32.mrb[23].mxu0  ;;  %v2407_v9 = vpop.f32.mrb[23].mxu1 }
 0x136   : > { %v5382_v8 = vld [vmem:[%s5682_s11 + $0x5b0] ss:$8 sps:$4 sm:$0xff]  }
 0x137   : > { %v4862_v10 = vpack.c.bf16 %v2819_v4, %v2819_v4  ;;  %v4974_v11 = vpack.c.bf16 %v2931_v5, %v2931_v5  ;;  %v2820_v12 = vmax.f32 %v1958_v6, 0.0  ;;  %v2932_v13 = vmax.f32 %v2406_v7, 0.0  ;;  %2169 = vmatmul.mubr.bf16.gmra.mrb[128].mxu0 %v5363_v62  ;;  %2617 = vmatmul.mubr.bf16.gmra.mrb[128].mxu1 %v5364_v63  ;;  %v5381_v7 = vld [vmem:[%s5682_s11 + $0x230] ss:$8 sps:$4 sm:$0xff]  }
 0x138   : > { %4545 = vmatprep.mubr.msk.bf16.mxu0 %vm1536_vm0, %v5365_v2  ;;  %4601 = vmatprep.mubr.msk.bf16.mxu1 %vm1536_vm0, %v5367_v3 }
 0x139   : > { %3940 = vst.msk [vmem:[%s5886_s18 + $0x28] sm:$0xf] %vm3929_vm3, %v4862_v10  ;;  %4052 = vst.msk [vmem:[%s5886_s18 + $0x1e8] sm:$0xf] %vm3929_vm3, %v4974_v11  ;;  %v4863_v14 = vpack.c.bf16 %v2820_v12, %v2820_v12  ;;  %v4975_v15 = vpack.c.bf16 %v2932_v13, %v2932_v13  ;;  %v5383_v11 = vld [vmem:[%s5682_s11 + $0x244] ss:$8 sps:$4 sm:$0xff]  }
 0x13a   : > { %v1962_v16 = vpop.f32.mrb[24].mxu0  ;;  %v2410_v17 = vpop.f32.mrb[24].mxu1  ;;  %v5385_v12 = vld [vmem:[%s5682_s11 + $0x5c4] ss:$8 sps:$4 sm:$0xff]  }
 0x13b   : > { %3941 = vst.msk [vmem:[%s5886_s18 + $0x2c] sm:$0xf] %vm3929_vm3, %v4863_v14  ;;  %4053 = vst.msk [vmem:[%s5886_s18 + $0x1ec] sm:$0xf] %vm3929_vm3, %v4975_v15  ;;  %v1963_v18 = vadd.f32 %v5870_v61, %v1962_v16  ;;  %v2411_v19 = vadd.f32 %v5870_v61, %v2410_v17  ;;  %v1964_v20 = vpop.f32.mrb[25].mxu0  ;;  %v2412_v21 = vpop.f32.mrb[25].mxu1 }
 0x13c   : > { %v1965_v24 = vpop.f32.mrb[26].mxu0  ;;  %v2413_v25 = vpop.f32.mrb[26].mxu1 }
 0x13d   : > { %v2821_v28 = vmax.f32 %v1963_v18, 0.0  ;;  %v2933_v29 = vmax.f32 %v2411_v19, 0.0  ;;  %v1966_v30 = vadd.f32 %v5870_v61, %v1965_v24  ;;  %v2414_v31 = vadd.f32 %v5870_v61, %v2413_v25  ;;  %v1967_v32 = vpop.f32.mrb[27].mxu0  ;;  %v2415_v33 = vpop.f32.mrb[27].mxu1 }
 0x13e   : > { %v5388_v32 = vld [vmem:[%s5682_s11 + $0x5c0] ss:$8 sps:$4 sm:$0xff]  }
 0x13f   : > { %v4864_v34 = vpack.c.bf16 %v2821_v28, %v2821_v28  ;;  %v4976_v35 = vpack.c.bf16 %v2933_v29, %v2933_v29  ;;  %v2822_v36 = vmax.f32 %v1966_v30, 0.0  ;;  %v2934_v37 = vmax.f32 %v2414_v31, 0.0  ;;  %2177 = vmatmul.mubr.bf16.gmra.mrb[132].mxu0 %v5369_v22  ;;  %2625 = vmatmul.mubr.bf16.gmra.mrb[132].mxu1 %v5370_v23  ;;  %v5387_v31 = vld [vmem:[%s5682_s11 + $0x240] ss:$8 sps:$4 sm:$0xff]  }
 0x140   : > { %4546 = vmatprep.mubr.msk.bf16.mxu0 %vm1536_vm0, %v5371_v26  ;;  %4602 = vmatprep.mubr.msk.bf16.mxu1 %vm1536_vm0, %v5373_v27 }
 0x141   : > { %3942 = vst.msk [vmem:[%s5886_s18 + $0x30] sm:$0xf] %vm3929_vm3, %v4864_v34  ;;  %4054 = vst.msk [vmem:[%s5886_s18 + $0x1f0] sm:$0xf] %vm3929_vm3, %v4976_v35  ;;  %v4865_v38 = vpack.c.bf16 %v2822_v36, %v2822_v36  ;;  %v4977_v39 = vpack.c.bf16 %v2934_v37, %v2934_v37  ;;  %v5389_v35 = vld [vmem:[%s5682_s11 + $0x254] ss:$8 sps:$4 sm:$0xff]  }
 0x142   : > { %v1970_v40 = vpop.f32.mrb[28].mxu0  ;;  %v2418_v41 = vpop.f32.mrb[28].mxu1  ;;  %v5391_v36 = vld [vmem:[%s5682_s11 + $0x5d4] ss:$8 sps:$4 sm:$0xff]  }
 0x143   : > { %3943 = vst.msk [vmem:[%s5886_s18 + $0x34] sm:$0xf] %vm3929_vm3, %v4865_v38  ;;  %4055 = vst.msk [vmem:[%s5886_s18 + $0x1f4] sm:$0xf] %vm3929_vm3, %v4977_v39  ;;  %v1971_v42 = vadd.f32 %v5870_v61, %v1970_v40  ;;  %v2419_v43 = vadd.f32 %v5870_v61, %v2418_v41  ;;  %v1972_v44 = vpop.f32.mrb[29].mxu0  ;;  %v2420_v45 = vpop.f32.mrb[29].mxu1 }
 0x144   : > { %v1973_v48 = vpop.f32.mrb[30].mxu0  ;;  %v2421_v49 = vpop.f32.mrb[30].mxu1 }
 0x145   : > { %v2823_v52 = vmax.f32 %v1971_v42, 0.0  ;;  %v2935_v53 = vmax.f32 %v2419_v43, 0.0  ;;  %v1974_v54 = vadd.f32 %v5870_v61, %v1973_v48  ;;  %v2422_v55 = vadd.f32 %v5870_v61, %v2421_v49  ;;  %v1975_v56 = vpop.f32.mrb[31].mxu0  ;;  %v2423_v57 = vpop.f32.mrb[31].mxu1 }
 0x146   : > { %v5394_v56 = vld [vmem:[%s5682_s11 + $0x5d0] ss:$8 sps:$4 sm:$0xff]  }
 0x147   : > { %v4866_v58 = vpack.c.bf16 %v2823_v52, %v2823_v52  ;;  %v4978_v59 = vpack.c.bf16 %v2935_v53, %v2935_v53  ;;  %v2824_v60 = vmax.f32 %v1974_v54, 0.0  ;;  %v2936_v62 = vmax.f32 %v2422_v55, 0.0  ;;  %2185 = vmatmul.mubr.bf16.gmra.mrb[136].mxu0 %v5375_v46  ;;  %2633 = vmatmul.mubr.bf16.gmra.mrb[136].mxu1 %v5376_v47  ;;  %v5393_v55 = vld [vmem:[%s5682_s11 + $0x250] ss:$8 sps:$4 sm:$0xff]  }
 0x148   : > { %4547 = vmatprep.mubr.msk.bf16.mxu0 %vm1536_vm0, %v5377_v50  ;;  %4603 = vmatprep.mubr.msk.bf16.mxu1 %vm1536_vm0, %v5379_v51 }
 0x149   : > { %3944 = vst.msk [vmem:[%s5886_s18 + $0x38] sm:$0xf] %vm3929_vm3, %v4866_v58  ;;  %4056 = vst.msk [vmem:[%s5886_s18 + $0x1f8] sm:$0xf] %vm3929_vm3, %v4978_v59  ;;  %v4867_v63 = vpack.c.bf16 %v2824_v60, %v2824_v60  ;;  %v4979_v0 = vpack.c.bf16 %v2936_v62, %v2936_v62  ;;  %v5395_v59 = vld [vmem:[%s5682_s11 + $0x264] ss:$8 sps:$4 sm:$0xff]  }
 0x14a   : > { %v1978_v1 = vpop.f32.mrb[32].mxu0  ;;  %v2426_v2 = vpop.f32.mrb[32].mxu1  ;;  %v5397_v60 = vld [vmem:[%s5682_s11 + $0x5e4] ss:$8 sps:$4 sm:$0xff]  }
 0x14b   : > { %3945 = vst.msk [vmem:[%s5886_s18 + $0x3c] sm:$0xf] %vm3929_vm3, %v4867_v63  ;;  %4057 = vst.msk [vmem:[%s5886_s18 + $0x1fc] sm:$0xf] %vm3929_vm3, %v4979_v0  ;;  %v1979_v3 = vadd.f32 %v5870_v61, %v1978_v1  ;;  %v2427_v4 = vadd.f32 %v5870_v61, %v2426_v2  ;;  %v1980_v5 = vpop.f32.mrb[33].mxu0  ;;  %v2428_v6 = vpop.f32.mrb[33].mxu1 }
 0x14c   : > { %v1981_v9 = vpop.f32.mrb[34].mxu0  ;;  %v2429_v10 = vpop.f32.mrb[34].mxu1 }
 0x14d   : > { %v2825_v13 = vmax.f32 %v1979_v3, 0.0  ;;  %v2937_v14 = vmax.f32 %v2427_v4, 0.0  ;;  %v1982_v15 = vadd.f32 %v5870_v61, %v1981_v9  ;;  %v2430_v16 = vadd.f32 %v5870_v61, %v2429_v10  ;;  %v1983_v17 = vpop.f32.mrb[35].mxu0  ;;  %v2431_v18 = vpop.f32.mrb[35].mxu1 }
 0x14e   : > { %v5400_v17 = vld [vmem:[%s5682_s11 + $0x5e0] ss:$8 sps:$4 sm:$0xff]  }
 0x14f   : > { %v4868_v19 = vpack.c.bf16 %v2825_v13, %v2825_v13  ;;  %v4980_v20 = vpack.c.bf16 %v2937_v14, %v2937_v14  ;;  %v2826_v21 = vmax.f32 %v1982_v15, 0.0  ;;  %v2938_v22 = vmax.f32 %v2430_v16, 0.0  ;;  %2193 = vmatmul.mubr.bf16.gmra.mrb[140].mxu0 %v5381_v7  ;;  %2641 = vmatmul.mubr.bf16.gmra.mrb[140].mxu1 %v5382_v8  ;;  %v5399_v16 = vld [vmem:[%s5682_s11 + $0x260] ss:$8 sps:$4 sm:$0xff]  }
 0x150   : > { %4548 = vmatprep.mubr.msk.bf16.mxu0 %vm1536_vm0, %v5383_v11  ;;  %4604 = vmatprep.mubr.msk.bf16.mxu1 %vm1536_vm0, %v5385_v12 }
 0x151   : > { %3946 = vst.msk [vmem:[%s5886_s18 + $0x40] sm:$0xf] %vm3929_vm3, %v4868_v19  ;;  %4058 = vst.msk [vmem:[%s5886_s18 + $0x200] sm:$0xf] %vm3929_vm3, %v4980_v20  ;;  %v4869_v23 = vpack.c.bf16 %v2826_v21, %v2826_v21  ;;  %v4981_v24 = vpack.c.bf16 %v2938_v22, %v2938_v22  ;;  %v5401_v20 = vld [vmem:[%s5682_s11 + $0x274] ss:$8 sps:$4 sm:$0xff]  }
 0x152   : > { %v1986_v25 = vpop.f32.mrb[36].mxu0  ;;  %v2434_v26 = vpop.f32.mrb[36].mxu1  ;;  %v5403_v21 = vld [vmem:[%s5682_s11 + $0x5f4] ss:$8 sps:$4 sm:$0xff]  }
 0x153   : > { %3947 = vst.msk [vmem:[%s5886_s18 + $0x44] sm:$0xf] %vm3929_vm3, %v4869_v23  ;;  %4059 = vst.msk [vmem:[%s5886_s18 + $0x204] sm:$0xf] %vm3929_vm3, %v4981_v24  ;;  %v1987_v27 = vadd.f32 %v5870_v61, %v1986_v25  ;;  %v2435_v28 = vadd.f32 %v5870_v61, %v2434_v26  ;;  %v1988_v29 = vpop.f32.mrb[37].mxu0  ;;  %v2436_v30 = vpop.f32.mrb[37].mxu1 }
 0x154   : > { %v1989_v33 = vpop.f32.mrb[38].mxu0  ;;  %v2437_v34 = vpop.f32.mrb[38].mxu1 }
 0x155   : > { %v2827_v37 = vmax.f32 %v1987_v27, 0.0  ;;  %v2939_v38 = vmax.f32 %v2435_v28, 0.0  ;;  %v1990_v39 = vadd.f32 %v5870_v61, %v1989_v33  ;;  %v2438_v40 = vadd.f32 %v5870_v61, %v2437_v34  ;;  %v1991_v41 = vpop.f32.mrb[39].mxu0  ;;  %v2439_v42 = vpop.f32.mrb[39].mxu1 }
 0x156   : > { %v5406_v41 = vld [vmem:[%s5682_s11 + $0x5f0] ss:$8 sps:$4 sm:$0xff]  }
 0x157   : > { %v4870_v43 = vpack.c.bf16 %v2827_v37, %v2827_v37  ;;  %v4982_v44 = vpack.c.bf16 %v2939_v38, %v2939_v38  ;;  %v2828_v45 = vmax.f32 %v1990_v39, 0.0  ;;  %v2940_v46 = vmax.f32 %v2438_v40, 0.0  ;;  %2201 = vmatmul.mubr.bf16.gmra.mrb[144].mxu0 %v5387_v31  ;;  %2649 = vmatmul.mubr.bf16.gmra.mrb[144].mxu1 %v5388_v32  ;;  %v5405_v40 = vld [vmem:[%s5682_s11 + $0x270] ss:$8 sps:$4 sm:$0xff]  }
 0x158   : > { %4549 = vmatprep.mubr.msk.bf16.mxu0 %vm1536_vm0, %v5389_v35  ;;  %4605 = vmatprep.mubr.msk.bf16.mxu1 %vm1536_vm0, %v5391_v36 }
 0x159   : > { %3948 = vst.msk [vmem:[%s5886_s18 + $0x48] sm:$0xf] %vm3929_vm3, %v4870_v43  ;;  %4060 = vst.msk [vmem:[%s5886_s18 + $0x208] sm:$0xf] %vm3929_vm3, %v4982_v44  ;;  %v4871_v47 = vpack.c.bf16 %v2828_v45, %v2828_v45  ;;  %v4983_v48 = vpack.c.bf16 %v2940_v46, %v2940_v46  ;;  %v5407_v44 = vld [vmem:[%s5682_s11 + $0x284] ss:$8 sps:$4 sm:$0xff]  }
 0x15a   : > { %v1994_v49 = vpop.f32.mrb[40].mxu0  ;;  %v2442_v50 = vpop.f32.mrb[40].mxu1  ;;  %v5409_v45 = vld [vmem:[%s5682_s11 + $0x604] ss:$8 sps:$4 sm:$0xff]  }
 0x15b   : > { %3949 = vst.msk [vmem:[%s5886_s18 + $0x4c] sm:$0xf] %vm3929_vm3, %v4871_v47  ;;  %4061 = vst.msk [vmem:[%s5886_s18 + $0x20c] sm:$0xf] %vm3929_vm3, %v4983_v48  ;;  %v1995_v51 = vadd.f32 %v5870_v61, %v1994_v49  ;;  %v2443_v52 = vadd.f32 %v5870_v61, %v2442_v50  ;;  %v1996_v53 = vpop.f32.mrb[41].mxu0  ;;  %v2444_v54 = vpop.f32.mrb[41].mxu1 }
 0x15c   : > { %v1997_v57 = vpop.f32.mrb[42].mxu0  ;;  %v2445_v58 = vpop.f32.mrb[42].mxu1 }
 0x15d   : > { %v2829_v62 = vmax.f32 %v1995_v51, 0.0  ;;  %v2941_v63 = vmax.f32 %v2443_v52, 0.0  ;;  %v1998_v0 = vadd.f32 %v5870_v61, %v1997_v57  ;;  %v2446_v1 = vadd.f32 %v5870_v61, %v2445_v58  ;;  %v1999_v2 = vpop.f32.mrb[43].mxu0  ;;  %v2447_v3 = vpop.f32.mrb[43].mxu1 }
 0x15e   : > { %v5412_v2 = vld [vmem:[%s5682_s11 + $0x600] ss:$8 sps:$4 sm:$0xff]  }
 0x15f   : > { %v4872_v4 = vpack.c.bf16 %v2829_v62, %v2829_v62  ;;  %v4984_v5 = vpack.c.bf16 %v2941_v63, %v2941_v63  ;;  %v2830_v6 = vmax.f32 %v1998_v0, 0.0  ;;  %v2942_v7 = vmax.f32 %v2446_v1, 0.0  ;;  %2209 = vmatmul.mubr.bf16.gmra.mrb[148].mxu0 %v5393_v55  ;;  %2657 = vmatmul.mubr.bf16.gmra.mrb[148].mxu1 %v5394_v56  ;;  %v5411_v1 = vld [vmem:[%s5682_s11 + $0x280] ss:$8 sps:$4 sm:$0xff]  }
 0x160   : > { %4550 = vmatprep.mubr.msk.bf16.mxu0 %vm1536_vm0, %v5395_v59  ;;  %4606 = vmatprep.mubr.msk.bf16.mxu1 %vm1536_vm0, %v5397_v60 }
 0x161   : > { %3950 = vst.msk [vmem:[%s5886_s18 + $0x50] sm:$0xf] %vm3929_vm3, %v4872_v4  ;;  %4062 = vst.msk [vmem:[%s5886_s18 + $0x210] sm:$0xf] %vm3929_vm3, %v4984_v5  ;;  %v4873_v8 = vpack.c.bf16 %v2830_v6, %v2830_v6  ;;  %v4985_v9 = vpack.c.bf16 %v2942_v7, %v2942_v7  ;;  %v5413_v5 = vld [vmem:[%s5682_s11 + $0x294] ss:$8 sps:$4 sm:$0xff]  }
 0x162   : > { %v2002_v10 = vpop.f32.mrb[44].mxu0  ;;  %v2450_v11 = vpop.f32.mrb[44].mxu1  ;;  %v5415_v6 = vld [vmem:[%s5682_s11 + $0x614] ss:$8 sps:$4 sm:$0xff]  }
 0x163   : > { %3951 = vst.msk [vmem:[%s5886_s18 + $0x54] sm:$0xf] %vm3929_vm3, %v4873_v8  ;;  %4063 = vst.msk [vmem:[%s5886_s18 + $0x214] sm:$0xf] %vm3929_vm3, %v4985_v9  ;;  %v2003_v12 = vadd.f32 %v5870_v61, %v2002_v10  ;;  %v2451_v13 = vadd.f32 %v5870_v61, %v2450_v11  ;;  %v2004_v14 = vpop.f32.mrb[45].mxu0  ;;  %v2452_v15 = vpop.f32.mrb[45].mxu1 }
 0x164   : > { %v2005_v18 = vpop.f32.mrb[46].mxu0  ;;  %v2453_v19 = vpop.f32.mrb[46].mxu1 }
 0x165   : > { %v2831_v22 = vmax.f32 %v2003_v12, 0.0  ;;  %v2943_v23 = vmax.f32 %v2451_v13, 0.0  ;;  %v2006_v24 = vadd.f32 %v5870_v61, %v2005_v18  ;;  %v2454_v25 = vadd.f32 %v5870_v61, %v2453_v19  ;;  %v2007_v26 = vpop.f32.mrb[47].mxu0  ;;  %v2455_v27 = vpop.f32.mrb[47].mxu1 }
 0x166   : > { %v5418_v26 = vld [vmem:[%s5682_s11 + $0x610] ss:$8 sps:$4 sm:$0xff]  }
 0x167   : > { %v4874_v28 = vpack.c.bf16 %v2831_v22, %v2831_v22  ;;  %v4986_v29 = vpack.c.bf16 %v2943_v23, %v2943_v23  ;;  %v2832_v30 = vmax.f32 %v2006_v24, 0.0  ;;  %v2944_v31 = vmax.f32 %v2454_v25, 0.0  ;;  %2217 = vmatmul.mubr.bf16.gmra.mrb[152].mxu0 %v5399_v16  ;;  %2665 = vmatmul.mubr.bf16.gmra.mrb[152].mxu1 %v5400_v17  ;;  %v5417_v25 = vld [vmem:[%s5682_s11 + $0x290] ss:$8 sps:$4 sm:$0xff]  }
 0x168   : > { %4551 = vmatprep.mubr.msk.bf16.mxu0 %vm1536_vm0, %v5401_v20  ;;  %4607 = vmatprep.mubr.msk.bf16.mxu1 %vm1536_vm0, %v5403_v21 }
 0x169   : > { %3952 = vst.msk [vmem:[%s5886_s18 + $0x58] sm:$0xf] %vm3929_vm3, %v4874_v28  ;;  %4064 = vst.msk [vmem:[%s5886_s18 + $0x218] sm:$0xf] %vm3929_vm3, %v4986_v29  ;;  %v4875_v32 = vpack.c.bf16 %v2832_v30, %v2832_v30  ;;  %v4987_v33 = vpack.c.bf16 %v2944_v31, %v2944_v31  ;;  %v5419_v29 = vld [vmem:[%s5682_s11 + $0x2a4] ss:$8 sps:$4 sm:$0xff]  }
 0x16a   : > { %v2010_v34 = vpop.f32.mrb[48].mxu0  ;;  %v2458_v35 = vpop.f32.mrb[48].mxu1  ;;  %v5421_v30 = vld [vmem:[%s5682_s11 + $0x624] ss:$8 sps:$4 sm:$0xff]  }
 0x16b   : > { %3953 = vst.msk [vmem:[%s5886_s18 + $0x5c] sm:$0xf] %vm3929_vm3, %v4875_v32  ;;  %4065 = vst.msk [vmem:[%s5886_s18 + $0x21c] sm:$0xf] %vm3929_vm3, %v4987_v33  ;;  %v2011_v36 = vadd.f32 %v5870_v61, %v2010_v34  ;;  %v2459_v37 = vadd.f32 %v5870_v61, %v2458_v35  ;;  %v2012_v38 = vpop.f32.mrb[49].mxu0  ;;  %v2460_v39 = vpop.f32.mrb[49].mxu1 }
 0x16c   : > { %v2013_v42 = vpop.f32.mrb[50].mxu0  ;;  %v2461_v43 = vpop.f32.mrb[50].mxu1 }
 0x16d   : > { %v2833_v46 = vmax.f32 %v2011_v36, 0.0  ;;  %v2945_v47 = vmax.f32 %v2459_v37, 0.0  ;;  %v2014_v48 = vadd.f32 %v5870_v61, %v2013_v42  ;;  %v2462_v49 = vadd.f32 %v5870_v61, %v2461_v43  ;;  %v2015_v50 = vpop.f32.mrb[51].mxu0  ;;  %v2463_v51 = vpop.f32.mrb[51].mxu1 }
 0x16e   : > { %v5424_v50 = vld [vmem:[%s5682_s11 + $0x620] ss:$8 sps:$4 sm:$0xff]  }
 0x16f   : > { %v4876_v52 = vpack.c.bf16 %v2833_v46, %v2833_v46  ;;  %v4988_v53 = vpack.c.bf16 %v2945_v47, %v2945_v47  ;;  %v2834_v54 = vmax.f32 %v2014_v48, 0.0  ;;  %v2946_v55 = vmax.f32 %v2462_v49, 0.0  ;;  %2225 = vmatmul.mubr.bf16.gmra.mrb[156].mxu0 %v5405_v40  ;;  %2673 = vmatmul.mubr.bf16.gmra.mrb[156].mxu1 %v5406_v41  ;;  %v5423_v49 = vld [vmem:[%s5682_s11 + $0x2a0] ss:$8 sps:$4 sm:$0xff]  }
 0x170   : > { %4552 = vmatprep.mubr.msk.bf16.mxu0 %vm1536_vm0, %v5407_v44  ;;  %4608 = vmatprep.mubr.msk.bf16.mxu1 %vm1536_vm0, %v5409_v45 }
 0x171   : > { %3954 = vst.msk [vmem:[%s5886_s18 + $0x60] sm:$0xf] %vm3929_vm3, %v4876_v52  ;;  %4066 = vst.msk [vmem:[%s5886_s18 + $0x220] sm:$0xf] %vm3929_vm3, %v4988_v53  ;;  %v4877_v56 = vpack.c.bf16 %v2834_v54, %v2834_v54  ;;  %v4989_v57 = vpack.c.bf16 %v2946_v55, %v2946_v55  ;;  %v5425_v53 = vld [vmem:[%s5682_s11 + $0x2b4] ss:$8 sps:$4 sm:$0xff]  }
 0x172   : > { %v2018_v58 = vpop.f32.mrb[52].mxu0  ;;  %v2466_v59 = vpop.f32.mrb[52].mxu1  ;;  %v5427_v54 = vld [vmem:[%s5682_s11 + $0x634] ss:$8 sps:$4 sm:$0xff]  }
 0x173   : > { %3955 = vst.msk [vmem:[%s5886_s18 + $0x64] sm:$0xf] %vm3929_vm3, %v4877_v56  ;;  %4067 = vst.msk [vmem:[%s5886_s18 + $0x224] sm:$0xf] %vm3929_vm3, %v4989_v57  ;;  %v2019_v60 = vadd.f32 %v5870_v61, %v2018_v58  ;;  %v2467_v62 = vadd.f32 %v5870_v61, %v2466_v59  ;;  %v2020_v63 = vpop.f32.mrb[53].mxu0  ;;  %v2468_v0 = vpop.f32.mrb[53].mxu1 }
 0x174   : > { %v2021_v3 = vpop.f32.mrb[54].mxu0  ;;  %v2469_v4 = vpop.f32.mrb[54].mxu1 }
 0x175   : > { %v2835_v7 = vmax.f32 %v2019_v60, 0.0  ;;  %v2947_v8 = vmax.f32 %v2467_v62, 0.0  ;;  %v2022_v9 = vadd.f32 %v5870_v61, %v2021_v3  ;;  %v2470_v10 = vadd.f32 %v5870_v61, %v2469_v4  ;;  %v2023_v11 = vpop.f32.mrb[55].mxu0  ;;  %v2471_v12 = vpop.f32.mrb[55].mxu1 }
 0x176   : > { %v5430_v11 = vld [vmem:[%s5682_s11 + $0x630] ss:$8 sps:$4 sm:$0xff]  }
 0x177   : > { %v4878_v13 = vpack.c.bf16 %v2835_v7, %v2835_v7  ;;  %v4990_v14 = vpack.c.bf16 %v2947_v8, %v2947_v8  ;;  %v2836_v15 = vmax.f32 %v2022_v9, 0.0  ;;  %v2948_v16 = vmax.f32 %v2470_v10, 0.0  ;;  %2233 = vmatmul.mubr.bf16.gmra.mrb[160].mxu0 %v5411_v1  ;;  %2681 = vmatmul.mubr.bf16.gmra.mrb[160].mxu1 %v5412_v2  ;;  %v5429_v10 = vld [vmem:[%s5682_s11 + $0x2b0] ss:$8 sps:$4 sm:$0xff]  }
 0x178   : > { %4553 = vmatprep.mubr.msk.bf16.mxu0 %vm1536_vm0, %v5413_v5  ;;  %4609 = vmatprep.mubr.msk.bf16.mxu1 %vm1536_vm0, %v5415_v6  ;;  %v6169_v5 = vld [vmem:[%s6788_s2] ss:$0 sm:$0xff] }
 0x179   : > { %3956 = vst.msk [vmem:[%s5886_s18 + $0x68] sm:$0xf] %vm3929_vm3, %v4878_v13  ;;  %4068 = vst.msk [vmem:[%s5886_s18 + $0x228] sm:$0xf] %vm3929_vm3, %v4990_v14  ;;  %v4879_v17 = vpack.c.bf16 %v2836_v15, %v2836_v15  ;;  %v4991_v18 = vpack.c.bf16 %v2948_v16, %v2948_v16  ;;  %v5431_v14 = vld [vmem:[%s5682_s11 + $0x2c4] ss:$8 sps:$4 sm:$0xff]  }
 0x17a   : > { %v2026_v19 = vpop.f32.mrb[56].mxu0  ;;  %v2474_v20 = vpop.f32.mrb[56].mxu1  ;;  %v5433_v15 = vld [vmem:[%s5682_s11 + $0x644] ss:$8 sps:$4 sm:$0xff]  }
 0x17b   : > { %3957 = vst.msk [vmem:[%s5886_s18 + $0x6c] sm:$0xf] %vm3929_vm3, %v4879_v17  ;;  %4069 = vst.msk [vmem:[%s5886_s18 + $0x22c] sm:$0xf] %vm3929_vm3, %v4991_v18  ;;  %v2027_v21 = vadd.f32 %v5870_v61, %v2026_v19  ;;  %v2475_v22 = vadd.f32 %v5870_v61, %v2474_v20  ;;  %v2028_v23 = vpop.f32.mrb[57].mxu0  ;;  %v2476_v24 = vpop.f32.mrb[57].mxu1 }
 0x17c   : > { %v2029_v27 = vpop.f32.mrb[58].mxu0  ;;  %v2477_v28 = vpop.f32.mrb[58].mxu1 }
 0x17d   : > { %v2837_v31 = vmax.f32 %v2027_v21, 0.0  ;;  %v2949_v32 = vmax.f32 %v2475_v22, 0.0  ;;  %v2030_v33 = vadd.f32 %v5870_v61, %v2029_v27  ;;  %v2478_v34 = vadd.f32 %v5870_v61, %v2477_v28  ;;  %v2031_v35 = vpop.f32.mrb[59].mxu0  ;;  %v2479_v36 = vpop.f32.mrb[59].mxu1 }
 0x17e   : > { %v5436_v35 = vld [vmem:[%s5682_s11 + $0x640] ss:$8 sps:$4 sm:$0xff]  }
 0x17f   : > { %v4880_v37 = vpack.c.bf16 %v2837_v31, %v2837_v31  ;;  %v4992_v38 = vpack.c.bf16 %v2949_v32, %v2949_v32  ;;  %v2838_v39 = vmax.f32 %v2030_v33, 0.0  ;;  %v2950_v40 = vmax.f32 %v2478_v34, 0.0  ;;  %2241 = vmatmul.mubr.bf16.gmra.mrb[164].mxu0 %v5417_v25  ;;  %2689 = vmatmul.mubr.bf16.gmra.mrb[164].mxu1 %v5418_v26  ;;  %v5435_v34 = vld [vmem:[%s5682_s11 + $0x2c0] ss:$8 sps:$4 sm:$0xff]  }
 0x180   : > { %4554 = vmatprep.mubr.msk.bf16.mxu0 %vm1536_vm0, %v5419_v29  ;;  %4610 = vmatprep.mubr.msk.bf16.mxu1 %vm1536_vm0, %v5421_v30 }
 0x181   : > { %3958 = vst.msk [vmem:[%s5886_s18 + $0x70] sm:$0xf] %vm3929_vm3, %v4880_v37  ;;  %4070 = vst.msk [vmem:[%s5886_s18 + $0x230] sm:$0xf] %vm3929_vm3, %v4992_v38  ;;  %v4881_v41 = vpack.c.bf16 %v2838_v39, %v2838_v39  ;;  %v4993_v42 = vpack.c.bf16 %v2950_v40, %v2950_v40  ;;  %v5437_v38 = vld [vmem:[%s5682_s11 + $0x2d4] ss:$8 sps:$4 sm:$0xff]  }
 0x182   : > { %v2034_v43 = vpop.f32.mrb[60].mxu0  ;;  %v2482_v44 = vpop.f32.mrb[60].mxu1  ;;  %v5439_v39 = vld [vmem:[%s5682_s11 + $0x654] ss:$8 sps:$4 sm:$0xff]  }
 0x183   : > { %3959 = vst.msk [vmem:[%s5886_s18 + $0x74] sm:$0xf] %vm3929_vm3, %v4881_v41  ;;  %4071 = vst.msk [vmem:[%s5886_s18 + $0x234] sm:$0xf] %vm3929_vm3, %v4993_v42  ;;  %v2035_v45 = vadd.f32 %v5870_v61, %v2034_v43  ;;  %v2483_v46 = vadd.f32 %v5870_v61, %v2482_v44  ;;  %v2036_v47 = vpop.f32.mrb[61].mxu0  ;;  %v2484_v48 = vpop.f32.mrb[61].mxu1 }
 0x184   : > { %v2037_v51 = vpop.f32.mrb[62].mxu0  ;;  %v2485_v52 = vpop.f32.mrb[62].mxu1 }
 0x185   : > { %v2839_v55 = vmax.f32 %v2035_v45, 0.0  ;;  %v2951_v56 = vmax.f32 %v2483_v46, 0.0  ;;  %v2038_v57 = vadd.f32 %v5870_v61, %v2037_v51  ;;  %v2486_v58 = vadd.f32 %v5870_v61, %v2485_v52  ;;  %v2039_v59 = vpop.f32.mrb[63].mxu0  ;;  %v2487_v60 = vpop.f32.mrb[63].mxu1 }
 0x186   : > { %v5442_v59 = vld [vmem:[%s5682_s11 + $0x650] ss:$8 sps:$4 sm:$0xff]  }
 0x187   : > { %v4882_v62 = vpack.c.bf16 %v2839_v55, %v2839_v55  ;;  %v4994_v63 = vpack.c.bf16 %v2951_v56, %v2951_v56  ;;  %v2840_v0 = vmax.f32 %v2038_v57, 0.0  ;;  %v2952_v1 = vmax.f32 %v2486_v58, 0.0  ;;  %2249 = vmatmul.mubr.bf16.gmra.mrb[168].mxu0 %v5423_v49  ;;  %2697 = vmatmul.mubr.bf16.gmra.mrb[168].mxu1 %v5424_v50  ;;  %v5441_v58 = vld [vmem:[%s5682_s11 + $0x2d0] ss:$8 sps:$4 sm:$0xff]  }
 0x188   : > { %4555 = vmatprep.mubr.msk.bf16.mxu0 %vm1536_vm0, %v5425_v53  ;;  %4611 = vmatprep.mubr.msk.bf16.mxu1 %vm1536_vm0, %v5427_v54 }
 0x189   : > { %3960 = vst.msk [vmem:[%s5886_s18 + $0x78] sm:$0xf] %vm3929_vm3, %v4882_v62  ;;  %4072 = vst.msk [vmem:[%s5886_s18 + $0x238] sm:$0xf] %vm3929_vm3, %v4994_v63  ;;  %v4883_v61 = vpack.c.bf16 %v2840_v0, %v2840_v0  ;;  %v4995_v2 = vpack.c.bf16 %v2952_v1, %v2952_v1  ;;  %v5443_v63 = vld [vmem:[%s5682_s11 + $0x2e4] ss:$8 sps:$4 sm:$0xff]  }
 0x18a   : > { %v2042_v3 = vpop.f32.mrb[64].mxu0  ;;  %v2490_v4 = vpop.f32.mrb[64].mxu1  ;;  %v5445_v0 = vld [vmem:[%s5682_s11 + $0x664] ss:$8 sps:$4 sm:$0xff]  }
 0x18b   : > { %3961 = vst.msk [vmem:[%s5886_s18 + $0x7c] sm:$0xf] %vm3929_vm3, %v4883_v61  ;;  %4073 = vst.msk [vmem:[%s5886_s18 + $0x23c] sm:$0xf] %vm3929_vm3, %v4995_v2  ;;  %v2043_v6 = vadd.f32 %v6169_v5, %v2042_v3  ;;  %v2491_v7 = vadd.f32 %v6169_v5, %v2490_v4  ;;  %v2044_v8 = vpop.f32.mrb[65].mxu0  ;;  %v2492_v9 = vpop.f32.mrb[65].mxu1 }
 0x18c   : > { %v2045_v12 = vpop.f32.mrb[66].mxu0  ;;  %v2493_v13 = vpop.f32.mrb[66].mxu1 }
 0x18d   : > { %v2841_v16 = vmax.f32 %v2043_v6, 0.0  ;;  %v2953_v17 = vmax.f32 %v2491_v7, 0.0  ;;  %v2046_v18 = vadd.f32 %v6169_v5, %v2045_v12  ;;  %v2494_v19 = vadd.f32 %v6169_v5, %v2493_v13  ;;  %v2047_v20 = vpop.f32.mrb[67].mxu0  ;;  %v2495_v21 = vpop.f32.mrb[67].mxu1 }
 0x18e   : > { %v5448_v20 = vld [vmem:[%s5682_s11 + $0x660] ss:$8 sps:$4 sm:$0xff]  }
 0x18f   : > { %v4884_v22 = vpack.c.bf16 %v2841_v16, %v2841_v16  ;;  %v4996_v23 = vpack.c.bf16 %v2953_v17, %v2953_v17  ;;  %v2842_v24 = vmax.f32 %v2046_v18, 0.0  ;;  %v2954_v25 = vmax.f32 %v2494_v19, 0.0  ;;  %2257 = vmatmul.mubr.bf16.gmra.mrb[172].mxu0 %v5429_v10  ;;  %2705 = vmatmul.mubr.bf16.gmra.mrb[172].mxu1 %v5430_v11  ;;  %v5447_v19 = vld [vmem:[%s5682_s11 + $0x2e0] ss:$8 sps:$4 sm:$0xff]  }
 0x190   : > { %4556 = vmatprep.mubr.msk.bf16.mxu0 %vm1536_vm0, %v5431_v14  ;;  %4612 = vmatprep.mubr.msk.bf16.mxu1 %vm1536_vm0, %v5433_v15 }
 0x191   : > { %3962 = vst.msk [vmem:[%s5886_s18 + $0x80] sm:$0xf] %vm3929_vm3, %v4884_v22  ;;  %4074 = vst.msk [vmem:[%s5886_s18 + $0x240] sm:$0xf] %vm3929_vm3, %v4996_v23  ;;  %v4885_v26 = vpack.c.bf16 %v2842_v24, %v2842_v24  ;;  %v4997_v27 = vpack.c.bf16 %v2954_v25, %v2954_v25  ;;  %v5449_v23 = vld [vmem:[%s5682_s11 + $0x2f4] ss:$8 sps:$4 sm:$0xff]  }
 0x192   : > { %v2050_v28 = vpop.f32.mrb[68].mxu0  ;;  %v2498_v29 = vpop.f32.mrb[68].mxu1  ;;  %v5451_v24 = vld [vmem:[%s5682_s11 + $0x674] ss:$8 sps:$4 sm:$0xff]  }
 0x193   : > { %3963 = vst.msk [vmem:[%s5886_s18 + $0x84] sm:$0xf] %vm3929_vm3, %v4885_v26  ;;  %4075 = vst.msk [vmem:[%s5886_s18 + $0x244] sm:$0xf] %vm3929_vm3, %v4997_v27  ;;  %v2051_v30 = vadd.f32 %v6169_v5, %v2050_v28  ;;  %v2499_v31 = vadd.f32 %v6169_v5, %v2498_v29  ;;  %v2052_v32 = vpop.f32.mrb[69].mxu0  ;;  %v2500_v33 = vpop.f32.mrb[69].mxu1 }
 0x194   : > { %v2053_v36 = vpop.f32.mrb[70].mxu0  ;;  %v2501_v37 = vpop.f32.mrb[70].mxu1 }
 0x195   : > { %v2843_v40 = vmax.f32 %v2051_v30, 0.0  ;;  %v2955_v41 = vmax.f32 %v2499_v31, 0.0  ;;  %v2054_v42 = vadd.f32 %v6169_v5, %v2053_v36  ;;  %v2502_v43 = vadd.f32 %v6169_v5, %v2501_v37  ;;  %v2055_v44 = vpop.f32.mrb[71].mxu0  ;;  %v2503_v45 = vpop.f32.mrb[71].mxu1 }
 0x196   : > { %v5454_v44 = vld [vmem:[%s5682_s11 + $0x670] ss:$8 sps:$4 sm:$0xff]  }
 0x197   : > { %v4886_v46 = vpack.c.bf16 %v2843_v40, %v2843_v40  ;;  %v4998_v47 = vpack.c.bf16 %v2955_v41, %v2955_v41  ;;  %v2844_v48 = vmax.f32 %v2054_v42, 0.0  ;;  %v2956_v49 = vmax.f32 %v2502_v43, 0.0  ;;  %2265 = vmatmul.mubr.bf16.gmra.mrb[176].mxu0 %v5435_v34  ;;  %2713 = vmatmul.mubr.bf16.gmra.mrb[176].mxu1 %v5436_v35  ;;  %v5453_v43 = vld [vmem:[%s5682_s11 + $0x2f0] ss:$8 sps:$4 sm:$0xff]  }
 0x198   : > { %4557 = vmatprep.mubr.msk.bf16.mxu0 %vm1536_vm0, %v5437_v38  ;;  %4613 = vmatprep.mubr.msk.bf16.mxu1 %vm1536_vm0, %v5439_v39 }
 0x199   : > { %3964 = vst.msk [vmem:[%s5886_s18 + $0x88] sm:$0xf] %vm3929_vm3, %v4886_v46  ;;  %4076 = vst.msk [vmem:[%s5886_s18 + $0x248] sm:$0xf] %vm3929_vm3, %v4998_v47  ;;  %v4887_v50 = vpack.c.bf16 %v2844_v48, %v2844_v48  ;;  %v4999_v51 = vpack.c.bf16 %v2956_v49, %v2956_v49  ;;  %v5455_v47 = vld [vmem:[%s5682_s11 + $0x304] ss:$8 sps:$4 sm:$0xff]  }
 0x19a   : > { %v2058_v52 = vpop.f32.mrb[72].mxu0  ;;  %v2506_v53 = vpop.f32.mrb[72].mxu1  ;;  %v5457_v48 = vld [vmem:[%s5682_s11 + $0x684] ss:$8 sps:$4 sm:$0xff]  }
 0x19b   : > { %3965 = vst.msk [vmem:[%s5886_s18 + $0x8c] sm:$0xf] %vm3929_vm3, %v4887_v50  ;;  %4077 = vst.msk [vmem:[%s5886_s18 + $0x24c] sm:$0xf] %vm3929_vm3, %v4999_v51  ;;  %v2059_v54 = vadd.f32 %v6169_v5, %v2058_v52  ;;  %v2507_v55 = vadd.f32 %v6169_v5, %v2506_v53  ;;  %v2060_v56 = vpop.f32.mrb[73].mxu0  ;;  %v2508_v57 = vpop.f32.mrb[73].mxu1 }
 0x19c   : > { %v2061_v60 = vpop.f32.mrb[74].mxu0  ;;  %v2509_v62 = vpop.f32.mrb[74].mxu1 }
 0x19d   : > { %v2845_v1 = vmax.f32 %v2059_v54, 0.0  ;;  %v2957_v61 = vmax.f32 %v2507_v55, 0.0  ;;  %v2062_v2 = vadd.f32 %v6169_v5, %v2061_v60  ;;  %v2510_v3 = vadd.f32 %v6169_v5, %v2509_v62  ;;  %v2063_v4 = vpop.f32.mrb[75].mxu0  ;;  %v2511_v6 = vpop.f32.mrb[75].mxu1 }
 0x19e   : > { %v5460_v4 = vld [vmem:[%s5682_s11 + $0x680] ss:$8 sps:$4 sm:$0xff]  }
 0x19f   : > { %v4888_v7 = vpack.c.bf16 %v2845_v1, %v2845_v1  ;;  %v5000_v8 = vpack.c.bf16 %v2957_v61, %v2957_v61  ;;  %v2846_v9 = vmax.f32 %v2062_v2, 0.0  ;;  %v2958_v10 = vmax.f32 %v2510_v3, 0.0  ;;  %2273 = vmatmul.mubr.bf16.gmra.mrb[180].mxu0 %v5441_v58  ;;  %2721 = vmatmul.mubr.bf16.gmra.mrb[180].mxu1 %v5442_v59  ;;  %v5459_v3 = vld [vmem:[%s5682_s11 + $0x300] ss:$8 sps:$4 sm:$0xff]  }
 0x1a0   : > { %4558 = vmatprep.mubr.msk.bf16.mxu0 %vm1536_vm0, %v5443_v63  ;;  %4614 = vmatprep.mubr.msk.bf16.mxu1 %vm1536_vm0, %v5445_v0 }
 0x1a1   : > { %3966 = vst.msk [vmem:[%s5886_s18 + $0x90] sm:$0xf] %vm3929_vm3, %v4888_v7  ;;  %4078 = vst.msk [vmem:[%s5886_s18 + $0x250] sm:$0xf] %vm3929_vm3, %v5000_v8  ;;  %v4889_v11 = vpack.c.bf16 %v2846_v9, %v2846_v9  ;;  %v5001_v12 = vpack.c.bf16 %v2958_v10, %v2958_v10  ;;  %v5461_v8 = vld [vmem:[%s5682_s11 + $0x314] ss:$8 sps:$4 sm:$0xff]  }
 0x1a2   : > { %v2066_v13 = vpop.f32.mrb[76].mxu0  ;;  %v2514_v14 = vpop.f32.mrb[76].mxu1  ;;  %v5463_v9 = vld [vmem:[%s5682_s11 + $0x694] ss:$8 sps:$4 sm:$0xff]  }
 0x1a3   : > { %3967 = vst.msk [vmem:[%s5886_s18 + $0x94] sm:$0xf] %vm3929_vm3, %v4889_v11  ;;  %4079 = vst.msk [vmem:[%s5886_s18 + $0x254] sm:$0xf] %vm3929_vm3, %v5001_v12  ;;  %v2067_v15 = vadd.f32 %v6169_v5, %v2066_v13  ;;  %v2515_v16 = vadd.f32 %v6169_v5, %v2514_v14  ;;  %v2068_v17 = vpop.f32.mrb[77].mxu0  ;;  %v2516_v18 = vpop.f32.mrb[77].mxu1 }
 0x1a4   : > { %v2069_v21 = vpop.f32.mrb[78].mxu0  ;;  %v2517_v22 = vpop.f32.mrb[78].mxu1 }
 0x1a5   : > { %v2847_v25 = vmax.f32 %v2067_v15, 0.0  ;;  %v2959_v26 = vmax.f32 %v2515_v16, 0.0  ;;  %v2070_v27 = vadd.f32 %v6169_v5, %v2069_v21  ;;  %v2518_v28 = vadd.f32 %v6169_v5, %v2517_v22  ;;  %v2071_v29 = vpop.f32.mrb[79].mxu0  ;;  %v2519_v30 = vpop.f32.mrb[79].mxu1 }
 0x1a6   : > { %v5466_v29 = vld [vmem:[%s5682_s11 + $0x690] ss:$8 sps:$4 sm:$0xff]  }
 0x1a7   : > { %v4890_v31 = vpack.c.bf16 %v2847_v25, %v2847_v25  ;;  %v5002_v32 = vpack.c.bf16 %v2959_v26, %v2959_v26  ;;  %v2848_v33 = vmax.f32 %v2070_v27, 0.0  ;;  %v2960_v34 = vmax.f32 %v2518_v28, 0.0  ;;  %2281 = vmatmul.mubr.bf16.gmra.mrb[184].mxu0 %v5447_v19  ;;  %2729 = vmatmul.mubr.bf16.gmra.mrb[184].mxu1 %v5448_v20  ;;  %v5465_v28 = vld [vmem:[%s5682_s11 + $0x310] ss:$8 sps:$4 sm:$0xff]  }
 0x1a8   : > { %4559 = vmatprep.mubr.msk.bf16.mxu0 %vm1536_vm0, %v5449_v23  ;;  %4615 = vmatprep.mubr.msk.bf16.mxu1 %vm1536_vm0, %v5451_v24 }
 0x1a9   : > { %3968 = vst.msk [vmem:[%s5886_s18 + $0x98] sm:$0xf] %vm3929_vm3, %v4890_v31  ;;  %4080 = vst.msk [vmem:[%s5886_s18 + $0x258] sm:$0xf] %vm3929_vm3, %v5002_v32  ;;  %v4891_v35 = vpack.c.bf16 %v2848_v33, %v2848_v33  ;;  %v5003_v36 = vpack.c.bf16 %v2960_v34, %v2960_v34  ;;  %v5467_v32 = vld [vmem:[%s5682_s11 + $0x324] ss:$8 sps:$4 sm:$0xff]  }
 0x1aa   : > { %v2074_v37 = vpop.f32.mrb[80].mxu0  ;;  %v2522_v38 = vpop.f32.mrb[80].mxu1  ;;  %v5469_v33 = vld [vmem:[%s5682_s11 + $0x6a4] ss:$8 sps:$4 sm:$0xff]  }
 0x1ab   : > { %3969 = vst.msk [vmem:[%s5886_s18 + $0x9c] sm:$0xf] %vm3929_vm3, %v4891_v35  ;;  %4081 = vst.msk [vmem:[%s5886_s18 + $0x25c] sm:$0xf] %vm3929_vm3, %v5003_v36  ;;  %v2075_v39 = vadd.f32 %v6169_v5, %v2074_v37  ;;  %v2523_v40 = vadd.f32 %v6169_v5, %v2522_v38  ;;  %v2076_v41 = vpop.f32.mrb[81].mxu0  ;;  %v2524_v42 = vpop.f32.mrb[81].mxu1 }
 0x1ac   : > { %v2077_v45 = vpop.f32.mrb[82].mxu0  ;;  %v2525_v46 = vpop.f32.mrb[82].mxu1 }
 0x1ad   : > { %v2849_v49 = vmax.f32 %v2075_v39, 0.0  ;;  %v2961_v50 = vmax.f32 %v2523_v40, 0.0  ;;  %v2078_v51 = vadd.f32 %v6169_v5, %v2077_v45  ;;  %v2526_v52 = vadd.f32 %v6169_v5, %v2525_v46  ;;  %v2079_v53 = vpop.f32.mrb[83].mxu0  ;;  %v2527_v54 = vpop.f32.mrb[83].mxu1 }
 0x1ae   : > { %v5472_v53 = vld [vmem:[%s5682_s11 + $0x6a0] ss:$8 sps:$4 sm:$0xff]  }
 0x1af   : > { %v4892_v55 = vpack.c.bf16 %v2849_v49, %v2849_v49  ;;  %v5004_v56 = vpack.c.bf16 %v2961_v50, %v2961_v50  ;;  %v2850_v57 = vmax.f32 %v2078_v51, 0.0  ;;  %v2962_v58 = vmax.f32 %v2526_v52, 0.0  ;;  %2289 = vmatmul.mubr.bf16.gmra.mrb[188].mxu0 %v5453_v43  ;;  %2737 = vmatmul.mubr.bf16.gmra.mrb[188].mxu1 %v5454_v44  ;;  %v5471_v52 = vld [vmem:[%s5682_s11 + $0x320] ss:$8 sps:$4 sm:$0xff]  }
 0x1b0   : > { %4560 = vmatprep.mubr.msk.bf16.mxu0 %vm1536_vm0, %v5455_v47  ;;  %4616 = vmatprep.mubr.msk.bf16.mxu1 %vm1536_vm0, %v5457_v48 }
 0x1b1   : > { %3970 = vst.msk [vmem:[%s5886_s18 + $0xa0] sm:$0xf] %vm3929_vm3, %v4892_v55  ;;  %4082 = vst.msk [vmem:[%s5886_s18 + $0x260] sm:$0xf] %vm3929_vm3, %v5004_v56  ;;  %v4893_v59 = vpack.c.bf16 %v2850_v57, %v2850_v57  ;;  %v5005_v60 = vpack.c.bf16 %v2962_v58, %v2962_v58  ;;  %v5473_v56 = vld [vmem:[%s5682_s11 + $0x334] ss:$8 sps:$4 sm:$0xff]  }
 0x1b2   : > { %v2082_v62 = vpop.f32.mrb[84].mxu0  ;;  %v2530_v63 = vpop.f32.mrb[84].mxu1  ;;  %v5475_v57 = vld [vmem:[%s5682_s11 + $0x6b4] ss:$8 sps:$4 sm:$0xff]  }
 0x1b3   : > { %3971 = vst.msk [vmem:[%s5886_s18 + $0xa4] sm:$0xf] %vm3929_vm3, %v4893_v59  ;;  %4083 = vst.msk [vmem:[%s5886_s18 + $0x264] sm:$0xf] %vm3929_vm3, %v5005_v60  ;;  %v2083_v0 = vadd.f32 %v6169_v5, %v2082_v62  ;;  %v2531_v1 = vadd.f32 %v6169_v5, %v2530_v63  ;;  %v2084_v61 = vpop.f32.mrb[85].mxu0  ;;  %v2532_v2 = vpop.f32.mrb[85].mxu1 }
 0x1b4   : > { %v2085_v6 = vpop.f32.mrb[86].mxu0  ;;  %v2533_v7 = vpop.f32.mrb[86].mxu1 }
 0x1b5   : > { %v2851_v10 = vmax.f32 %v2083_v0, 0.0  ;;  %v2963_v11 = vmax.f32 %v2531_v1, 0.0  ;;  %v2086_v12 = vadd.f32 %v6169_v5, %v2085_v6  ;;  %v2534_v13 = vadd.f32 %v6169_v5, %v2533_v7  ;;  %v2087_v14 = vpop.f32.mrb[87].mxu0  ;;  %v2535_v15 = vpop.f32.mrb[87].mxu1 }
 0x1b6   : > { %v5478_v14 = vld [vmem:[%s5682_s11 + $0x6b0] ss:$8 sps:$4 sm:$0xff]  }
 0x1b7   : > { %v4894_v16 = vpack.c.bf16 %v2851_v10, %v2851_v10  ;;  %v5006_v17 = vpack.c.bf16 %v2963_v11, %v2963_v11  ;;  %v2852_v18 = vmax.f32 %v2086_v12, 0.0  ;;  %v2964_v19 = vmax.f32 %v2534_v13, 0.0  ;;  %2297 = vmatmul.mubr.bf16.gmra.mrb[192].mxu0 %v5459_v3  ;;  %2745 = vmatmul.mubr.bf16.gmra.mrb[192].mxu1 %v5460_v4  ;;  %v5477_v13 = vld [vmem:[%s5682_s11 + $0x330] ss:$8 sps:$4 sm:$0xff]  }
 0x1b8   : > { %4561 = vmatprep.mubr.msk.bf16.mxu0 %vm1536_vm0, %v5461_v8  ;;  %4617 = vmatprep.mubr.msk.bf16.mxu1 %vm1536_vm0, %v5463_v9 }
 0x1b9   : > { %3972 = vst.msk [vmem:[%s5886_s18 + $0xa8] sm:$0xf] %vm3929_vm3, %v4894_v16  ;;  %4084 = vst.msk [vmem:[%s5886_s18 + $0x268] sm:$0xf] %vm3929_vm3, %v5006_v17  ;;  %v4895_v20 = vpack.c.bf16 %v2852_v18, %v2852_v18  ;;  %v5007_v21 = vpack.c.bf16 %v2964_v19, %v2964_v19  ;;  %v5479_v17 = vld [vmem:[%s5682_s11 + $0x344] ss:$8 sps:$4 sm:$0xff]  }
 0x1ba   : > { %v2090_v22 = vpop.f32.mrb[88].mxu0  ;;  %v2538_v23 = vpop.f32.mrb[88].mxu1  ;;  %v5481_v18 = vld [vmem:[%s5682_s11 + $0x6c4] ss:$8 sps:$4 sm:$0xff]  }
 0x1bb   : > { %3973 = vst.msk [vmem:[%s5886_s18 + $0xac] sm:$0xf] %vm3929_vm3, %v4895_v20  ;;  %4085 = vst.msk [vmem:[%s5886_s18 + $0x26c] sm:$0xf] %vm3929_vm3, %v5007_v21  ;;  %v2091_v24 = vadd.f32 %v6169_v5, %v2090_v22  ;;  %v2539_v25 = vadd.f32 %v6169_v5, %v2538_v23  ;;  %v2092_v26 = vpop.f32.mrb[89].mxu0  ;;  %v2540_v27 = vpop.f32.mrb[89].mxu1 }
 0x1bc   : > { %v2093_v30 = vpop.f32.mrb[90].mxu0  ;;  %v2541_v31 = vpop.f32.mrb[90].mxu1 }
 0x1bd   : > { %v2853_v34 = vmax.f32 %v2091_v24, 0.0  ;;  %v2965_v35 = vmax.f32 %v2539_v25, 0.0  ;;  %v2094_v36 = vadd.f32 %v6169_v5, %v2093_v30  ;;  %v2542_v37 = vadd.f32 %v6169_v5, %v2541_v31  ;;  %v2095_v38 = vpop.f32.mrb[91].mxu0  ;;  %v2543_v39 = vpop.f32.mrb[91].mxu1 }
 0x1be   : > { %v5484_v38 = vld [vmem:[%s5682_s11 + $0x6c0] ss:$8 sps:$4 sm:$0xff]  }
 0x1bf   : > { %v4896_v40 = vpack.c.bf16 %v2853_v34, %v2853_v34  ;;  %v5008_v41 = vpack.c.bf16 %v2965_v35, %v2965_v35  ;;  %v2854_v42 = vmax.f32 %v2094_v36, 0.0  ;;  %v2966_v43 = vmax.f32 %v2542_v37, 0.0  ;;  %2305 = vmatmul.mubr.bf16.gmra.mrb[196].mxu0 %v5465_v28  ;;  %2753 = vmatmul.mubr.bf16.gmra.mrb[196].mxu1 %v5466_v29  ;;  %v5483_v37 = vld [vmem:[%s5682_s11 + $0x340] ss:$8 sps:$4 sm:$0xff]  }
 0x1c0   : > { %4562 = vmatprep.mubr.msk.bf16.mxu0 %vm1536_vm0, %v5467_v32  ;;  %4618 = vmatprep.mubr.msk.bf16.mxu1 %vm1536_vm0, %v5469_v33 }
 0x1c1   : > { %3974 = vst.msk [vmem:[%s5886_s18 + $0xb0] sm:$0xf] %vm3929_vm3, %v4896_v40  ;;  %4086 = vst.msk [vmem:[%s5886_s18 + $0x270] sm:$0xf] %vm3929_vm3, %v5008_v41  ;;  %v4897_v44 = vpack.c.bf16 %v2854_v42, %v2854_v42  ;;  %v5009_v45 = vpack.c.bf16 %v2966_v43, %v2966_v43  ;;  %v5485_v41 = vld [vmem:[%s5682_s11 + $0x354] ss:$8 sps:$4 sm:$0xff]  }
 0x1c2   : > { %v2098_v46 = vpop.f32.mrb[92].mxu0  ;;  %v2546_v47 = vpop.f32.mrb[92].mxu1  ;;  %v5487_v42 = vld [vmem:[%s5682_s11 + $0x6d4] ss:$8 sps:$4 sm:$0xff]  }
 0x1c3   : > { %3975 = vst.msk [vmem:[%s5886_s18 + $0xb4] sm:$0xf] %vm3929_vm3, %v4897_v44  ;;  %4087 = vst.msk [vmem:[%s5886_s18 + $0x274] sm:$0xf] %vm3929_vm3, %v5009_v45  ;;  %v2099_v48 = vadd.f32 %v6169_v5, %v2098_v46  ;;  %v2547_v49 = vadd.f32 %v6169_v5, %v2546_v47  ;;  %v2100_v50 = vpop.f32.mrb[93].mxu0  ;;  %v2548_v51 = vpop.f32.mrb[93].mxu1 }
 0x1c4   : > { %v2101_v54 = vpop.f32.mrb[94].mxu0  ;;  %v2549_v55 = vpop.f32.mrb[94].mxu1 }
 0x1c5   : > { %v2855_v58 = vmax.f32 %v2099_v48, 0.0  ;;  %v2967_v59 = vmax.f32 %v2547_v49, 0.0  ;;  %v2102_v60 = vadd.f32 %v6169_v5, %v2101_v54  ;;  %v2550_v62 = vadd.f32 %v6169_v5, %v2549_v55  ;;  %v2103_v63 = vpop.f32.mrb[95].mxu0  ;;  %v2551_v0 = vpop.f32.mrb[95].mxu1 }
 0x1c6   : > { %v5490_v63 = vld [vmem:[%s5682_s11 + $0x6d0] ss:$8 sps:$4 sm:$0xff]  }
 0x1c7   : > { %v4898_v1 = vpack.c.bf16 %v2855_v58, %v2855_v58  ;;  %v5010_v61 = vpack.c.bf16 %v2967_v59, %v2967_v59  ;;  %v2856_v2 = vmax.f32 %v2102_v60, 0.0  ;;  %v2968_v3 = vmax.f32 %v2550_v62, 0.0  ;;  %2313 = vmatmul.mubr.bf16.gmra.mrb[200].mxu0 %v5471_v52  ;;  %2761 = vmatmul.mubr.bf16.gmra.mrb[200].mxu1 %v5472_v53  ;;  %v5489_v62 = vld [vmem:[%s5682_s11 + $0x350] ss:$8 sps:$4 sm:$0xff]  }
 0x1c8   : > { %4563 = vmatprep.mubr.msk.bf16.mxu0 %vm1536_vm0, %v5473_v56  ;;  %4619 = vmatprep.mubr.msk.bf16.mxu1 %vm1536_vm0, %v5475_v57 }
 0x1c9   : > { %3976 = vst.msk [vmem:[%s5886_s18 + $0xb8] sm:$0xf] %vm3929_vm3, %v4898_v1  ;;  %4088 = vst.msk [vmem:[%s5886_s18 + $0x278] sm:$0xf] %vm3929_vm3, %v5010_v61  ;;  %v4899_v4 = vpack.c.bf16 %v2856_v2, %v2856_v2  ;;  %v5011_v6 = vpack.c.bf16 %v2968_v3, %v2968_v3  ;;  %v5491_v61 = vld [vmem:[%s5682_s11 + $0x364] ss:$8 sps:$4 sm:$0xff]  }
 0x1ca   : > { %v2106_v7 = vpop.f32.mrb[96].mxu0  ;;  %v2554_v8 = vpop.f32.mrb[96].mxu1  ;;  %v5493_v2 = vld [vmem:[%s5682_s11 + $0x6e4] ss:$8 sps:$4 sm:$0xff]  }
 0x1cb   : > { %3977 = vst.msk [vmem:[%s5886_s18 + $0xbc] sm:$0xf] %vm3929_vm3, %v4899_v4  ;;  %4089 = vst.msk [vmem:[%s5886_s18 + $0x27c] sm:$0xf] %vm3929_vm3, %v5011_v6  ;;  %v2107_v9 = vadd.f32 %v6169_v5, %v2106_v7  ;;  %v2555_v10 = vadd.f32 %v6169_v5, %v2554_v8  ;;  %v2108_v11 = vpop.f32.mrb[97].mxu0  ;;  %v2556_v12 = vpop.f32.mrb[97].mxu1 }
 0x1cc   : > { %v2109_v15 = vpop.f32.mrb[98].mxu0  ;;  %v2557_v16 = vpop.f32.mrb[98].mxu1 }
 0x1cd   : > { %v2857_v19 = vmax.f32 %v2107_v9, 0.0  ;;  %v2969_v20 = vmax.f32 %v2555_v10, 0.0  ;;  %v2110_v21 = vadd.f32 %v6169_v5, %v2109_v15  ;;  %v2558_v22 = vadd.f32 %v6169_v5, %v2557_v16  ;;  %v2111_v23 = vpop.f32.mrb[99].mxu0  ;;  %v2559_v24 = vpop.f32.mrb[99].mxu1 }
 0x1ce   : > { %v5496_v23 = vld [vmem:[%s5682_s11 + $0x6e0] ss:$8 sps:$4 sm:$0xff]  }
 0x1cf   : > { %v4900_v25 = vpack.c.bf16 %v2857_v19, %v2857_v19  ;;  %v5012_v26 = vpack.c.bf16 %v2969_v20, %v2969_v20  ;;  %v2858_v27 = vmax.f32 %v2110_v21, 0.0  ;;  %v2970_v28 = vmax.f32 %v2558_v22, 0.0  ;;  %2321 = vmatmul.mubr.bf16.gmra.mrb[204].mxu0 %v5477_v13  ;;  %2769 = vmatmul.mubr.bf16.gmra.mrb[204].mxu1 %v5478_v14  ;;  %v5495_v22 = vld [vmem:[%s5682_s11 + $0x360] ss:$8 sps:$4 sm:$0xff]  }
 0x1d0   : > { %4564 = vmatprep.mubr.msk.bf16.mxu0 %vm1536_vm0, %v5479_v17  ;;  %4620 = vmatprep.mubr.msk.bf16.mxu1 %vm1536_vm0, %v5481_v18 }
 0x1d1   : > { %3978 = vst.msk [vmem:[%s5886_s18 + $0xc0] sm:$0xf] %vm3929_vm3, %v4900_v25  ;;  %4090 = vst.msk [vmem:[%s5886_s18 + $0x280] sm:$0xf] %vm3929_vm3, %v5012_v26  ;;  %v4901_v29 = vpack.c.bf16 %v2858_v27, %v2858_v27  ;;  %v5013_v30 = vpack.c.bf16 %v2970_v28, %v2970_v28  ;;  %v5497_v26 = vld [vmem:[%s5682_s11 + $0x374] ss:$8 sps:$4 sm:$0xff]  }
 0x1d2   : > { %v2114_v31 = vpop.f32.mrb[100].mxu0  ;;  %v2562_v32 = vpop.f32.mrb[100].mxu1  ;;  %v5499_v27 = vld [vmem:[%s5682_s11 + $0x6f4] ss:$8 sps:$4 sm:$0xff]  }
 0x1d3   : > { %3979 = vst.msk [vmem:[%s5886_s18 + $0xc4] sm:$0xf] %vm3929_vm3, %v4901_v29  ;;  %4091 = vst.msk [vmem:[%s5886_s18 + $0x284] sm:$0xf] %vm3929_vm3, %v5013_v30  ;;  %v2115_v33 = vadd.f32 %v6169_v5, %v2114_v31  ;;  %v2563_v34 = vadd.f32 %v6169_v5, %v2562_v32  ;;  %v2116_v35 = vpop.f32.mrb[101].mxu0  ;;  %v2564_v36 = vpop.f32.mrb[101].mxu1 }
 0x1d4   : > { %v2117_v39 = vpop.f32.mrb[102].mxu0  ;;  %v2565_v40 = vpop.f32.mrb[102].mxu1 }
 0x1d5   : > { %v2859_v43 = vmax.f32 %v2115_v33, 0.0  ;;  %v2971_v44 = vmax.f32 %v2563_v34, 0.0  ;;  %v2118_v45 = vadd.f32 %v6169_v5, %v2117_v39  ;;  %v2566_v46 = vadd.f32 %v6169_v5, %v2565_v40  ;;  %v2119_v47 = vpop.f32.mrb[103].mxu0  ;;  %v2567_v48 = vpop.f32.mrb[103].mxu1 }
 0x1d6   : > { %v5502_v47 = vld [vmem:[%s5682_s11 + $0x6f0] ss:$8 sps:$4 sm:$0xff]  }
 0x1d7   : > { %v4902_v49 = vpack.c.bf16 %v2859_v43, %v2859_v43  ;;  %v5014_v50 = vpack.c.bf16 %v2971_v44, %v2971_v44  ;;  %v2860_v51 = vmax.f32 %v2118_v45, 0.0  ;;  %v2972_v52 = vmax.f32 %v2566_v46, 0.0  ;;  %2329 = vmatmul.mubr.bf16.gmra.mrb[208].mxu0 %v5483_v37  ;;  %2777 = vmatmul.mubr.bf16.gmra.mrb[208].mxu1 %v5484_v38  ;;  %v5501_v46 = vld [vmem:[%s5682_s11 + $0x370] ss:$8 sps:$4 sm:$0xff]  }
 0x1d8   : > { %4565 = vmatprep.mubr.msk.bf16.mxu0 %vm1536_vm0, %v5485_v41  ;;  %4621 = vmatprep.mubr.msk.bf16.mxu1 %vm1536_vm0, %v5487_v42 }
 0x1d9   : > { %3980 = vst.msk [vmem:[%s5886_s18 + $0xc8] sm:$0xf] %vm3929_vm3, %v4902_v49  ;;  %4092 = vst.msk [vmem:[%s5886_s18 + $0x288] sm:$0xf] %vm3929_vm3, %v5014_v50  ;;  %v4903_v53 = vpack.c.bf16 %v2860_v51, %v2860_v51  ;;  %v5015_v54 = vpack.c.bf16 %v2972_v52, %v2972_v52 }
 0x1da   : > { %v2122_v55 = vpop.f32.mrb[104].mxu0  ;;  %v2570_v56 = vpop.f32.mrb[104].mxu1 }
 0x1db   : > { %3981 = vst.msk [vmem:[%s5886_s18 + $0xcc] sm:$0xf] %vm3929_vm3, %v4903_v53  ;;  %4093 = vst.msk [vmem:[%s5886_s18 + $0x28c] sm:$0xf] %vm3929_vm3, %v5015_v54  ;;  %v2123_v57 = vadd.f32 %v6169_v5, %v2122_v55  ;;  %v2571_v58 = vadd.f32 %v6169_v5, %v2570_v56  ;;  %v2124_v59 = vpop.f32.mrb[105].mxu0  ;;  %v2572_v60 = vpop.f32.mrb[105].mxu1 }
 0x1dc   : > { %v2125_v0 = vpop.f32.mrb[106].mxu0  ;;  %v2573_v1 = vpop.f32.mrb[106].mxu1 }
 0x1dd   : > { %v2861_v3 = vmax.f32 %v2123_v57, 0.0  ;;  %v2973_v4 = vmax.f32 %v2571_v58, 0.0  ;;  %v2126_v6 = vadd.f32 %v6169_v5, %v2125_v0  ;;  %v2574_v7 = vadd.f32 %v6169_v5, %v2573_v1  ;;  %v2127_v8 = vpop.f32.mrb[107].mxu0  ;;  %v2575_v9 = vpop.f32.mrb[107].mxu1 }
 0x1df   : > { %v4904_v10 = vpack.c.bf16 %v2861_v3, %v2861_v3  ;;  %v5016_v11 = vpack.c.bf16 %v2973_v4, %v2973_v4  ;;  %v2862_v12 = vmax.f32 %v2126_v6, 0.0  ;;  %v2974_v13 = vmax.f32 %v2574_v7, 0.0  ;;  %2337 = vmatmul.mubr.bf16.gmra.mrb[212].mxu0 %v5489_v62  ;;  %2785 = vmatmul.mubr.bf16.gmra.mrb[212].mxu1 %v5490_v63 }
 0x1e0   : > { %4566 = vmatprep.mubr.msk.bf16.mxu0 %vm1536_vm0, %v5491_v61  ;;  %4622 = vmatprep.mubr.msk.bf16.mxu1 %vm1536_vm0, %v5493_v2 }
 0x1e1   : > { %3982 = vst.msk [vmem:[%s5886_s18 + $0xd0] sm:$0xf] %vm3929_vm3, %v4904_v10  ;;  %4094 = vst.msk [vmem:[%s5886_s18 + $0x290] sm:$0xf] %vm3929_vm3, %v5016_v11  ;;  %v4905_v14 = vpack.c.bf16 %v2862_v12, %v2862_v12  ;;  %v5017_v15 = vpack.c.bf16 %v2974_v13, %v2974_v13 }
 0x1e2   : > { %v2130_v16 = vpop.f32.mrb[108].mxu0  ;;  %v2578_v17 = vpop.f32.mrb[108].mxu1 }
 0x1e3   : > { %3983 = vst.msk [vmem:[%s5886_s18 + $0xd4] sm:$0xf] %vm3929_vm3, %v4905_v14  ;;  %4095 = vst.msk [vmem:[%s5886_s18 + $0x294] sm:$0xf] %vm3929_vm3, %v5017_v15  ;;  %v2131_v18 = vadd.f32 %v6169_v5, %v2130_v16  ;;  %v2579_v19 = vadd.f32 %v6169_v5, %v2578_v17  ;;  %v2132_v20 = vpop.f32.mrb[109].mxu0  ;;  %v2580_v21 = vpop.f32.mrb[109].mxu1 }
 0x1e4   : > { %v2133_v24 = vpop.f32.mrb[110].mxu0  ;;  %v2581_v25 = vpop.f32.mrb[110].mxu1 }
 0x1e5   : > { %v2863_v28 = vmax.f32 %v2131_v18, 0.0  ;;  %v2975_v29 = vmax.f32 %v2579_v19, 0.0  ;;  %v2134_v30 = vadd.f32 %v6169_v5, %v2133_v24  ;;  %v2582_v31 = vadd.f32 %v6169_v5, %v2581_v25  ;;  %v2135_v32 = vpop.f32.mrb[111].mxu0  ;;  %v2583_v33 = vpop.f32.mrb[111].mxu1 }
 0x1e7   : > { %v4906_v34 = vpack.c.bf16 %v2863_v28, %v2863_v28  ;;  %v5018_v35 = vpack.c.bf16 %v2975_v29, %v2975_v29  ;;  %v2864_v36 = vmax.f32 %v2134_v30, 0.0  ;;  %v2976_v37 = vmax.f32 %v2582_v31, 0.0  ;;  %2345 = vmatmul.mubr.bf16.gmra.mrb[216].mxu0 %v5495_v22  ;;  %2793 = vmatmul.mubr.bf16.gmra.mrb[216].mxu1 %v5496_v23 }
 0x1e8   : > { %4567 = vmatprep.mubr.msk.bf16.mxu0 %vm1536_vm0, %v5497_v26  ;;  %4623 = vmatprep.mubr.msk.bf16.mxu1 %vm1536_vm0, %v5499_v27 }
 0x1e9   : > { %3984 = vst.msk [vmem:[%s5886_s18 + $0xd8] sm:$0xf] %vm3929_vm3, %v4906_v34  ;;  %4096 = vst.msk [vmem:[%s5886_s18 + $0x298] sm:$0xf] %vm3929_vm3, %v5018_v35  ;;  %v4907_v38 = vpack.c.bf16 %v2864_v36, %v2864_v36  ;;  %v5019_v39 = vpack.c.bf16 %v2976_v37, %v2976_v37 }
 0x1ea   : > { %v2138_v40 = vpop.f32.mrb[112].mxu0  ;;  %v2586_v41 = vpop.f32.mrb[112].mxu1 }
 0x1eb   : > { %3985 = vst.msk [vmem:[%s5886_s18 + $0xdc] sm:$0xf] %vm3929_vm3, %v4907_v38  ;;  %4097 = vst.msk [vmem:[%s5886_s18 + $0x29c] sm:$0xf] %vm3929_vm3, %v5019_v39  ;;  %v2139_v42 = vadd.f32 %v6169_v5, %v2138_v40  ;;  %v2587_v43 = vadd.f32 %v6169_v5, %v2586_v41  ;;  %v2140_v44 = vpop.f32.mrb[113].mxu0  ;;  %v2588_v45 = vpop.f32.mrb[113].mxu1 }
 0x1ec   : > { %v2141_v48 = vpop.f32.mrb[114].mxu0  ;;  %v2589_v49 = vpop.f32.mrb[114].mxu1 }
 0x1ed   : > { %v2865_v50 = vmax.f32 %v2139_v42, 0.0  ;;  %v2977_v51 = vmax.f32 %v2587_v43, 0.0  ;;  %v2142_v52 = vadd.f32 %v6169_v5, %v2141_v48  ;;  %v2590_v53 = vadd.f32 %v6169_v5, %v2589_v49  ;;  %v2143_v54 = vpop.f32.mrb[115].mxu0  ;;  %v2591_v55 = vpop.f32.mrb[115].mxu1 }
 0x1ef   : > { %v4908_v56 = vpack.c.bf16 %v2865_v50, %v2865_v50  ;;  %v5020_v57 = vpack.c.bf16 %v2977_v51, %v2977_v51  ;;  %v2866_v58 = vmax.f32 %v2142_v52, 0.0  ;;  %v2978_v59 = vmax.f32 %v2590_v53, 0.0  ;;  %2353 = vmatmul.mubr.bf16.gmra.mrb[220].mxu0 %v5501_v46  ;;  %2801 = vmatmul.mubr.bf16.gmra.mrb[220].mxu1 %v5502_v47 }
 0x1f1   : > { %3986 = vst.msk [vmem:[%s5886_s18 + $0xe0] sm:$0xf] %vm3929_vm3, %v4908_v56  ;;  %4098 = vst.msk [vmem:[%s5886_s18 + $0x2a0] sm:$0xf] %vm3929_vm3, %v5020_v57  ;;  %v4909_v60 = vpack.c.bf16 %v2866_v58, %v2866_v58  ;;  %v5021_v62 = vpack.c.bf16 %v2978_v59, %v2978_v59 }
 0x1f2   : > { %v2146_v63 = vpop.f32.mrb[116].mxu0  ;;  %v2594_v0 = vpop.f32.mrb[116].mxu1 }
 0x1f3   : > { %3987 = vst.msk [vmem:[%s5886_s18 + $0xe4] sm:$0xf] %vm3929_vm3, %v4909_v60  ;;  %4099 = vst.msk [vmem:[%s5886_s18 + $0x2a4] sm:$0xf] %vm3929_vm3, %v5021_v62  ;;  %v2147_v1 = vadd.f32 %v6169_v5, %v2146_v63  ;;  %v2595_v61 = vadd.f32 %v6169_v5, %v2594_v0  ;;  %v2148_v2 = vpop.f32.mrb[117].mxu0  ;;  %v2596_v3 = vpop.f32.mrb[117].mxu1 }
 0x1f4   : > { %v2149_v4 = vpop.f32.mrb[118].mxu0  ;;  %v2597_v6 = vpop.f32.mrb[118].mxu1 }
 0x1f5   : > { %v2867_v7 = vmax.f32 %v2147_v1, 0.0  ;;  %v2979_v8 = vmax.f32 %v2595_v61, 0.0  ;;  %v2150_v9 = vadd.f32 %v6169_v5, %v2149_v4  ;;  %v2598_v10 = vadd.f32 %v6169_v5, %v2597_v6  ;;  %v2151_v11 = vpop.f32.mrb[119].mxu0  ;;  %v2599_v12 = vpop.f32.mrb[119].mxu1 }
 0x1f7   : > { %v4910_v13 = vpack.c.bf16 %v2867_v7, %v2867_v7  ;;  %v5022_v14 = vpack.c.bf16 %v2979_v8, %v2979_v8  ;;  %v2868_v15 = vmax.f32 %v2150_v9, 0.0  ;;  %v2980_v16 = vmax.f32 %v2598_v10, 0.0 }
 0x1f9   : > { %3988 = vst.msk [vmem:[%s5886_s18 + $0xe8] sm:$0xf] %vm3929_vm3, %v4910_v13  ;;  %4100 = vst.msk [vmem:[%s5886_s18 + $0x2a8] sm:$0xf] %vm3929_vm3, %v5022_v14  ;;  %v4911_v17 = vpack.c.bf16 %v2868_v15, %v2868_v15  ;;  %v5023_v18 = vpack.c.bf16 %v2980_v16, %v2980_v16 }
 0x1fa   : > { %v2154_v19 = vpop.f32.mrb[120].mxu0  ;;  %v2602_v20 = vpop.f32.mrb[120].mxu1 }
 0x1fb   : > { %3989 = vst.msk [vmem:[%s5886_s18 + $0xec] sm:$0xf] %vm3929_vm3, %v4911_v17  ;;  %4101 = vst.msk [vmem:[%s5886_s18 + $0x2ac] sm:$0xf] %vm3929_vm3, %v5023_v18  ;;  %v2155_v21 = vadd.f32 %v6169_v5, %v2154_v19  ;;  %v2603_v22 = vadd.f32 %v6169_v5, %v2602_v20  ;;  %v2156_v23 = vpop.f32.mrb[121].mxu0  ;;  %v2604_v24 = vpop.f32.mrb[121].mxu1 }
 0x1fc   : > { %v2157_v25 = vpop.f32.mrb[122].mxu0  ;;  %v2605_v26 = vpop.f32.mrb[122].mxu1 }
 0x1fd   : > { %v2869_v27 = vmax.f32 %v2155_v21, 0.0  ;;  %v2981_v28 = vmax.f32 %v2603_v22, 0.0  ;;  %v2158_v29 = vadd.f32 %v6169_v5, %v2157_v25  ;;  %v2606_v30 = vadd.f32 %v6169_v5, %v2605_v26  ;;  %v2159_v31 = vpop.f32.mrb[123].mxu0  ;;  %v2607_v32 = vpop.f32.mrb[123].mxu1  ;;  %v6454_v26 = vld [vmem:[%s6788_s2] ss:$0 sm:$0xff] }
 0x1ff   : > { %v4912_v33 = vpack.c.bf16 %v2869_v27, %v2869_v27  ;;  %v5024_v34 = vpack.c.bf16 %v2981_v28, %v2981_v28  ;;  %v2870_v35 = vmax.f32 %v2158_v29, 0.0  ;;  %v2982_v36 = vmax.f32 %v2606_v30, 0.0 }
 0x201   : > { %3990 = vst.msk [vmem:[%s5886_s18 + $0xf0] sm:$0xf] %vm3929_vm3, %v4912_v33  ;;  %4102 = vst.msk [vmem:[%s5886_s18 + $0x2b0] sm:$0xf] %vm3929_vm3, %v5024_v34  ;;  %v4913_v37 = vpack.c.bf16 %v2870_v35, %v2870_v35  ;;  %v5025_v38 = vpack.c.bf16 %v2982_v36, %v2982_v36 }
 0x202   : > { %v2162_v39 = vpop.f32.mrb[124].mxu0  ;;  %v2610_v40 = vpop.f32.mrb[124].mxu1 }
 0x203   : > { %3991 = vst.msk [vmem:[%s5886_s18 + $0xf4] sm:$0xf] %vm3929_vm3, %v4913_v37  ;;  %4103 = vst.msk [vmem:[%s5886_s18 + $0x2b4] sm:$0xf] %vm3929_vm3, %v5025_v38  ;;  %v2163_v41 = vadd.f32 %v6169_v5, %v2162_v39  ;;  %v2611_v42 = vadd.f32 %v6169_v5, %v2610_v40  ;;  %v2164_v43 = vpop.f32.mrb[125].mxu0  ;;  %v2612_v44 = vpop.f32.mrb[125].mxu1 }
 0x204   : > { %v2165_v45 = vpop.f32.mrb[126].mxu0  ;;  %v2613_v46 = vpop.f32.mrb[126].mxu1 }
 0x205   : > { %v2871_v47 = vmax.f32 %v2163_v41, 0.0  ;;  %v2983_v48 = vmax.f32 %v2611_v42, 0.0  ;;  %v2166_v49 = vadd.f32 %v6169_v5, %v2165_v45  ;;  %v2614_v50 = vadd.f32 %v6169_v5, %v2613_v46  ;;  %v2167_v51 = vpop.f32.mrb[127].mxu0  ;;  %v2615_v52 = vpop.f32.mrb[127].mxu1 }
 0x207   : > { %v4914_v53 = vpack.c.bf16 %v2871_v47, %v2871_v47  ;;  %v5026_v54 = vpack.c.bf16 %v2983_v48, %v2983_v48  ;;  %v2872_v55 = vmax.f32 %v2166_v49, 0.0  ;;  %v2984_v56 = vmax.f32 %v2614_v50, 0.0 }
 0x209   : > { %3992 = vst.msk [vmem:[%s5886_s18 + $0xf8] sm:$0xf] %vm3929_vm3, %v4914_v53  ;;  %4104 = vst.msk [vmem:[%s5886_s18 + $0x2b8] sm:$0xf] %vm3929_vm3, %v5026_v54  ;;  %v4915_v57 = vpack.c.bf16 %v2872_v55, %v2872_v55  ;;  %v5027_v58 = vpack.c.bf16 %v2984_v56, %v2984_v56 }
 0x20a   : > { %v2170_v59 = vpop.f32.mrb[128].mxu0  ;;  %v2618_v60 = vpop.f32.mrb[128].mxu1 }
 0x20b   : > { %3993 = vst.msk [vmem:[%s5886_s18 + $0xfc] sm:$0xf] %vm3929_vm3, %v4915_v57  ;;  %4105 = vst.msk [vmem:[%s5886_s18 + $0x2bc] sm:$0xf] %vm3929_vm3, %v5027_v58  ;;  %v2171_v62 = vadd.f32 %v6169_v5, %v2170_v59  ;;  %v2619_v63 = vadd.f32 %v6169_v5, %v2618_v60  ;;  %v2172_v0 = vpop.f32.mrb[129].mxu0  ;;  %v2620_v1 = vpop.f32.mrb[129].mxu1 }
 0x20c   : > { %v2173_v61 = vpop.f32.mrb[130].mxu0  ;;  %v2621_v2 = vpop.f32.mrb[130].mxu1 }
 0x20d   : > { %v2873_v3 = vmax.f32 %v2171_v62, 0.0  ;;  %v2985_v4 = vmax.f32 %v2619_v63, 0.0  ;;  %v2174_v6 = vadd.f32 %v6169_v5, %v2173_v61  ;;  %v2622_v7 = vadd.f32 %v6169_v5, %v2621_v2  ;;  %v2175_v8 = vpop.f32.mrb[131].mxu0  ;;  %v2623_v9 = vpop.f32.mrb[131].mxu1 }
 0x20f   : > { %v4916_v10 = vpack.c.bf16 %v2873_v3, %v2873_v3  ;;  %v5028_v11 = vpack.c.bf16 %v2985_v4, %v2985_v4  ;;  %v2874_v12 = vmax.f32 %v2174_v6, 0.0  ;;  %v2986_v13 = vmax.f32 %v2622_v7, 0.0 }
 0x211   : > { %3994 = vst.msk [vmem:[%s5886_s18 + $0x100] sm:$0xf] %vm3929_vm3, %v4916_v10  ;;  %4106 = vst.msk [vmem:[%s5886_s18 + $0x2c0] sm:$0xf] %vm3929_vm3, %v5028_v11  ;;  %v4917_v14 = vpack.c.bf16 %v2874_v12, %v2874_v12  ;;  %v5029_v15 = vpack.c.bf16 %v2986_v13, %v2986_v13 }
 0x212   : > { %v2178_v16 = vpop.f32.mrb[132].mxu0  ;;  %v2626_v17 = vpop.f32.mrb[132].mxu1 }
 0x213   : > { %3995 = vst.msk [vmem:[%s5886_s18 + $0x104] sm:$0xf] %vm3929_vm3, %v4917_v14  ;;  %4107 = vst.msk [vmem:[%s5886_s18 + $0x2c4] sm:$0xf] %vm3929_vm3, %v5029_v15  ;;  %v2179_v18 = vadd.f32 %v6169_v5, %v2178_v16  ;;  %v2627_v19 = vadd.f32 %v6169_v5, %v2626_v17  ;;  %v2180_v20 = vpop.f32.mrb[133].mxu0  ;;  %v2628_v21 = vpop.f32.mrb[133].mxu1 }
 0x214   : > { %v2181_v22 = vpop.f32.mrb[134].mxu0  ;;  %v2629_v23 = vpop.f32.mrb[134].mxu1 }
 0x215   : > { %v2875_v24 = vmax.f32 %v2179_v18, 0.0  ;;  %v2987_v25 = vmax.f32 %v2627_v19, 0.0  ;;  %v2182_v27 = vadd.f32 %v6454_v26, %v2181_v22  ;;  %v2630_v28 = vadd.f32 %v6454_v26, %v2629_v23  ;;  %v2183_v5 = vpop.f32.mrb[135].mxu0  ;;  %v2631_v29 = vpop.f32.mrb[135].mxu1 }
 0x217   : > { %v4918_v30 = vpack.c.bf16 %v2875_v24, %v2875_v24  ;;  %v5030_v31 = vpack.c.bf16 %v2987_v25, %v2987_v25  ;;  %v2876_v32 = vmax.f32 %v2182_v27, 0.0  ;;  %v2988_v33 = vmax.f32 %v2630_v28, 0.0 }
 0x219   : > { %3996 = vst.msk [vmem:[%s5886_s18 + $0x108] sm:$0xf] %vm3929_vm3, %v4918_v30  ;;  %4108 = vst.msk [vmem:[%s5886_s18 + $0x2c8] sm:$0xf] %vm3929_vm3, %v5030_v31  ;;  %v4919_v34 = vpack.c.bf16 %v2876_v32, %v2876_v32  ;;  %v5031_v35 = vpack.c.bf16 %v2988_v33, %v2988_v33 }
 0x21a   : > { %v2186_v36 = vpop.f32.mrb[136].mxu0  ;;  %v2634_v37 = vpop.f32.mrb[136].mxu1 }
 0x21b   : > { %3997 = vst.msk [vmem:[%s5886_s18 + $0x10c] sm:$0xf] %vm3929_vm3, %v4919_v34  ;;  %4109 = vst.msk [vmem:[%s5886_s18 + $0x2cc] sm:$0xf] %vm3929_vm3, %v5031_v35  ;;  %v2187_v38 = vadd.f32 %v6454_v26, %v2186_v36  ;;  %v2635_v39 = vadd.f32 %v6454_v26, %v2634_v37  ;;  %v2188_v40 = vpop.f32.mrb[137].mxu0  ;;  %v2636_v41 = vpop.f32.mrb[137].mxu1 }
 0x21c   : > { %v2189_v42 = vpop.f32.mrb[138].mxu0  ;;  %v2637_v43 = vpop.f32.mrb[138].mxu1 }
 0x21d   : > { %v2877_v44 = vmax.f32 %v2187_v38, 0.0  ;;  %v2989_v45 = vmax.f32 %v2635_v39, 0.0  ;;  %v2190_v46 = vadd.f32 %v6454_v26, %v2189_v42  ;;  %v2638_v47 = vadd.f32 %v6454_v26, %v2637_v43  ;;  %v2191_v48 = vpop.f32.mrb[139].mxu0  ;;  %v2639_v49 = vpop.f32.mrb[139].mxu1 }
 0x21f   : > { %v4920_v50 = vpack.c.bf16 %v2877_v44, %v2877_v44  ;;  %v5032_v51 = vpack.c.bf16 %v2989_v45, %v2989_v45  ;;  %v2878_v52 = vmax.f32 %v2190_v46, 0.0  ;;  %v2990_v53 = vmax.f32 %v2638_v47, 0.0 }
 0x221   : > { %3998 = vst.msk [vmem:[%s5886_s18 + $0x110] sm:$0xf] %vm3929_vm3, %v4920_v50  ;;  %4110 = vst.msk [vmem:[%s5886_s18 + $0x2d0] sm:$0xf] %vm3929_vm3, %v5032_v51  ;;  %v4921_v54 = vpack.c.bf16 %v2878_v52, %v2878_v52  ;;  %v5033_v55 = vpack.c.bf16 %v2990_v53, %v2990_v53 }
 0x222   : > { %v2194_v56 = vpop.f32.mrb[140].mxu0  ;;  %v2642_v57 = vpop.f32.mrb[140].mxu1 }
 0x223   : > { %3999 = vst.msk [vmem:[%s5886_s18 + $0x114] sm:$0xf] %vm3929_vm3, %v4921_v54  ;;  %4111 = vst.msk [vmem:[%s5886_s18 + $0x2d4] sm:$0xf] %vm3929_vm3, %v5033_v55  ;;  %v2195_v58 = vadd.f32 %v6454_v26, %v2194_v56  ;;  %v2643_v59 = vadd.f32 %v6454_v26, %v2642_v57  ;;  %v2196_v60 = vpop.f32.mrb[141].mxu0  ;;  %v2644_v62 = vpop.f32.mrb[141].mxu1 }
 0x224   : > { %v2197_v63 = vpop.f32.mrb[142].mxu0  ;;  %v2645_v0 = vpop.f32.mrb[142].mxu1 }
 0x225   : > { %v2879_v1 = vmax.f32 %v2195_v58, 0.0  ;;  %v2991_v61 = vmax.f32 %v2643_v59, 0.0  ;;  %v2198_v2 = vadd.f32 %v6454_v26, %v2197_v63  ;;  %v2646_v3 = vadd.f32 %v6454_v26, %v2645_v0  ;;  %v2199_v4 = vpop.f32.mrb[143].mxu0  ;;  %v2647_v6 = vpop.f32.mrb[143].mxu1 }
 0x227   : > { %v4922_v7 = vpack.c.bf16 %v2879_v1, %v2879_v1  ;;  %v5034_v8 = vpack.c.bf16 %v2991_v61, %v2991_v61  ;;  %v2880_v9 = vmax.f32 %v2198_v2, 0.0  ;;  %v2992_v10 = vmax.f32 %v2646_v3, 0.0 }
 0x229   : > { %4000 = vst.msk [vmem:[%s5886_s18 + $0x118] sm:$0xf] %vm3929_vm3, %v4922_v7  ;;  %4112 = vst.msk [vmem:[%s5886_s18 + $0x2d8] sm:$0xf] %vm3929_vm3, %v5034_v8  ;;  %v4923_v11 = vpack.c.bf16 %v2880_v9, %v2880_v9  ;;  %v5035_v12 = vpack.c.bf16 %v2992_v10, %v2992_v10 }
 0x22a   : > { %v2202_v13 = vpop.f32.mrb[144].mxu0  ;;  %v2650_v14 = vpop.f32.mrb[144].mxu1 }
 0x22b   : > { %4001 = vst.msk [vmem:[%s5886_s18 + $0x11c] sm:$0xf] %vm3929_vm3, %v4923_v11  ;;  %4113 = vst.msk [vmem:[%s5886_s18 + $0x2dc] sm:$0xf] %vm3929_vm3, %v5035_v12  ;;  %v2203_v15 = vadd.f32 %v6454_v26, %v2202_v13  ;;  %v2651_v16 = vadd.f32 %v6454_v26, %v2650_v14  ;;  %v2204_v17 = vpop.f32.mrb[145].mxu0  ;;  %v2652_v18 = vpop.f32.mrb[145].mxu1 }
 0x22c   : > { %v2205_v19 = vpop.f32.mrb[146].mxu0  ;;  %v2653_v20 = vpop.f32.mrb[146].mxu1 }
 0x22d   : > { %v2881_v21 = vmax.f32 %v2203_v15, 0.0  ;;  %v2993_v22 = vmax.f32 %v2651_v16, 0.0  ;;  %v2206_v23 = vadd.f32 %v6454_v26, %v2205_v19  ;;  %v2654_v24 = vadd.f32 %v6454_v26, %v2653_v20  ;;  %v2207_v25 = vpop.f32.mrb[147].mxu0  ;;  %v2655_v27 = vpop.f32.mrb[147].mxu1 }
 0x22f   : > { %v4924_v28 = vpack.c.bf16 %v2881_v21, %v2881_v21  ;;  %v5036_v5 = vpack.c.bf16 %v2993_v22, %v2993_v22  ;;  %v2882_v29 = vmax.f32 %v2206_v23, 0.0  ;;  %v2994_v30 = vmax.f32 %v2654_v24, 0.0 }
 0x231   : > { %4002 = vst.msk [vmem:[%s5886_s18 + $0x120] sm:$0xf] %vm3929_vm3, %v4924_v28  ;;  %4114 = vst.msk [vmem:[%s5886_s18 + $0x2e0] sm:$0xf] %vm3929_vm3, %v5036_v5  ;;  %v4925_v31 = vpack.c.bf16 %v2882_v29, %v2882_v29  ;;  %v5037_v32 = vpack.c.bf16 %v2994_v30, %v2994_v30 }
 0x232   : > { %v2210_v33 = vpop.f32.mrb[148].mxu0  ;;  %v2658_v34 = vpop.f32.mrb[148].mxu1 }
 0x233   : > { %4003 = vst.msk [vmem:[%s5886_s18 + $0x124] sm:$0xf] %vm3929_vm3, %v4925_v31  ;;  %4115 = vst.msk [vmem:[%s5886_s18 + $0x2e4] sm:$0xf] %vm3929_vm3, %v5037_v32  ;;  %v2211_v35 = vadd.f32 %v6454_v26, %v2210_v33  ;;  %v2659_v36 = vadd.f32 %v6454_v26, %v2658_v34  ;;  %v2212_v37 = vpop.f32.mrb[149].mxu0  ;;  %v2660_v38 = vpop.f32.mrb[149].mxu1 }
 0x234   : > { %v2213_v39 = vpop.f32.mrb[150].mxu0  ;;  %v2661_v40 = vpop.f32.mrb[150].mxu1 }
 0x235   : > { %v2883_v41 = vmax.f32 %v2211_v35, 0.0  ;;  %v2995_v42 = vmax.f32 %v2659_v36, 0.0  ;;  %v2214_v43 = vadd.f32 %v6454_v26, %v2213_v39  ;;  %v2662_v44 = vadd.f32 %v6454_v26, %v2661_v40  ;;  %v2215_v45 = vpop.f32.mrb[151].mxu0  ;;  %v2663_v46 = vpop.f32.mrb[151].mxu1 }
 0x237   : > { %v4926_v47 = vpack.c.bf16 %v2883_v41, %v2883_v41  ;;  %v5038_v48 = vpack.c.bf16 %v2995_v42, %v2995_v42  ;;  %v2884_v49 = vmax.f32 %v2214_v43, 0.0  ;;  %v2996_v50 = vmax.f32 %v2662_v44, 0.0 }
 0x239   : > { %4004 = vst.msk [vmem:[%s5886_s18 + $0x128] sm:$0xf] %vm3929_vm3, %v4926_v47  ;;  %4116 = vst.msk [vmem:[%s5886_s18 + $0x2e8] sm:$0xf] %vm3929_vm3, %v5038_v48  ;;  %v4927_v51 = vpack.c.bf16 %v2884_v49, %v2884_v49  ;;  %v5039_v52 = vpack.c.bf16 %v2996_v50, %v2996_v50 }
 0x23a   : > { %v2218_v53 = vpop.f32.mrb[152].mxu0  ;;  %v2666_v54 = vpop.f32.mrb[152].mxu1 }
 0x23b   : > { %4005 = vst.msk [vmem:[%s5886_s18 + $0x12c] sm:$0xf] %vm3929_vm3, %v4927_v51  ;;  %4117 = vst.msk [vmem:[%s5886_s18 + $0x2ec] sm:$0xf] %vm3929_vm3, %v5039_v52  ;;  %v2219_v55 = vadd.f32 %v6454_v26, %v2218_v53  ;;  %v2667_v56 = vadd.f32 %v6454_v26, %v2666_v54  ;;  %v2220_v57 = vpop.f32.mrb[153].mxu0  ;;  %v2668_v58 = vpop.f32.mrb[153].mxu1 }
 0x23c   : > { %v2221_v59 = vpop.f32.mrb[154].mxu0  ;;  %v2669_v60 = vpop.f32.mrb[154].mxu1 }
 0x23d   : > { %v2885_v62 = vmax.f32 %v2219_v55, 0.0  ;;  %v2997_v63 = vmax.f32 %v2667_v56, 0.0  ;;  %v2222_v0 = vadd.f32 %v6454_v26, %v2221_v59  ;;  %v2670_v1 = vadd.f32 %v6454_v26, %v2669_v60  ;;  %v2223_v61 = vpop.f32.mrb[155].mxu0  ;;  %v2671_v2 = vpop.f32.mrb[155].mxu1 }
 0x23f   : > { %v4928_v3 = vpack.c.bf16 %v2885_v62, %v2885_v62  ;;  %v5040_v4 = vpack.c.bf16 %v2997_v63, %v2997_v63  ;;  %v2886_v6 = vmax.f32 %v2222_v0, 0.0  ;;  %v2998_v7 = vmax.f32 %v2670_v1, 0.0 }
 0x241   : > { %4006 = vst.msk [vmem:[%s5886_s18 + $0x130] sm:$0xf] %vm3929_vm3, %v4928_v3  ;;  %4118 = vst.msk [vmem:[%s5886_s18 + $0x2f0] sm:$0xf] %vm3929_vm3, %v5040_v4  ;;  %v4929_v8 = vpack.c.bf16 %v2886_v6, %v2886_v6  ;;  %v5041_v9 = vpack.c.bf16 %v2998_v7, %v2998_v7 }
 0x242   : > { %v2226_v10 = vpop.f32.mrb[156].mxu0  ;;  %v2674_v11 = vpop.f32.mrb[156].mxu1 }
 0x243   : > { %4007 = vst.msk [vmem:[%s5886_s18 + $0x134] sm:$0xf] %vm3929_vm3, %v4929_v8  ;;  %4119 = vst.msk [vmem:[%s5886_s18 + $0x2f4] sm:$0xf] %vm3929_vm3, %v5041_v9  ;;  %v2227_v12 = vadd.f32 %v6454_v26, %v2226_v10  ;;  %v2675_v13 = vadd.f32 %v6454_v26, %v2674_v11  ;;  %v2228_v14 = vpop.f32.mrb[157].mxu0  ;;  %v2676_v15 = vpop.f32.mrb[157].mxu1 }
 0x244   : > { %v2229_v16 = vpop.f32.mrb[158].mxu0  ;;  %v2677_v17 = vpop.f32.mrb[158].mxu1 }
 0x245   : > { %v2887_v18 = vmax.f32 %v2227_v12, 0.0  ;;  %v2999_v19 = vmax.f32 %v2675_v13, 0.0  ;;  %v2230_v20 = vadd.f32 %v6454_v26, %v2229_v16  ;;  %v2678_v21 = vadd.f32 %v6454_v26, %v2677_v17  ;;  %v2231_v22 = vpop.f32.mrb[159].mxu0  ;;  %v2679_v23 = vpop.f32.mrb[159].mxu1 }
 0x247   : > { %v4930_v24 = vpack.c.bf16 %v2887_v18, %v2887_v18  ;;  %v5042_v25 = vpack.c.bf16 %v2999_v19, %v2999_v19  ;;  %v2888_v27 = vmax.f32 %v2230_v20, 0.0  ;;  %v3000_v28 = vmax.f32 %v2678_v21, 0.0 }
 0x249   : > { %4008 = vst.msk [vmem:[%s5886_s18 + $0x138] sm:$0xf] %vm3929_vm3, %v4930_v24  ;;  %4120 = vst.msk [vmem:[%s5886_s18 + $0x2f8] sm:$0xf] %vm3929_vm3, %v5042_v25  ;;  %v4931_v5 = vpack.c.bf16 %v2888_v27, %v2888_v27  ;;  %v5043_v29 = vpack.c.bf16 %v3000_v28, %v3000_v28 }
 0x24a   : > { %v2234_v30 = vpop.f32.mrb[160].mxu0  ;;  %v2682_v31 = vpop.f32.mrb[160].mxu1 }
 0x24b   : > { %4009 = vst.msk [vmem:[%s5886_s18 + $0x13c] sm:$0xf] %vm3929_vm3, %v4931_v5  ;;  %4121 = vst.msk [vmem:[%s5886_s18 + $0x2fc] sm:$0xf] %vm3929_vm3, %v5043_v29  ;;  %v2235_v32 = vadd.f32 %v6454_v26, %v2234_v30  ;;  %v2683_v33 = vadd.f32 %v6454_v26, %v2682_v31  ;;  %v2236_v34 = vpop.f32.mrb[161].mxu0  ;;  %v2684_v35 = vpop.f32.mrb[161].mxu1 }
 0x24c   : > { %v2237_v36 = vpop.f32.mrb[162].mxu0  ;;  %v2685_v37 = vpop.f32.mrb[162].mxu1 }
 0x24d   : > { %v2889_v38 = vmax.f32 %v2235_v32, 0.0  ;;  %v3001_v39 = vmax.f32 %v2683_v33, 0.0  ;;  %v2238_v40 = vadd.f32 %v6454_v26, %v2237_v36  ;;  %v2686_v41 = vadd.f32 %v6454_v26, %v2685_v37  ;;  %v2239_v42 = vpop.f32.mrb[163].mxu0  ;;  %v2687_v43 = vpop.f32.mrb[163].mxu1 }
 0x24f   : > { %v4932_v44 = vpack.c.bf16 %v2889_v38, %v2889_v38  ;;  %v5044_v45 = vpack.c.bf16 %v3001_v39, %v3001_v39  ;;  %v2890_v46 = vmax.f32 %v2238_v40, 0.0  ;;  %v3002_v47 = vmax.f32 %v2686_v41, 0.0 }
 0x251   : > { %4010 = vst.msk [vmem:[%s5886_s18 + $0x140] sm:$0xf] %vm3929_vm3, %v4932_v44  ;;  %4122 = vst.msk [vmem:[%s5886_s18 + $0x300] sm:$0xf] %vm3929_vm3, %v5044_v45  ;;  %v4933_v48 = vpack.c.bf16 %v2890_v46, %v2890_v46  ;;  %v5045_v49 = vpack.c.bf16 %v3002_v47, %v3002_v47 }
 0x252   : > { %v2242_v50 = vpop.f32.mrb[164].mxu0  ;;  %v2690_v51 = vpop.f32.mrb[164].mxu1 }
 0x253   : > { %4011 = vst.msk [vmem:[%s5886_s18 + $0x144] sm:$0xf] %vm3929_vm3, %v4933_v48  ;;  %4123 = vst.msk [vmem:[%s5886_s18 + $0x304] sm:$0xf] %vm3929_vm3, %v5045_v49  ;;  %v2243_v52 = vadd.f32 %v6454_v26, %v2242_v50  ;;  %v2691_v53 = vadd.f32 %v6454_v26, %v2690_v51  ;;  %v2244_v54 = vpop.f32.mrb[165].mxu0  ;;  %v2692_v55 = vpop.f32.mrb[165].mxu1 }
 0x254   : > { %v2245_v56 = vpop.f32.mrb[166].mxu0  ;;  %v2693_v57 = vpop.f32.mrb[166].mxu1 }
 0x255   : > { %v2891_v58 = vmax.f32 %v2243_v52, 0.0  ;;  %v3003_v59 = vmax.f32 %v2691_v53, 0.0  ;;  %v2246_v60 = vadd.f32 %v6454_v26, %v2245_v56  ;;  %v2694_v62 = vadd.f32 %v6454_v26, %v2693_v57  ;;  %v2247_v63 = vpop.f32.mrb[167].mxu0  ;;  %v2695_v0 = vpop.f32.mrb[167].mxu1 }
 0x257   : > { %v4934_v1 = vpack.c.bf16 %v2891_v58, %v2891_v58  ;;  %v5046_v61 = vpack.c.bf16 %v3003_v59, %v3003_v59  ;;  %v2892_v2 = vmax.f32 %v2246_v60, 0.0  ;;  %v3004_v3 = vmax.f32 %v2694_v62, 0.0 }
 0x259   : > { %4012 = vst.msk [vmem:[%s5886_s18 + $0x148] sm:$0xf] %vm3929_vm3, %v4934_v1  ;;  %4124 = vst.msk [vmem:[%s5886_s18 + $0x308] sm:$0xf] %vm3929_vm3, %v5046_v61  ;;  %v4935_v4 = vpack.c.bf16 %v2892_v2, %v2892_v2  ;;  %v5047_v6 = vpack.c.bf16 %v3004_v3, %v3004_v3 }
 0x25a   : > { %v2250_v7 = vpop.f32.mrb[168].mxu0  ;;  %v2698_v8 = vpop.f32.mrb[168].mxu1 }
 0x25b   : > { %4013 = vst.msk [vmem:[%s5886_s18 + $0x14c] sm:$0xf] %vm3929_vm3, %v4935_v4  ;;  %4125 = vst.msk [vmem:[%s5886_s18 + $0x30c] sm:$0xf] %vm3929_vm3, %v5047_v6  ;;  %v2251_v9 = vadd.f32 %v6454_v26, %v2250_v7  ;;  %v2699_v10 = vadd.f32 %v6454_v26, %v2698_v8  ;;  %v2252_v11 = vpop.f32.mrb[169].mxu0  ;;  %v2700_v12 = vpop.f32.mrb[169].mxu1 }
 0x25c   : > { %v2253_v13 = vpop.f32.mrb[170].mxu0  ;;  %v2701_v14 = vpop.f32.mrb[170].mxu1 }
 0x25d   : > { %v2893_v15 = vmax.f32 %v2251_v9, 0.0  ;;  %v3005_v16 = vmax.f32 %v2699_v10, 0.0  ;;  %v2254_v17 = vadd.f32 %v6454_v26, %v2253_v13  ;;  %v2702_v18 = vadd.f32 %v6454_v26, %v2701_v14  ;;  %v2255_v19 = vpop.f32.mrb[171].mxu0  ;;  %v2703_v20 = vpop.f32.mrb[171].mxu1 }
 0x25f   : > { %v4936_v21 = vpack.c.bf16 %v2893_v15, %v2893_v15  ;;  %v5048_v22 = vpack.c.bf16 %v3005_v16, %v3005_v16  ;;  %v2894_v23 = vmax.f32 %v2254_v17, 0.0  ;;  %v3006_v24 = vmax.f32 %v2702_v18, 0.0 }
 0x261   : > { %4014 = vst.msk [vmem:[%s5886_s18 + $0x150] sm:$0xf] %vm3929_vm3, %v4936_v21  ;;  %4126 = vst.msk [vmem:[%s5886_s18 + $0x310] sm:$0xf] %vm3929_vm3, %v5048_v22  ;;  %v4937_v25 = vpack.c.bf16 %v2894_v23, %v2894_v23  ;;  %v5049_v27 = vpack.c.bf16 %v3006_v24, %v3006_v24 }
 0x262   : > { %v2258_v28 = vpop.f32.mrb[172].mxu0  ;;  %v2706_v5 = vpop.f32.mrb[172].mxu1 }
 0x263   : > { %4015 = vst.msk [vmem:[%s5886_s18 + $0x154] sm:$0xf] %vm3929_vm3, %v4937_v25  ;;  %4127 = vst.msk [vmem:[%s5886_s18 + $0x314] sm:$0xf] %vm3929_vm3, %v5049_v27  ;;  %v2259_v29 = vadd.f32 %v6454_v26, %v2258_v28  ;;  %v2707_v30 = vadd.f32 %v6454_v26, %v2706_v5  ;;  %v2260_v31 = vpop.f32.mrb[173].mxu0  ;;  %v2708_v32 = vpop.f32.mrb[173].mxu1 }
 0x264   : > { %v2261_v33 = vpop.f32.mrb[174].mxu0  ;;  %v2709_v34 = vpop.f32.mrb[174].mxu1 }
 0x265   : > { %v2895_v35 = vmax.f32 %v2259_v29, 0.0  ;;  %v3007_v36 = vmax.f32 %v2707_v30, 0.0  ;;  %v2262_v37 = vadd.f32 %v6454_v26, %v2261_v33  ;;  %v2710_v38 = vadd.f32 %v6454_v26, %v2709_v34  ;;  %v2263_v39 = vpop.f32.mrb[175].mxu0  ;;  %v2711_v40 = vpop.f32.mrb[175].mxu1 }
 0x267   : > { %v4938_v41 = vpack.c.bf16 %v2895_v35, %v2895_v35  ;;  %v5050_v42 = vpack.c.bf16 %v3007_v36, %v3007_v36  ;;  %v2896_v43 = vmax.f32 %v2262_v37, 0.0  ;;  %v3008_v44 = vmax.f32 %v2710_v38, 0.0 }
 0x269   : > { %4016 = vst.msk [vmem:[%s5886_s18 + $0x158] sm:$0xf] %vm3929_vm3, %v4938_v41  ;;  %4128 = vst.msk [vmem:[%s5886_s18 + $0x318] sm:$0xf] %vm3929_vm3, %v5050_v42  ;;  %v4939_v45 = vpack.c.bf16 %v2896_v43, %v2896_v43  ;;  %v5051_v46 = vpack.c.bf16 %v3008_v44, %v3008_v44 }
 0x26a   : > { %v2266_v47 = vpop.f32.mrb[176].mxu0  ;;  %v2714_v48 = vpop.f32.mrb[176].mxu1 }
 0x26b   : > { %4017 = vst.msk [vmem:[%s5886_s18 + $0x15c] sm:$0xf] %vm3929_vm3, %v4939_v45  ;;  %4129 = vst.msk [vmem:[%s5886_s18 + $0x31c] sm:$0xf] %vm3929_vm3, %v5051_v46  ;;  %v2267_v49 = vadd.f32 %v6454_v26, %v2266_v47  ;;  %v2715_v50 = vadd.f32 %v6454_v26, %v2714_v48  ;;  %v2268_v51 = vpop.f32.mrb[177].mxu0  ;;  %v2716_v52 = vpop.f32.mrb[177].mxu1 }
 0x26c   : > { %v2269_v53 = vpop.f32.mrb[178].mxu0  ;;  %v2717_v54 = vpop.f32.mrb[178].mxu1 }
 0x26d   : > { %v2897_v55 = vmax.f32 %v2267_v49, 0.0  ;;  %v3009_v56 = vmax.f32 %v2715_v50, 0.0  ;;  %v2270_v57 = vadd.f32 %v6454_v26, %v2269_v53  ;;  %v2718_v58 = vadd.f32 %v6454_v26, %v2717_v54  ;;  %v2271_v59 = vpop.f32.mrb[179].mxu0  ;;  %v2719_v60 = vpop.f32.mrb[179].mxu1 }
 0x26f   : > { %v4940_v62 = vpack.c.bf16 %v2897_v55, %v2897_v55  ;;  %v5052_v63 = vpack.c.bf16 %v3009_v56, %v3009_v56  ;;  %v2898_v0 = vmax.f32 %v2270_v57, 0.0  ;;  %v3010_v1 = vmax.f32 %v2718_v58, 0.0 }
 0x271   : > { %4018 = vst.msk [vmem:[%s5886_s18 + $0x160] sm:$0xf] %vm3929_vm3, %v4940_v62  ;;  %4130 = vst.msk [vmem:[%s5886_s18 + $0x320] sm:$0xf] %vm3929_vm3, %v5052_v63  ;;  %v4941_v61 = vpack.c.bf16 %v2898_v0, %v2898_v0  ;;  %v5053_v2 = vpack.c.bf16 %v3010_v1, %v3010_v1 }
 0x272   : > { %v2274_v3 = vpop.f32.mrb[180].mxu0  ;;  %v2722_v4 = vpop.f32.mrb[180].mxu1 }
 0x273   : > { %4019 = vst.msk [vmem:[%s5886_s18 + $0x164] sm:$0xf] %vm3929_vm3, %v4941_v61  ;;  %4131 = vst.msk [vmem:[%s5886_s18 + $0x324] sm:$0xf] %vm3929_vm3, %v5053_v2  ;;  %v2275_v6 = vadd.f32 %v6454_v26, %v2274_v3  ;;  %v2723_v7 = vadd.f32 %v6454_v26, %v2722_v4  ;;  %v2276_v8 = vpop.f32.mrb[181].mxu0  ;;  %v2724_v9 = vpop.f32.mrb[181].mxu1 }
 0x274   : > { %v2277_v10 = vpop.f32.mrb[182].mxu0  ;;  %v2725_v11 = vpop.f32.mrb[182].mxu1 }
 0x275   : > { %v2899_v12 = vmax.f32 %v2275_v6, 0.0  ;;  %v3011_v13 = vmax.f32 %v2723_v7, 0.0  ;;  %v2278_v14 = vadd.f32 %v6454_v26, %v2277_v10  ;;  %v2726_v15 = vadd.f32 %v6454_v26, %v2725_v11  ;;  %v2279_v16 = vpop.f32.mrb[183].mxu0  ;;  %v2727_v17 = vpop.f32.mrb[183].mxu1 }
 0x277   : > { %v4942_v18 = vpack.c.bf16 %v2899_v12, %v2899_v12  ;;  %v5054_v19 = vpack.c.bf16 %v3011_v13, %v3011_v13  ;;  %v2900_v20 = vmax.f32 %v2278_v14, 0.0  ;;  %v3012_v21 = vmax.f32 %v2726_v15, 0.0 }
 0x279   : > { %4020 = vst.msk [vmem:[%s5886_s18 + $0x168] sm:$0xf] %vm3929_vm3, %v4942_v18  ;;  %4132 = vst.msk [vmem:[%s5886_s18 + $0x328] sm:$0xf] %vm3929_vm3, %v5054_v19  ;;  %v4943_v22 = vpack.c.bf16 %v2900_v20, %v2900_v20  ;;  %v5055_v23 = vpack.c.bf16 %v3012_v21, %v3012_v21 }
 0x27a   : > { %v2282_v24 = vpop.f32.mrb[184].mxu0  ;;  %v2730_v25 = vpop.f32.mrb[184].mxu1 }
 0x27b   : > { %4021 = vst.msk [vmem:[%s5886_s18 + $0x16c] sm:$0xf] %vm3929_vm3, %v4943_v22  ;;  %4133 = vst.msk [vmem:[%s5886_s18 + $0x32c] sm:$0xf] %vm3929_vm3, %v5055_v23  ;;  %v2283_v27 = vadd.f32 %v6454_v26, %v2282_v24  ;;  %v2731_v28 = vadd.f32 %v6454_v26, %v2730_v25  ;;  %v2284_v5 = vpop.f32.mrb[185].mxu0  ;;  %v2732_v29 = vpop.f32.mrb[185].mxu1 }
 0x27c   : > { %v2285_v30 = vpop.f32.mrb[186].mxu0  ;;  %v2733_v31 = vpop.f32.mrb[186].mxu1 }
 0x27d   : > { %v2901_v32 = vmax.f32 %v2283_v27, 0.0  ;;  %v3013_v33 = vmax.f32 %v2731_v28, 0.0  ;;  %v2286_v34 = vadd.f32 %v6454_v26, %v2285_v30  ;;  %v2734_v35 = vadd.f32 %v6454_v26, %v2733_v31  ;;  %v2287_v36 = vpop.f32.mrb[187].mxu0  ;;  %v2735_v37 = vpop.f32.mrb[187].mxu1 }
 0x27f   : > { %v4944_v38 = vpack.c.bf16 %v2901_v32, %v2901_v32  ;;  %v5056_v39 = vpack.c.bf16 %v3013_v33, %v3013_v33  ;;  %v2902_v40 = vmax.f32 %v2286_v34, 0.0  ;;  %v3014_v41 = vmax.f32 %v2734_v35, 0.0 }
 0x281   : > { %4022 = vst.msk [vmem:[%s5886_s18 + $0x170] sm:$0xf] %vm3929_vm3, %v4944_v38  ;;  %4134 = vst.msk [vmem:[%s5886_s18 + $0x330] sm:$0xf] %vm3929_vm3, %v5056_v39  ;;  %v4945_v42 = vpack.c.bf16 %v2902_v40, %v2902_v40  ;;  %v5057_v43 = vpack.c.bf16 %v3014_v41, %v3014_v41 }
 0x282   : > { %v2290_v44 = vpop.f32.mrb[188].mxu0  ;;  %v2738_v45 = vpop.f32.mrb[188].mxu1 }
 0x283   : > { %4023 = vst.msk [vmem:[%s5886_s18 + $0x174] sm:$0xf] %vm3929_vm3, %v4945_v42  ;;  %4135 = vst.msk [vmem:[%s5886_s18 + $0x334] sm:$0xf] %vm3929_vm3, %v5057_v43  ;;  %v2291_v46 = vadd.f32 %v6454_v26, %v2290_v44  ;;  %v2739_v47 = vadd.f32 %v6454_v26, %v2738_v45  ;;  %v2292_v48 = vpop.f32.mrb[189].mxu0  ;;  %v2740_v49 = vpop.f32.mrb[189].mxu1 }
 0x284   : > { %v2293_v50 = vpop.f32.mrb[190].mxu0  ;;  %v2741_v51 = vpop.f32.mrb[190].mxu1 }
 0x285   : > { %v2903_v52 = vmax.f32 %v2291_v46, 0.0  ;;  %v3015_v53 = vmax.f32 %v2739_v47, 0.0  ;;  %v2294_v54 = vadd.f32 %v6454_v26, %v2293_v50  ;;  %v2742_v55 = vadd.f32 %v6454_v26, %v2741_v51  ;;  %v2295_v56 = vpop.f32.mrb[191].mxu0  ;;  %v2743_v57 = vpop.f32.mrb[191].mxu1 }
 0x287   : > { %v4946_v58 = vpack.c.bf16 %v2903_v52, %v2903_v52  ;;  %v5058_v59 = vpack.c.bf16 %v3015_v53, %v3015_v53  ;;  %v2904_v60 = vmax.f32 %v2294_v54, 0.0  ;;  %v3016_v62 = vmax.f32 %v2742_v55, 0.0 }
 0x289   : > { %4024 = vst.msk [vmem:[%s5886_s18 + $0x178] sm:$0xf] %vm3929_vm3, %v4946_v58  ;;  %4136 = vst.msk [vmem:[%s5886_s18 + $0x338] sm:$0xf] %vm3929_vm3, %v5058_v59  ;;  %v4947_v63 = vpack.c.bf16 %v2904_v60, %v2904_v60  ;;  %v5059_v0 = vpack.c.bf16 %v3016_v62, %v3016_v62 }
 0x28a   : > { %v2298_v1 = vpop.f32.mrb[192].mxu0  ;;  %v2746_v61 = vpop.f32.mrb[192].mxu1 }
 0x28b   : > { %4025 = vst.msk [vmem:[%s5886_s18 + $0x17c] sm:$0xf] %vm3929_vm3, %v4947_v63  ;;  %4137 = vst.msk [vmem:[%s5886_s18 + $0x33c] sm:$0xf] %vm3929_vm3, %v5059_v0  ;;  %v2299_v2 = vadd.f32 %v6454_v26, %v2298_v1  ;;  %v2747_v3 = vadd.f32 %v6454_v26, %v2746_v61  ;;  %v2300_v4 = vpop.f32.mrb[193].mxu0  ;;  %v2748_v6 = vpop.f32.mrb[193].mxu1 }
 0x28c   : > { %v2301_v7 = vpop.f32.mrb[194].mxu0  ;;  %v2749_v8 = vpop.f32.mrb[194].mxu1 }
 0x28d   : > { %v2905_v9 = vmax.f32 %v2299_v2, 0.0  ;;  %v3017_v10 = vmax.f32 %v2747_v3, 0.0  ;;  %v2302_v11 = vadd.f32 %v6454_v26, %v2301_v7  ;;  %v2750_v12 = vadd.f32 %v6454_v26, %v2749_v8  ;;  %v2303_v13 = vpop.f32.mrb[195].mxu0  ;;  %v2751_v14 = vpop.f32.mrb[195].mxu1 }
 0x28f   : > { %v4948_v15 = vpack.c.bf16 %v2905_v9, %v2905_v9  ;;  %v5060_v16 = vpack.c.bf16 %v3017_v10, %v3017_v10  ;;  %v2906_v17 = vmax.f32 %v2302_v11, 0.0  ;;  %v3018_v18 = vmax.f32 %v2750_v12, 0.0 }
 0x291   : > { %4026 = vst.msk [vmem:[%s5886_s18 + $0x180] sm:$0xf] %vm3929_vm3, %v4948_v15  ;;  %4138 = vst.msk [vmem:[%s5886_s18 + $0x340] sm:$0xf] %vm3929_vm3, %v5060_v16  ;;  %v4949_v19 = vpack.c.bf16 %v2906_v17, %v2906_v17  ;;  %v5061_v20 = vpack.c.bf16 %v3018_v18, %v3018_v18 }
 0x292   : > { %v2306_v21 = vpop.f32.mrb[196].mxu0  ;;  %v2754_v22 = vpop.f32.mrb[196].mxu1 }
 0x293   : > { %4027 = vst.msk [vmem:[%s5886_s18 + $0x184] sm:$0xf] %vm3929_vm3, %v4949_v19  ;;  %4139 = vst.msk [vmem:[%s5886_s18 + $0x344] sm:$0xf] %vm3929_vm3, %v5061_v20  ;;  %v2307_v23 = vadd.f32 %v6454_v26, %v2306_v21  ;;  %v2755_v24 = vadd.f32 %v6454_v26, %v2754_v22  ;;  %v2308_v25 = vpop.f32.mrb[197].mxu0  ;;  %v2756_v27 = vpop.f32.mrb[197].mxu1 }
 0x294   : > { %v2309_v28 = vpop.f32.mrb[198].mxu0  ;;  %v2757_v5 = vpop.f32.mrb[198].mxu1 }
 0x295   : > { %v2907_v29 = vmax.f32 %v2307_v23, 0.0  ;;  %v3019_v30 = vmax.f32 %v2755_v24, 0.0  ;;  %v2310_v31 = vadd.f32 %v6454_v26, %v2309_v28  ;;  %v2758_v32 = vadd.f32 %v6454_v26, %v2757_v5  ;;  %v2311_v33 = vpop.f32.mrb[199].mxu0  ;;  %v2759_v34 = vpop.f32.mrb[199].mxu1 }
 0x297   : > { %v4950_v35 = vpack.c.bf16 %v2907_v29, %v2907_v29  ;;  %v5062_v36 = vpack.c.bf16 %v3019_v30, %v3019_v30  ;;  %v2908_v37 = vmax.f32 %v2310_v31, 0.0  ;;  %v3020_v38 = vmax.f32 %v2758_v32, 0.0 }
 0x299   : > { %4028 = vst.msk [vmem:[%s5886_s18 + $0x188] sm:$0xf] %vm3929_vm3, %v4950_v35  ;;  %4140 = vst.msk [vmem:[%s5886_s18 + $0x348] sm:$0xf] %vm3929_vm3, %v5062_v36  ;;  %v4951_v39 = vpack.c.bf16 %v2908_v37, %v2908_v37  ;;  %v5063_v40 = vpack.c.bf16 %v3020_v38, %v3020_v38 }
 0x29a   : > { %v2314_v41 = vpop.f32.mrb[200].mxu0  ;;  %v2762_v42 = vpop.f32.mrb[200].mxu1 }
 0x29b   : > { %4029 = vst.msk [vmem:[%s5886_s18 + $0x18c] sm:$0xf] %vm3929_vm3, %v4951_v39  ;;  %4141 = vst.msk [vmem:[%s5886_s18 + $0x34c] sm:$0xf] %vm3929_vm3, %v5063_v40  ;;  %v2315_v43 = vadd.f32 %v6454_v26, %v2314_v41  ;;  %v2763_v44 = vadd.f32 %v6454_v26, %v2762_v42  ;;  %v2316_v45 = vpop.f32.mrb[201].mxu0  ;;  %v2764_v46 = vpop.f32.mrb[201].mxu1 }
 0x29c   : > { %v2317_v47 = vpop.f32.mrb[202].mxu0  ;;  %v2765_v48 = vpop.f32.mrb[202].mxu1 }
 0x29d   : > { %v2909_v49 = vmax.f32 %v2315_v43, 0.0  ;;  %v3021_v50 = vmax.f32 %v2763_v44, 0.0  ;;  %v2318_v51 = vadd.f32 %v6454_v26, %v2317_v47  ;;  %v2766_v52 = vadd.f32 %v6454_v26, %v2765_v48  ;;  %v2319_v53 = vpop.f32.mrb[203].mxu0  ;;  %v2767_v54 = vpop.f32.mrb[203].mxu1 }
 0x29f   : > { %v4952_v55 = vpack.c.bf16 %v2909_v49, %v2909_v49  ;;  %v5064_v56 = vpack.c.bf16 %v3021_v50, %v3021_v50  ;;  %v2910_v57 = vmax.f32 %v2318_v51, 0.0  ;;  %v3022_v58 = vmax.f32 %v2766_v52, 0.0 }
 0x2a1   : > { %4030 = vst.msk [vmem:[%s5886_s18 + $0x190] sm:$0xf] %vm3929_vm3, %v4952_v55  ;;  %4142 = vst.msk [vmem:[%s5886_s18 + $0x350] sm:$0xf] %vm3929_vm3, %v5064_v56  ;;  %v4953_v59 = vpack.c.bf16 %v2910_v57, %v2910_v57  ;;  %v5065_v60 = vpack.c.bf16 %v3022_v58, %v3022_v58 }
 0x2a2   : > { %v2322_v62 = vpop.f32.mrb[204].mxu0  ;;  %v2770_v63 = vpop.f32.mrb[204].mxu1 }
 0x2a3   : > { %4031 = vst.msk [vmem:[%s5886_s18 + $0x194] sm:$0xf] %vm3929_vm3, %v4953_v59  ;;  %4143 = vst.msk [vmem:[%s5886_s18 + $0x354] sm:$0xf] %vm3929_vm3, %v5065_v60  ;;  %v2323_v0 = vadd.f32 %v6454_v26, %v2322_v62  ;;  %v2771_v1 = vadd.f32 %v6454_v26, %v2770_v63  ;;  %v2324_v61 = vpop.f32.mrb[205].mxu0  ;;  %v2772_v2 = vpop.f32.mrb[205].mxu1 }
 0x2a4   : > { %v2325_v3 = vpop.f32.mrb[206].mxu0  ;;  %v2773_v4 = vpop.f32.mrb[206].mxu1 }
 0x2a5   : > { %v2911_v6 = vmax.f32 %v2323_v0, 0.0  ;;  %v3023_v7 = vmax.f32 %v2771_v1, 0.0  ;;  %v2326_v8 = vadd.f32 %v6454_v26, %v2325_v3  ;;  %v2774_v9 = vadd.f32 %v6454_v26, %v2773_v4  ;;  %v2327_v10 = vpop.f32.mrb[207].mxu0  ;;  %v2775_v11 = vpop.f32.mrb[207].mxu1 }
 0x2a7   : > { %v4954_v12 = vpack.c.bf16 %v2911_v6, %v2911_v6  ;;  %v5066_v13 = vpack.c.bf16 %v3023_v7, %v3023_v7  ;;  %v2912_v14 = vmax.f32 %v2326_v8, 0.0  ;;  %v3024_v15 = vmax.f32 %v2774_v9, 0.0 }
 0x2a9   : > { %4032 = vst.msk [vmem:[%s5886_s18 + $0x198] sm:$0xf] %vm3929_vm3, %v4954_v12  ;;  %4144 = vst.msk [vmem:[%s5886_s18 + $0x358] sm:$0xf] %vm3929_vm3, %v5066_v13  ;;  %v4955_v16 = vpack.c.bf16 %v2912_v14, %v2912_v14  ;;  %v5067_v17 = vpack.c.bf16 %v3024_v15, %v3024_v15 }
 0x2aa   : > { %v2330_v18 = vpop.f32.mrb[208].mxu0  ;;  %v2778_v19 = vpop.f32.mrb[208].mxu1 }
 0x2ab   : > { %4033 = vst.msk [vmem:[%s5886_s18 + $0x19c] sm:$0xf] %vm3929_vm3, %v4955_v16  ;;  %4145 = vst.msk [vmem:[%s5886_s18 + $0x35c] sm:$0xf] %vm3929_vm3, %v5067_v17  ;;  %v2331_v20 = vadd.f32 %v6454_v26, %v2330_v18  ;;  %v2779_v21 = vadd.f32 %v6454_v26, %v2778_v19  ;;  %v2332_v22 = vpop.f32.mrb[209].mxu0  ;;  %v2780_v23 = vpop.f32.mrb[209].mxu1 }
 0x2ac   : > { %v2333_v24 = vpop.f32.mrb[210].mxu0  ;;  %v2781_v25 = vpop.f32.mrb[210].mxu1 }
 0x2ad   : > { %v2913_v27 = vmax.f32 %v2331_v20, 0.0  ;;  %v3025_v28 = vmax.f32 %v2779_v21, 0.0  ;;  %v2334_v5 = vadd.f32 %v6454_v26, %v2333_v24  ;;  %v2782_v29 = vadd.f32 %v6454_v26, %v2781_v25  ;;  %v2335_v30 = vpop.f32.mrb[211].mxu0  ;;  %v2783_v31 = vpop.f32.mrb[211].mxu1 }
 0x2af   : > { %v4956_v32 = vpack.c.bf16 %v2913_v27, %v2913_v27  ;;  %v5068_v33 = vpack.c.bf16 %v3025_v28, %v3025_v28  ;;  %v2914_v34 = vmax.f32 %v2334_v5, 0.0  ;;  %v3026_v35 = vmax.f32 %v2782_v29, 0.0 }
 0x2b1   : > { %4034 = vst.msk [vmem:[%s5886_s18 + $0x1a0] sm:$0xf] %vm3929_vm3, %v4956_v32  ;;  %4146 = vst.msk [vmem:[%s5886_s18 + $0x360] sm:$0xf] %vm3929_vm3, %v5068_v33  ;;  %v4957_v36 = vpack.c.bf16 %v2914_v34, %v2914_v34  ;;  %v5069_v37 = vpack.c.bf16 %v3026_v35, %v3026_v35 }
 0x2b2   : > { %v2338_v38 = vpop.f32.mrb[212].mxu0  ;;  %v2786_v39 = vpop.f32.mrb[212].mxu1 }
 0x2b3   : > { %4035 = vst.msk [vmem:[%s5886_s18 + $0x1a4] sm:$0xf] %vm3929_vm3, %v4957_v36  ;;  %4147 = vst.msk [vmem:[%s5886_s18 + $0x364] sm:$0xf] %vm3929_vm3, %v5069_v37  ;;  %v2339_v40 = vadd.f32 %v6454_v26, %v2338_v38  ;;  %v2787_v41 = vadd.f32 %v6454_v26, %v2786_v39  ;;  %v2340_v42 = vpop.f32.mrb[213].mxu0  ;;  %v2788_v43 = vpop.f32.mrb[213].mxu1 }
 0x2b4   : > { %v2341_v44 = vpop.f32.mrb[214].mxu0  ;;  %v2789_v45 = vpop.f32.mrb[214].mxu1 }
 0x2b5   : > { %v2915_v46 = vmax.f32 %v2339_v40, 0.0  ;;  %v3027_v47 = vmax.f32 %v2787_v41, 0.0  ;;  %v2342_v48 = vadd.f32 %v6454_v26, %v2341_v44  ;;  %v2790_v49 = vadd.f32 %v6454_v26, %v2789_v45  ;;  %v2343_v50 = vpop.f32.mrb[215].mxu0  ;;  %v2791_v51 = vpop.f32.mrb[215].mxu1 }
 0x2b7   : > { %v4958_v52 = vpack.c.bf16 %v2915_v46, %v2915_v46  ;;  %v5070_v53 = vpack.c.bf16 %v3027_v47, %v3027_v47  ;;  %v2916_v54 = vmax.f32 %v2342_v48, 0.0  ;;  %v3028_v55 = vmax.f32 %v2790_v49, 0.0 }
 0x2b9   : > { %4036 = vst.msk [vmem:[%s5886_s18 + $0x1a8] sm:$0xf] %vm3929_vm3, %v4958_v52  ;;  %4148 = vst.msk [vmem:[%s5886_s18 + $0x368] sm:$0xf] %vm3929_vm3, %v5070_v53  ;;  %v4959_v56 = vpack.c.bf16 %v2916_v54, %v2916_v54  ;;  %v5071_v57 = vpack.c.bf16 %v3028_v55, %v3028_v55 }
 0x2ba   : > { %v2346_v58 = vpop.f32.mrb[216].mxu0  ;;  %v2794_v59 = vpop.f32.mrb[216].mxu1 }
 0x2bb   : > { %4037 = vst.msk [vmem:[%s5886_s18 + $0x1ac] sm:$0xf] %vm3929_vm3, %v4959_v56  ;;  %4149 = vst.msk [vmem:[%s5886_s18 + $0x36c] sm:$0xf] %vm3929_vm3, %v5071_v57  ;;  %v2347_v60 = vadd.f32 %v6454_v26, %v2346_v58  ;;  %v2795_v62 = vadd.f32 %v6454_v26, %v2794_v59  ;;  %v2348_v63 = vpop.f32.mrb[217].mxu0  ;;  %v2796_v0 = vpop.f32.mrb[217].mxu1 }
 0x2bc   : > { %v2349_v1 = vpop.f32.mrb[218].mxu0  ;;  %v2797_v61 = vpop.f32.mrb[218].mxu1 }
 0x2bd   : > { %v2917_v2 = vmax.f32 %v2347_v60, 0.0  ;;  %v3029_v3 = vmax.f32 %v2795_v62, 0.0  ;;  %v2350_v4 = vadd.f32 %v6454_v26, %v2349_v1  ;;  %v2798_v6 = vadd.f32 %v6454_v26, %v2797_v61  ;;  %v2351_v7 = vpop.f32.mrb[219].mxu0  ;;  %v2799_v8 = vpop.f32.mrb[219].mxu1  ;;  %v5505_v26 = vld [vmem:[%s6788_s2] ss:$0 sm:$0xff] }
 0x2bf   : > { %v4960_v9 = vpack.c.bf16 %v2917_v2, %v2917_v2  ;;  %v5072_v10 = vpack.c.bf16 %v3029_v3, %v3029_v3  ;;  %v2918_v11 = vmax.f32 %v2350_v4, 0.0  ;;  %v3030_v12 = vmax.f32 %v2798_v6, 0.0 }
 0x2c1   : > { %4038 = vst.msk [vmem:[%s5886_s18 + $0x1b0] sm:$0xf] %vm3929_vm3, %v4960_v9  ;;  %4150 = vst.msk [vmem:[%s5886_s18 + $0x370] sm:$0xf] %vm3929_vm3, %v5072_v10  ;;  %v4961_v13 = vpack.c.bf16 %v2918_v11, %v2918_v11  ;;  %v5073_v14 = vpack.c.bf16 %v3030_v12, %v3030_v12 }
 0x2c2   : > { %v2354_v15 = vpop.f32.mrb[220].mxu0  ;;  %v2802_v16 = vpop.f32.mrb[220].mxu1 }
 0x2c3   : > { %4039 = vst.msk [vmem:[%s5886_s18 + $0x1b4] sm:$0xf] %vm3929_vm3, %v4961_v13  ;;  %4151 = vst.msk [vmem:[%s5886_s18 + $0x374] sm:$0xf] %vm3929_vm3, %v5073_v14  ;;  %v2355_v17 = vadd.f32 %v5505_v26, %v2354_v15  ;;  %v2803_v18 = vadd.f32 %v5505_v26, %v2802_v16  ;;  %v2356_v19 = vpop.f32.mrb[221].mxu0  ;;  %v2804_v20 = vpop.f32.mrb[221].mxu1 }
 0x2c4   : > { %v2357_v21 = vpop.f32.mrb[222].mxu0  ;;  %v2805_v22 = vpop.f32.mrb[222].mxu1 }
 0x2c5   : > { %v2919_v23 = vmax.f32 %v2355_v17, 0.0  ;;  %v3031_v24 = vmax.f32 %v2803_v18, 0.0  ;;  %v2358_v25 = vadd.f32 %v5505_v26, %v2357_v21  ;;  %v2806_v27 = vadd.f32 %v5505_v26, %v2805_v22  ;;  %v2359_v28 = vpop.f32.mrb[223].mxu0  ;;  %v2807_v5 = vpop.f32.mrb[223].mxu1 }
 0x2c7   : > { %v4962_v29 = vpack.c.bf16 %v2919_v23, %v2919_v23  ;;  %v5074_v30 = vpack.c.bf16 %v3031_v24, %v3031_v24  ;;  %v2920_v31 = vmax.f32 %v2358_v25, 0.0  ;;  %v3032_v32 = vmax.f32 %v2806_v27, 0.0 }
 0x2c9   : > { %4040 = vst.msk [vmem:[%s5886_s18 + $0x1b8] sm:$0xf] %vm3929_vm3, %v4962_v29  ;;  %4152 = vst.msk [vmem:[%s5886_s18 + $0x378] sm:$0xf] %vm3929_vm3, %v5074_v30  ;;  %v4963_v33 = vpack.c.bf16 %v2920_v31, %v2920_v31  ;;  %v5075_v34 = vpack.c.bf16 %v3032_v32, %v3032_v32 }
 0x2cb   : > { %4041 = vst.msk [vmem:[%s5886_s18 + $0x1bc] sm:$0xf] %vm3929_vm3, %v4963_v33  ;;  %4153 = vst.msk [vmem:[%s5886_s18 + $0x37c] sm:$0xf] %vm3929_vm3, %v5075_v34 }
 0x2cc   : > { %5519 = shalt.err (!%p5516_p5)
}
 0x2cd   : > { %s5520_s7 = scalar_lea.hbm %s6726_s5, 14336  ;;  %s5524_s21 = scalar_lea.hbm %s6789_s3, 200704 }
 0x2ce   : > { %p5521_p6 = scmp.ne.s32.totalorder %s6726_s5, %s5520_s7  ;;  %p5525_p10 = scmp.lt.u32.totalorder %s6726_s5, %s6789_s3 }
 0x2cf   : > { %p5526_p11 = scmp.lt.u32.totalorder %s5524_s21, %s5520_s7  ;;  %p5528_p13 = scmp.lt.u32.totalorder %s5520_s7, %s6726_s5 }
 0x2d0   : > { %p5522_p7 = pnand %p5521_p6, %p5651_p4 }
 0x2d1   : > { %p5527_p12 = por %p5526_p11, %p5525_p10 }
 0x2d2   : > { %p5523_p9 = pneg %p5522_p7 }
 0x2d3   : > { %p5529_p0 = por %p5528_p13, %p5527_p12 }
 0x2d5   : > { %p5530_p1 = pnand %p5529_p0, %p5523_p9 }
 0x2d7   : > { %5533 = shalt.err (!%p5530_p1)
}
 0x2d8   : > { %s5589_s26 = smov 64   ;;  %s5590_s27 = smov 4  }
 0x2d9   : > { %5098 = dma.vmem_to_hbm [thread:$0]  (%p5651_p4), %s6728_s29, 14336, %s6726_s5, %s6740_s15, %s5589_s26, %s5589_s26, %s5590_s27  }
 0x2da PF: > { %p5104_p2 = scmp.ge.s32.totalorder %s5584_s17, 2  ;;  %s4184_s28 = sand.u32 1, %s5564_s12  }
 0x2db   : > { %s4185_s30 = scalar_lea.sflag [#allocation3], %s4184_s28 }
 0x2dc   : > { %p5101_p3 = pnand %p5104_p2, %p5658_p8 }
 0x2de   : > { %5559 = dma.done.wait (!%p5101_p3), %s4185_s30, 14336  }
 0x2df   : > { %5561 = vsyncadd (!%p5101_p3), %s4185_s30, 4294952960  ;;  %s16_s17 = sadd.s32 1, %s5584_s17   ;;  %s6792_s12 = smov %s5568_s13 }
 0x2e0   : > { %p13_p5 = scmp.ge.s32.totalorder %s16_s17, 16   ;;  %s6793_s13 = smov %s5572_s14 }
 0x2e1   : > { %s6794_s14 = smov %s5664_s25  ;;  %s6795_s15 = smov %s5580_s16 }
 0x2e2   : > { %s6796_s16 = smov %s6798_s20  ;;  %15 = sbr.rel (!%p13_p5) target bundleno = 4 (0x4), region = 73 }
 0x2e9   :  { %4190 = vsyncpa [#allocation3], 1 }
 0x2ea   :  { %4192 = vsyncpa [#allocation3 + $0x1], 1 }

</bundles_post_ra>
